<compile_context>
chip_gen: v7x
topology: tpu7x:2x2x1
jax: 0.10.0
libtpu: 0.0.40
codegen_flags: <defaults>
</compile_context>

<pallas_src>
import jax
import jax.numpy as jnp
from jax.experimental import pallas as pl
from jax.experimental.pallas import tpu as pltpu

# ----------------------------- model sizes (small) ---------------------------
VOCAB = 50
EMBED = 32
HIDDEN = 32
NUM_LAYERS = 2
BATCH = 4
SEQ = 8


# ----------------------------- Pallas kernel ---------------------------------
def _gru_cell(gi_ref, row, off, h, whh, bhn, m, H, B):
    """One GRU step for one direction.

    gi_ref : [T*B, 6H] precomputed input projection (+ folded r/z biases).
    row    : static row offset (t*B) for this timestep.
    off    : 0 (forward half) or 3H (backward half).
    h      : [B, H] previous hidden.  whh: [H, 3H].  bhn: [1, H] (b_hn only).
    m      : [B, 1] validity mask (1 = real token, 0 = padding -> freeze h).
    """
    gh = jnp.dot(h, whh, preferred_element_type=jnp.float32)          # [B, 3H]
    gi_r = gi_ref[row:row + B, off + 0 * H:off + 1 * H]
    gi_z = gi_ref[row:row + B, off + 1 * H:off + 2 * H]
    gi_n = gi_ref[row:row + B, off + 2 * H:off + 3 * H]
    r = jax.nn.sigmoid(gi_r + gh[:, 0 * H:1 * H])
    z = jax.nn.sigmoid(gi_z + gh[:, 1 * H:2 * H])
    n = jnp.tanh(gi_n + r * (gh[:, 2 * H:3 * H] + bhn))
    h_new = (1.0 - z) * n + z * h
    return m * h_new + (1.0 - m) * h


def fused_bigru_kernel(x_ref, len_ref,
                       wih1_ref, whh1f_ref, whh1b_ref, bgi1_ref, bhn1_ref,
                       wih2_ref, whh2f_ref, whh2b_ref, bgi2_ref, bhn2_ref,
                       wout_ref, bout_ref,
                       out_ref,
                       gi1_ref, gi2_ref, out1_ref):
    TB, _ = x_ref.shape
    H = whh1f_ref.shape[0]
    B = len_ref.shape[0]
    T = TB // B

    # validity masks, one [B,1] per timestep (lengths resident in VMEM)
    lens = len_ref[...]                                               # [B, 1] f32
    masks = [(lens > float(t)).astype(jnp.float32) for t in range(T)]

    # ---------------- layer 1: single input projection, both directions -------
    gi1_ref[...] = (jnp.dot(x_ref[...], wih1_ref[...],
                            preferred_element_type=jnp.float32) + bgi1_ref[...])
    whh1f = whh1f_ref[...]
    whh1b = whh1b_ref[...]
    bhn1f = bhn1_ref[:, 0:H]
    bhn1b = bhn1_ref[:, H:2 * H]

    h1f = jnp.zeros((B, H), jnp.float32)
    h1b = jnp.zeros((B, H), jnp.float32)
    for s in range(T):                      # T=8: fully unrolled recurrence
        tf, tb = s, T - 1 - s
        h1f = _gru_cell(gi1_ref, tf * B, 0,     h1f, whh1f, bhn1f, masks[tf], H, B)
        h1b = _gru_cell(gi1_ref, tb * B, 3 * H, h1b, whh1b, bhn1b, masks[tb], H, B)
        out1_ref[tf * B:(tf + 1) * B, 0:H] = h1f
        out1_ref[tb * B:(tb + 1) * B, H:2 * H] = h1b

    # ---------------- layer 2 --------------------------------------------------
    gi2_ref[...] = (jnp.dot(out1_ref[...], wih2_ref[...],
                            preferred_element_type=jnp.float32) + bgi2_ref[...])
    whh2f = whh2f_ref[...]
    whh2b = whh2b_ref[...]
    bhn2f = bhn2_ref[:, 0:H]
    bhn2b = bhn2_ref[:, H:2 * H]

    h2f = jnp.zeros((B, H), jnp.float32)
    h2b = jnp.zeros((B, H), jnp.float32)
    for s in range(T):
        tf, tb = s, T - 1 - s
        h2f = _gru_cell(gi2_ref, tf * B, 0,     h2f, whh2f, bhn2f, masks[tf], H, B)
        h2b = _gru_cell(gi2_ref, tb * B, 3 * H, h2b, whh2b, bhn2b, masks[tb], H, B)

    # ---------------- head (fused linear) --------------------------------------
    out_ref[...] = (jnp.dot(h2f, wout_ref[0:H, :], preferred_element_type=jnp.float32)
                    + jnp.dot(h2b, wout_ref[H:2 * H, :], preferred_element_type=jnp.float32)
                    + bout_ref[...])


def bigru_head(x_flat, lens, wih1, whh1f, whh1b, bgi1, bhn1,
               wih2, whh2f, whh2b, bgi2, bhn2, w_out, b_out):
    """x_flat: [T*B, E] time-major flattened embeddings, lens: [B, 1] f32."""
    TB, _ = x_flat.shape
    B = lens.shape[0]
    H = whh1f.shape[0]
    args = (x_flat, lens, wih1, whh1f, whh1b, bgi1, bhn1,
            wih2, whh2f, whh2b, bgi2, bhn2, w_out, b_out)
    in_specs = [pl.BlockSpec(a.shape, lambda i: (0, 0)) for a in args]
    return pl.pallas_call(
        fused_bigru_kernel,
        out_shape=jax.ShapeDtypeStruct((B, 1), jnp.float32),
        grid_spec=pltpu.PrefetchScalarGridSpec(
            num_scalar_prefetch=0,
            grid=(1,),
            in_specs=in_specs,
            out_specs=pl.BlockSpec((B, 1), lambda i: (0, 0)),
            scratch_shapes=[
                pltpu.VMEM((TB, 6 * H), jnp.float32),   # gi1
                pltpu.VMEM((TB, 6 * H), jnp.float32),   # gi2
                pltpu.VMEM((TB, 2 * H), jnp.float32),   # layer-1 outputs [f|b]
            ],
        ),
        compiler_params=pltpu.CompilerParams(
            dimension_semantics=("arbitrary",)),
    )(*args)


# ----------------------------- parameter init --------------------------------
def init_params(key):
    ks = jax.random.split(key, 2 + NUM_LAYERS * 8 + 2)
    k_iter = iter(ks)
    scale = 1.0 / jnp.sqrt(jnp.float32(HIDDEN))

    emb = jax.random.normal(next(k_iter), (VOCAB, EMBED), jnp.float32) * 0.1
    emb = emb.at[0].set(0.0)  # padding_idx=0

    gru_layers = []
    for layer in range(NUM_LAYERS):
        d_in = EMBED if layer == 0 else 2 * HIDDEN
        p = {}
        for direction in ("f", "b"):
            p["wih_" + direction] = jax.random.uniform(
                next(k_iter), (d_in, 3 * HIDDEN), jnp.float32, -scale, scale)
            p["whh_" + direction] = jax.random.uniform(
                next(k_iter), (HIDDEN, 3 * HIDDEN), jnp.float32, -scale, scale)
            p["bih_" + direction] = jax.random.uniform(
                next(k_iter), (1, 3 * HIDDEN), jnp.float32, -scale, scale)
            p["bhh_" + direction] = jax.random.uniform(
                next(k_iter), (1, 3 * HIDDEN), jnp.float32, -scale, scale)
        gru_layers.append(p)

    w_out = jax.random.uniform(next(k_iter), (2 * HIDDEN, 1), jnp.float32,
                               -scale, scale)
    b_out = jax.random.uniform(next(k_iter), (1, 1), jnp.float32, -scale, scale)
    return {"emb": emb, "gru": gru_layers, "w_out": w_out, "b_out": b_out}


# ----------------------------- forward (glue in JAX) --------------------------
@jax.jit
def forward(params, x_ids, lengths):
    H = HIDDEN
    # embedding lookup (glue; gather has no clean tiny-Pallas equivalent)
    emb = jnp.take(params["emb"], x_ids, axis=0)            # [B, T, E]
    x = jnp.transpose(emb, (1, 0, 2)).astype(jnp.float32)   # [T, B, E] time-major
    T, B, E = x.shape
    x_flat = x.reshape(T * B, E)
    lens = lengths.astype(jnp.float32).reshape(B, 1)

    fused = []
    for layer in range(NUM_LAYERS):
        p = params["gru"][layer]
        # concat forward|backward input weights -> one [D_in, 6H] matmul
        wih = jnp.concatenate([p["wih_f"], p["wih_b"]], axis=1)
        # fold r/z recurrent biases into the input-projection bias
        bgi = jnp.concatenate(
            [p["bih_f"][:, :2 * H] + p["bhh_f"][:, :2 * H], p["bih_f"][:, 2 * H:],
             p["bih_b"][:, :2 * H] + p["bhh_b"][:, :2 * H], p["bih_b"][:, 2 * H:]],
            axis=1)                                                     # [1, 6H]
        bhn = jnp.concatenate([p["bhh_f"][:, 2 * H:], p["bhh_b"][:, 2 * H:]],
                              axis=1)                                   # [1, 2H]
        fused.append((wih, p["whh_f"], p["whh_b"], bgi, bhn))

    logits = bigru_head(x_flat, lens, *fused[0], *fused[1],
                        params["w_out"], params["b_out"])               # [B, 1]
    # dropout is identity in eval mode
    return logits[:, 0]                                                 # [B]


# ----------------------------- pure-JAX reference -----------------------------
def gru_pass_ref(x_seq, mask, wih, whh, bih, bhh):
    H = whh.shape[0]

    def step(h, xm):
        x, m = xm
        gi = x @ wih + bih
        gh = h @ whh + bhh
        r = jax.nn.sigmoid(gi[:, :H] + gh[:, :H])
        z = jax.nn.sigmoid(gi[:, H:2 * H] + gh[:, H:2 * H])
        n = jnp.tanh(gi[:, 2 * H:] + r * gh[:, 2 * H:])
        h_new = (1.0 - z) * n + z * h
        h_upd = m * h_new + (1.0 - m) * h
        return h_upd, h_upd

    h0 = jnp.zeros((x_seq.shape[1], H), jnp.float32)
    h_fin, outs = jax.lax.scan(step, h0, (x_seq, mask))
    return outs, h_fin


def forward_ref(params, x_ids, lengths):
    emb = jnp.take(params["emb"], x_ids, axis=0)
    x = jnp.transpose(emb, (1, 0, 2)).astype(jnp.float32)
    T = x.shape[0]
    mask = (jnp.arange(T)[:, None] < lengths[None, :]).astype(jnp.float32)[..., None]
    layer_in = x
    h_fwd = h_bwd = None
    for layer in range(NUM_LAYERS):
        p = params["gru"][layer]
        out_f, h_fwd = gru_pass_ref(layer_in, mask,
                                    p["wih_f"], p["whh_f"], p["bih_f"], p["bhh_f"])
        out_b_rev, h_bwd = gru_pass_ref(layer_in[::-1], mask[::-1],
                                        p["wih_b"], p["whh_b"], p["bih_b"], p["bhh_b"])
        layer_in = jnp.concatenate([out_f, out_b_rev[::-1]], axis=-1)
    h_cat = jnp.concatenate([h_fwd, h_bwd], axis=-1)
    return (h_cat @ params["w_out"] + params["b_out"])[:, 0]


# ----------------------------- main -------------------------------------------
if __name__ == "__main__":
    key = jax.random.PRNGKey(0)
    k_param, k_tok = jax.random.split(key)
    params = init_params(k_param)

    lengths = jnp.array([8, 5, 3, 6], dtype=jnp.int32)           # [B]
    tok = jax.random.randint(k_tok, (BATCH, SEQ), 1, VOCAB, jnp.int32)
    pos = jnp.arange(SEQ)[None, :]
    x_ids = jnp.where(pos < lengths[:, None], tok, 0)            # pad with 0

    out = forward(params, x_ids, lengths)
    out = jax.block_until_ready(out)

    ref = jax.block_until_ready(forward_ref(params, x_ids, lengths))
    assert out.shape == (BATCH,)
    assert jnp.allclose(out, ref, atol=1e-4, rtol=1e-4), (out, ref)

    print("KERNEL_OK")
</pallas_src>

<mosaic_0001>
module attributes {stable_mosaic.version = 11 : i64} {
  func.func @fused_bigru_kernel(%arg0: i32, %arg1: memref<32x32xf32, #tpu.memory_space<vmem>>, %arg2: memref<4x1xf32, #tpu.memory_space<vmem>>, %arg3: memref<32x192xf32, #tpu.memory_space<vmem>>, %arg4: memref<32x96xf32, #tpu.memory_space<vmem>>, %arg5: memref<32x96xf32, #tpu.memory_space<vmem>>, %arg6: memref<1x192xf32, #tpu.memory_space<vmem>>, %arg7: memref<1x64xf32, #tpu.memory_space<vmem>>, %arg8: memref<64x192xf32, #tpu.memory_space<vmem>>, %arg9: memref<32x96xf32, #tpu.memory_space<vmem>>, %arg10: memref<32x96xf32, #tpu.memory_space<vmem>>, %arg11: memref<1x192xf32, #tpu.memory_space<vmem>>, %arg12: memref<1x64xf32, #tpu.memory_space<vmem>>, %arg13: memref<64x1xf32, #tpu.memory_space<vmem>>, %arg14: memref<1x1xf32, #tpu.memory_space<vmem>>, %arg15: memref<4x1xf32, #tpu.memory_space<vmem>>, %arg16: memref<32x192xf32, #tpu.memory_space<vmem>>, %arg17: memref<32x192xf32, #tpu.memory_space<vmem>>, %arg18: memref<32x64xf32, #tpu.memory_space<vmem>>) attributes {dimension_semantics = [#tpu.dimension_semantics<arbitrary>], iteration_bounds = array<i64: 1>, scalar_prefetch = 0 : i64, scratch_operands = 3 : i64, tpu.core_type = #tpu.core_type<tc>, window_params = [{pipeline_mode = #tpu.pipeline_mode<synchronous>, transform_indices = @transform_0, window_bounds = array<i64: 32, 32>}, {pipeline_mode = #tpu.pipeline_mode<synchronous>, transform_indices = @transform_1, window_bounds = array<i64: 4, 1>}, {pipeline_mode = #tpu.pipeline_mode<synchronous>, transform_indices = @transform_2, window_bounds = array<i64: 32, 192>}, {pipeline_mode = #tpu.pipeline_mode<synchronous>, transform_indices = @transform_3, window_bounds = array<i64: 32, 96>}, {pipeline_mode = #tpu.pipeline_mode<synchronous>, transform_indices = @transform_4, window_bounds = array<i64: 32, 96>}, {pipeline_mode = #tpu.pipeline_mode<synchronous>, transform_indices = @transform_5, window_bounds = array<i64: 1, 192>}, {pipeline_mode = #tpu.pipeline_mode<synchronous>, transform_indices = @transform_6, window_bounds = array<i64: 1, 64>}, {pipeline_mode = #tpu.pipeline_mode<synchronous>, transform_indices = @transform_7, window_bounds = array<i64: 64, 192>}, {pipeline_mode = #tpu.pipeline_mode<synchronous>, transform_indices = @transform_8, window_bounds = array<i64: 32, 96>}, {pipeline_mode = #tpu.pipeline_mode<synchronous>, transform_indices = @transform_9, window_bounds = array<i64: 32, 96>}, {pipeline_mode = #tpu.pipeline_mode<synchronous>, transform_indices = @transform_10, window_bounds = array<i64: 1, 192>}, {pipeline_mode = #tpu.pipeline_mode<synchronous>, transform_indices = @transform_11, window_bounds = array<i64: 1, 64>}, {pipeline_mode = #tpu.pipeline_mode<synchronous>, transform_indices = @transform_12, window_bounds = array<i64: 64, 1>}, {pipeline_mode = #tpu.pipeline_mode<synchronous>, transform_indices = @transform_13, window_bounds = array<i64: 1, 1>}, {pipeline_mode = #tpu.pipeline_mode<synchronous>, transform_indices = @transform_14, window_bounds = array<i64: 4, 1>}]} {
    %c0 = arith.constant 0 : index
    %c0_0 = arith.constant 0 : index
    %0 = vector.load %arg2[%c0, %c0_0] : memref<4x1xf32, #tpu.memory_space<vmem>>, vector<4x1xf32>
    %cst = arith.constant 0.000000e+00 : f32
    %1 = vector.broadcast %cst : f32 to vector<4x1xf32>
    %2 = arith.cmpf ogt, %0, %1 : vector<4x1xf32>
    %3 = arith.extui %2 : vector<4x1xi1> to vector<4x1xi32>
    %4 = arith.sitofp %3 : vector<4x1xi32> to vector<4x1xf32>
    %cst_1 = arith.constant 1.000000e+00 : f32
    %5 = vector.broadcast %cst_1 : f32 to vector<4x1xf32>
    %6 = arith.cmpf ogt, %0, %5 : vector<4x1xf32>
    %7 = arith.extui %6 : vector<4x1xi1> to vector<4x1xi32>
    %8 = arith.sitofp %7 : vector<4x1xi32> to vector<4x1xf32>
    %cst_2 = arith.constant 2.000000e+00 : f32
    %9 = vector.broadcast %cst_2 : f32 to vector<4x1xf32>
    %10 = arith.cmpf ogt, %0, %9 : vector<4x1xf32>
    %11 = arith.extui %10 : vector<4x1xi1> to vector<4x1xi32>
    %12 = arith.sitofp %11 : vector<4x1xi32> to vector<4x1xf32>
    %cst_3 = arith.constant 3.000000e+00 : f32
    %13 = vector.broadcast %cst_3 : f32 to vector<4x1xf32>
    %14 = arith.cmpf ogt, %0, %13 : vector<4x1xf32>
    %15 = arith.extui %14 : vector<4x1xi1> to vector<4x1xi32>
    %16 = arith.sitofp %15 : vector<4x1xi32> to vector<4x1xf32>
    %cst_4 = arith.constant 4.000000e+00 : f32
    %17 = vector.broadcast %cst_4 : f32 to vector<4x1xf32>
    %18 = arith.cmpf ogt, %0, %17 : vector<4x1xf32>
    %19 = arith.extui %18 : vector<4x1xi1> to vector<4x1xi32>
    %20 = arith.sitofp %19 : vector<4x1xi32> to vector<4x1xf32>
    %cst_5 = arith.constant 5.000000e+00 : f32
    %21 = vector.broadcast %cst_5 : f32 to vector<4x1xf32>
    %22 = arith.cmpf ogt, %0, %21 : vector<4x1xf32>
    %23 = arith.extui %22 : vector<4x1xi1> to vector<4x1xi32>
    %24 = arith.sitofp %23 : vector<4x1xi32> to vector<4x1xf32>
    %cst_6 = arith.constant 6.000000e+00 : f32
    %25 = vector.broadcast %cst_6 : f32 to vector<4x1xf32>
    %26 = arith.cmpf ogt, %0, %25 : vector<4x1xf32>
    %27 = arith.extui %26 : vector<4x1xi1> to vector<4x1xi32>
    %28 = arith.sitofp %27 : vector<4x1xi32> to vector<4x1xf32>
    %cst_7 = arith.constant 7.000000e+00 : f32
    %29 = vector.broadcast %cst_7 : f32 to vector<4x1xf32>
    %30 = arith.cmpf ogt, %0, %29 : vector<4x1xf32>
    %31 = arith.extui %30 : vector<4x1xi1> to vector<4x1xi32>
    %32 = arith.sitofp %31 : vector<4x1xi32> to vector<4x1xf32>
    %c0_8 = arith.constant 0 : index
    %c0_9 = arith.constant 0 : index
    %33 = vector.load %arg1[%c0_8, %c0_9] : memref<32x32xf32, #tpu.memory_space<vmem>>, vector<32x32xf32>
    %c0_10 = arith.constant 0 : index
    %c0_11 = arith.constant 0 : index
    %34 = vector.load %arg3[%c0_10, %c0_11] : memref<32x192xf32, #tpu.memory_space<vmem>>, vector<32x192xf32>
    %cst_12 = arith.constant dense<0.000000e+00> : vector<32x192xf32>
    %35 = tpu.matmul %33, %34, %cst_12 {dimension_numbers = #tpu.dot_dimension_numbers<[1], [0], [0], [1], [0, 0, 1, 1], [], []>} : vector<32x32xf32>, vector<32x192xf32>, vector<32x192xf32> -> vector<32x192xf32>
    %c0_13 = arith.constant 0 : index
    %c0_14 = arith.constant 0 : index
    %36 = vector.load %arg6[%c0_13, %c0_14] : memref<1x192xf32, #tpu.memory_space<vmem>>, vector<1x192xf32>
    %37 = vector.broadcast %36 : vector<1x192xf32> to vector<32x192xf32>
    %38 = arith.addf %35, %37 : vector<32x192xf32>
    %c0_15 = arith.constant 0 : index
    %c0_16 = arith.constant 0 : index
    %39 = vector.load %arg16[%c0_15, %c0_16] : memref<32x192xf32, #tpu.memory_space<vmem>>, vector<32x192xf32>
    tpu.vector_store %arg16[%c0_15, %c0_16], %38 {strides = array<i32>} : memref<32x192xf32, #tpu.memory_space<vmem>>, vector<32x192xf32>,
    %c0_17 = arith.constant 0 : index
    %c0_18 = arith.constant 0 : index
    %40 = vector.load %arg4[%c0_17, %c0_18] : memref<32x96xf32, #tpu.memory_space<vmem>>, vector<32x96xf32>
    %c0_19 = arith.constant 0 : index
    %c0_20 = arith.constant 0 : index
    %41 = vector.load %arg5[%c0_19, %c0_20] : memref<32x96xf32, #tpu.memory_space<vmem>>, vector<32x96xf32>
    %c0_21 = arith.constant 0 : index
    %c0_22 = arith.constant 0 : index
    %42 = vector.load %arg7[%c0_21, %c0_22] : memref<1x64xf32, #tpu.memory_space<vmem>>, vector<1x32xf32>
    %c0_23 = arith.constant 0 : index
    %c32 = arith.constant 32 : index
    %43 = vector.load %arg7[%c0_23, %c32] : memref<1x64xf32, #tpu.memory_space<vmem>>, vector<1x32xf32>
    %cst_24 = arith.constant 0.000000e+00 : f32
    %44 = vector.broadcast %cst_24 : f32 to vector<4x32xf32>
    %cst_25 = arith.constant 0.000000e+00 : f32
    %45 = vector.broadcast %cst_25 : f32 to vector<4x32xf32>
    %cst_26 = arith.constant dense<0.000000e+00> : vector<4x96xf32>
    %46 = tpu.matmul %44, %40, %cst_26 {dimension_numbers = #tpu.dot_dimension_numbers<[1], [0], [0], [1], [0, 0, 1, 1], [], []>} : vector<4x32xf32>, vector<32x96xf32>, vector<4x96xf32> -> vector<4x96xf32>
    %c0_27 = arith.constant 0 : index
    %c0_28 = arith.constant 0 : index
    %47 = vector.load %arg16[%c0_27, %c0_28] : memref<32x192xf32, #tpu.memory_space<vmem>>, vector<4x32xf32>
    %c0_29 = arith.constant 0 : index
    %c32_30 = arith.constant 32 : index
    %48 = vector.load %arg16[%c0_29, %c32_30] : memref<32x192xf32, #tpu.memory_space<vmem>>, vector<4x32xf32>
    %c0_31 = arith.constant 0 : index
    %c64 = arith.constant 64 : index
    %49 = vector.load %arg16[%c0_31, %c64] : memref<32x192xf32, #tpu.memory_space<vmem>>, vector<4x32xf32>
    %50 = vector.extract_strided_slice %46 {offsets = [0, 0], sizes = [4, 32], strides = [1, 1]} : vector<4x96xf32> to vector<4x32xf32>
    %51 = arith.addf %47, %50 : vector<4x32xf32>
    %52 = arith.negf %51 : vector<4x32xf32>
    %53 = math.exp %52 : vector<4x32xf32>
    %cst_32 = arith.constant 1.000000e+00 : f32
    %54 = vector.broadcast %cst_32 : f32 to vector<4x32xf32>
    %55 = arith.addf %54, %53 : vector<4x32xf32>
    %56 = arith.divf %54, %55 : vector<4x32xf32>
    %57 = vector.extract_strided_slice %46 {offsets = [0, 32], sizes = [4, 32], strides = [1, 1]} : vector<4x96xf32> to vector<4x32xf32>
    %58 = arith.addf %48, %57 : vector<4x32xf32>
    %59 = arith.negf %58 : vector<4x32xf32>
    %60 = math.exp %59 : vector<4x32xf32>
    %cst_33 = arith.constant 1.000000e+00 : f32
    %61 = vector.broadcast %cst_33 : f32 to vector<4x32xf32>
    %62 = arith.addf %61, %60 : vector<4x32xf32>
    %63 = arith.divf %61, %62 : vector<4x32xf32>
    %64 = vector.extract_strided_slice %46 {offsets = [0, 64], sizes = [4, 32], strides = [1, 1]} : vector<4x96xf32> to vector<4x32xf32>
    %65 = vector.broadcast %42 : vector<1x32xf32> to vector<4x32xf32>
    %66 = arith.addf %64, %65 : vector<4x32xf32>
    %67 = arith.mulf %56, %66 : vector<4x32xf32>
    %68 = arith.addf %49, %67 : vector<4x32xf32>
    %69 = math.tanh %68 : vector<4x32xf32>
    %cst_34 = arith.constant 1.000000e+00 : f32
    %70 = vector.broadcast %cst_34 : f32 to vector<4x32xf32>
    %71 = arith.subf %70, %63 : vector<4x32xf32>
    %72 = arith.mulf %71, %69 : vector<4x32xf32>
    %73 = arith.mulf %63, %44 : vector<4x32xf32>
    %74 = arith.addf %72, %73 : vector<4x32xf32>
    %75 = vector.broadcast %4 : vector<4x1xf32> to vector<4x32xf32>
    %76 = arith.mulf %75, %74 : vector<4x32xf32>
    %cst_35 = arith.constant 1.000000e+00 : f32
    %77 = vector.broadcast %cst_35 : f32 to vector<4x1xf32>
    %78 = arith.subf %77, %4 : vector<4x1xf32>
    %79 = vector.broadcast %78 : vector<4x1xf32> to vector<4x32xf32>
    %80 = arith.mulf %79, %44 : vector<4x32xf32>
    %81 = arith.addf %76, %80 : vector<4x32xf32>
    %cst_36 = arith.constant dense<0.000000e+00> : vector<4x96xf32>
    %82 = tpu.matmul %45, %41, %cst_36 {dimension_numbers = #tpu.dot_dimension_numbers<[1], [0], [0], [1], [0, 0, 1, 1], [], []>} : vector<4x32xf32>, vector<32x96xf32>, vector<4x96xf32> -> vector<4x96xf32>
    %c28 = arith.constant 28 : index
    %c96 = arith.constant 96 : index
    %83 = vector.load %arg16[%c28, %c96] : memref<32x192xf32, #tpu.memory_space<vmem>>, vector<4x32xf32>
    %c28_37 = arith.constant 28 : index
    %c128 = arith.constant 128 : index
    %84 = vector.load %arg16[%c28_37, %c128] : memref<32x192xf32, #tpu.memory_space<vmem>>, vector<4x32xf32>
    %c28_38 = arith.constant 28 : index
    %c160 = arith.constant 160 : index
    %85 = vector.load %arg16[%c28_38, %c160] : memref<32x192xf32, #tpu.memory_space<vmem>>, vector<4x32xf32>
    %86 = vector.extract_strided_slice %82 {offsets = [0, 0], sizes = [4, 32], strides = [1, 1]} : vector<4x96xf32> to vector<4x32xf32>
    %87 = arith.addf %83, %86 : vector<4x32xf32>
    %88 = arith.negf %87 : vector<4x32xf32>
    %89 = math.exp %88 : vector<4x32xf32>
    %cst_39 = arith.constant 1.000000e+00 : f32
    %90 = vector.broadcast %cst_39 : f32 to vector<4x32xf32>
    %91 = arith.addf %90, %89 : vector<4x32xf32>
    %92 = arith.divf %90, %91 : vector<4x32xf32>
    %93 = vector.extract_strided_slice %82 {offsets = [0, 32], sizes = [4, 32], strides = [1, 1]} : vector<4x96xf32> to vector<4x32xf32>
    %94 = arith.addf %84, %93 : vector<4x32xf32>
    %95 = arith.negf %94 : vector<4x32xf32>
    %96 = math.exp %95 : vector<4x32xf32>
    %cst_40 = arith.constant 1.000000e+00 : f32
    %97 = vector.broadcast %cst_40 : f32 to vector<4x32xf32>
    %98 = arith.addf %97, %96 : vector<4x32xf32>
    %99 = arith.divf %97, %98 : vector<4x32xf32>
    %100 = vector.extract_strided_slice %82 {offsets = [0, 64], sizes = [4, 32], strides = [1, 1]} : vector<4x96xf32> to vector<4x32xf32>
    %101 = vector.broadcast %43 : vector<1x32xf32> to vector<4x32xf32>
    %102 = arith.addf %100, %101 : vector<4x32xf32>
    %103 = arith.mulf %92, %102 : vector<4x32xf32>
    %104 = arith.addf %85, %103 : vector<4x32xf32>
    %105 = math.tanh %104 : vector<4x32xf32>
    %cst_41 = arith.constant 1.000000e+00 : f32
    %106 = vector.broadcast %cst_41 : f32 to vector<4x32xf32>
    %107 = arith.subf %106, %99 : vector<4x32xf32>
    %108 = arith.mulf %107, %105 : vector<4x32xf32>
    %109 = arith.mulf %99, %45 : vector<4x32xf32>
    %110 = arith.addf %108, %109 : vector<4x32xf32>
    %111 = vector.broadcast %32 : vector<4x1xf32> to vector<4x32xf32>
    %112 = arith.mulf %111, %110 : vector<4x32xf32>
    %cst_42 = arith.constant 1.000000e+00 : f32
    %113 = vector.broadcast %cst_42 : f32 to vector<4x1xf32>
    %114 = arith.subf %113, %32 : vector<4x1xf32>
    %115 = vector.broadcast %114 : vector<4x1xf32> to vector<4x32xf32>
    %116 = arith.mulf %115, %45 : vector<4x32xf32>
    %117 = arith.addf %112, %116 : vector<4x32xf32>
    %c0_43 = arith.constant 0 : index
    %c0_44 = arith.constant 0 : index
    %118 = vector.load %arg18[%c0_43, %c0_44] : memref<32x64xf32, #tpu.memory_space<vmem>>, vector<4x32xf32>
    tpu.vector_store %arg18[%c0_43, %c0_44], %81 {strides = array<i32>} : memref<32x64xf32, #tpu.memory_space<vmem>>, vector<4x32xf32>,
    %c28_45 = arith.constant 28 : index
    %c32_46 = arith.constant 32 : index
    %119 = vector.load %arg18[%c28_45, %c32_46] : memref<32x64xf32, #tpu.memory_space<vmem>>, vector<4x32xf32>
    tpu.vector_store %arg18[%c28_45, %c32_46], %117 {strides = array<i32>} : memref<32x64xf32, #tpu.memory_space<vmem>>, vector<4x32xf32>,
    %cst_47 = arith.constant dense<0.000000e+00> : vector<4x96xf32>
    %120 = tpu.matmul %81, %40, %cst_47 {dimension_numbers = #tpu.dot_dimension_numbers<[1], [0], [0], [1], [0, 0, 1, 1], [], []>} : vector<4x32xf32>, vector<32x96xf32>, vector<4x96xf32> -> vector<4x96xf32>
    %c4 = arith.constant 4 : index
    %c0_48 = arith.constant 0 : index
    %121 = vector.load %arg16[%c4, %c0_48] : memref<32x192xf32, #tpu.memory_space<vmem>>, vector<4x32xf32>
    %c4_49 = arith.constant 4 : index
    %c32_50 = arith.constant 32 : index
    %122 = vector.load %arg16[%c4_49, %c32_50] : memref<32x192xf32, #tpu.memory_space<vmem>>, vector<4x32xf32>
    %c4_51 = arith.constant 4 : index
    %c64_52 = arith.constant 64 : index
    %123 = vector.load %arg16[%c4_51, %c64_52] : memref<32x192xf32, #tpu.memory_space<vmem>>, vector<4x32xf32>
    %124 = vector.extract_strided_slice %120 {offsets = [0, 0], sizes = [4, 32], strides = [1, 1]} : vector<4x96xf32> to vector<4x32xf32>
    %125 = arith.addf %121, %124 : vector<4x32xf32>
    %126 = arith.negf %125 : vector<4x32xf32>
    %127 = math.exp %126 : vector<4x32xf32>
    %cst_53 = arith.constant 1.000000e+00 : f32
    %128 = vector.broadcast %cst_53 : f32 to vector<4x32xf32>
    %129 = arith.addf %128, %127 : vector<4x32xf32>
    %130 = arith.divf %128, %129 : vector<4x32xf32>
    %131 = vector.extract_strided_slice %120 {offsets = [0, 32], sizes = [4, 32], strides = [1, 1]} : vector<4x96xf32> to vector<4x32xf32>
    %132 = arith.addf %122, %131 : vector<4x32xf32>
    %133 = arith.negf %132 : vector<4x32xf32>
    %134 = math.exp %133 : vector<4x32xf32>
    %cst_54 = arith.constant 1.000000e+00 : f32
    %135 = vector.broadcast %cst_54 : f32 to vector<4x32xf32>
    %136 = arith.addf %135, %134 : vector<4x32xf32>
    %137 = arith.divf %135, %136 : vector<4x32xf32>
    %138 = vector.extract_strided_slice %120 {offsets = [0, 64], sizes = [4, 32], strides = [1, 1]} : vector<4x96xf32> to vector<4x32xf32>
    %139 = vector.broadcast %42 : vector<1x32xf32> to vector<4x32xf32>
    %140 = arith.addf %138, %139 : vector<4x32xf32>
    %141 = arith.mulf %130, %140 : vector<4x32xf32>
    %142 = arith.addf %123, %141 : vector<4x32xf32>
    %143 = math.tanh %142 : vector<4x32xf32>
    %cst_55 = arith.constant 1.000000e+00 : f32
    %144 = vector.broadcast %cst_55 : f32 to vector<4x32xf32>
    %145 = arith.subf %144, %137 : vector<4x32xf32>
    %146 = arith.mulf %145, %143 : vector<4x32xf32>
    %147 = arith.mulf %137, %81 : vector<4x32xf32>
    %148 = arith.addf %146, %147 : vector<4x32xf32>
    %149 = vector.broadcast %8 : vector<4x1xf32> to vector<4x32xf32>
    %150 = arith.mulf %149, %148 : vector<4x32xf32>
    %cst_56 = arith.constant 1.000000e+00 : f32
    %151 = vector.broadcast %cst_56 : f32 to vector<4x1xf32>
    %152 = arith.subf %151, %8 : vector<4x1xf32>
    %153 = vector.broadcast %152 : vector<4x1xf32> to vector<4x32xf32>
    %154 = arith.mulf %153, %81 : vector<4x32xf32>
    %155 = arith.addf %150, %154 : vector<4x32xf32>
    %cst_57 = arith.constant dense<0.000000e+00> : vector<4x96xf32>
    %156 = tpu.matmul %117, %41, %cst_57 {dimension_numbers = #tpu.dot_dimension_numbers<[1], [0], [0], [1], [0, 0, 1, 1], [], []>} : vector<4x32xf32>, vector<32x96xf32>, vector<4x96xf32> -> vector<4x96xf32>
    %c24 = arith.constant 24 : index
    %c96_58 = arith.constant 96 : index
    %157 = vector.load %arg16[%c24, %c96_58] : memref<32x192xf32, #tpu.memory_space<vmem>>, vector<4x32xf32>
    %c24_59 = arith.constant 24 : index
    %c128_60 = arith.constant 128 : index
    %158 = vector.load %arg16[%c24_59, %c128_60] : memref<32x192xf32, #tpu.memory_space<vmem>>, vector<4x32xf32>
    %c24_61 = arith.constant 24 : index
    %c160_62 = arith.constant 160 : index
    %159 = vector.load %arg16[%c24_61, %c160_62] : memref<32x192xf32, #tpu.memory_space<vmem>>, vector<4x32xf32>
    %160 = vector.extract_strided_slice %156 {offsets = [0, 0], sizes = [4, 32], strides = [1, 1]} : vector<4x96xf32> to vector<4x32xf32>
    %161 = arith.addf %157, %160 : vector<4x32xf32>
    %162 = arith.negf %161 : vector<4x32xf32>
    %163 = math.exp %162 : vector<4x32xf32>
    %cst_63 = arith.constant 1.000000e+00 : f32
    %164 = vector.broadcast %cst_63 : f32 to vector<4x32xf32>
    %165 = arith.addf %164, %163 : vector<4x32xf32>
    %166 = arith.divf %164, %165 : vector<4x32xf32>
    %167 = vector.extract_strided_slice %156 {offsets = [0, 32], sizes = [4, 32], strides = [1, 1]} : vector<4x96xf32> to vector<4x32xf32>
    %168 = arith.addf %158, %167 : vector<4x32xf32>
    %169 = arith.negf %168 : vector<4x32xf32>
    %170 = math.exp %169 : vector<4x32xf32>
    %cst_64 = arith.constant 1.000000e+00 : f32
    %171 = vector.broadcast %cst_64 : f32 to vector<4x32xf32>
    %172 = arith.addf %171, %170 : vector<4x32xf32>
    %173 = arith.divf %171, %172 : vector<4x32xf32>
    %174 = vector.extract_strided_slice %156 {offsets = [0, 64], sizes = [4, 32], strides = [1, 1]} : vector<4x96xf32> to vector<4x32xf32>
    %175 = vector.broadcast %43 : vector<1x32xf32> to vector<4x32xf32>
    %176 = arith.addf %174, %175 : vector<4x32xf32>
    %177 = arith.mulf %166, %176 : vector<4x32xf32>
    %178 = arith.addf %159, %177 : vector<4x32xf32>
    %179 = math.tanh %178 : vector<4x32xf32>
    %cst_65 = arith.constant 1.000000e+00 : f32
    %180 = vector.broadcast %cst_65 : f32 to vector<4x32xf32>
    %181 = arith.subf %180, %173 : vector<4x32xf32>
    %182 = arith.mulf %181, %179 : vector<4x32xf32>
    %183 = arith.mulf %173, %117 : vector<4x32xf32>
    %184 = arith.addf %182, %183 : vector<4x32xf32>
    %185 = vector.broadcast %28 : vector<4x1xf32> to vector<4x32xf32>
    %186 = arith.mulf %185, %184 : vector<4x32xf32>
    %cst_66 = arith.constant 1.000000e+00 : f32
    %187 = vector.broadcast %cst_66 : f32 to vector<4x1xf32>
    %188 = arith.subf %187, %28 : vector<4x1xf32>
    %189 = vector.broadcast %188 : vector<4x1xf32> to vector<4x32xf32>
    %190 = arith.mulf %189, %117 : vector<4x32xf32>
    %191 = arith.addf %186, %190 : vector<4x32xf32>
    %c4_67 = arith.constant 4 : index
    %c0_68 = arith.constant 0 : index
    %192 = vector.load %arg18[%c4_67, %c0_68] : memref<32x64xf32, #tpu.memory_space<vmem>>, vector<4x32xf32>
    tpu.vector_store %arg18[%c4_67, %c0_68], %155 {strides = array<i32>} : memref<32x64xf32, #tpu.memory_space<vmem>>, vector<4x32xf32>,
    %c24_69 = arith.constant 24 : index
    %c32_70 = arith.constant 32 : index
    %193 = vector.load %arg18[%c24_69, %c32_70] : memref<32x64xf32, #tpu.memory_space<vmem>>, vector<4x32xf32>
    tpu.vector_store %arg18[%c24_69, %c32_70], %191 {strides = array<i32>} : memref<32x64xf32, #tpu.memory_space<vmem>>, vector<4x32xf32>,
    %cst_71 = arith.constant dense<0.000000e+00> : vector<4x96xf32>
    %194 = tpu.matmul %155, %40, %cst_71 {dimension_numbers = #tpu.dot_dimension_numbers<[1], [0], [0], [1], [0, 0, 1, 1], [], []>} : vector<4x32xf32>, vector<32x96xf32>, vector<4x96xf32> -> vector<4x96xf32>
    %c8 = arith.constant 8 : index
    %c0_72 = arith.constant 0 : index
    %195 = vector.load %arg16[%c8, %c0_72] : memref<32x192xf32, #tpu.memory_space<vmem>>, vector<4x32xf32>
    %c8_73 = arith.constant 8 : index
    %c32_74 = arith.constant 32 : index
    %196 = vector.load %arg16[%c8_73, %c32_74] : memref<32x192xf32, #tpu.memory_space<vmem>>, vector<4x32xf32>
    %c8_75 = arith.constant 8 : index
    %c64_76 = arith.constant 64 : index
    %197 = vector.load %arg16[%c8_75, %c64_76] : memref<32x192xf32, #tpu.memory_space<vmem>>, vector<4x32xf32>
    %198 = vector.extract_strided_slice %194 {offsets = [0, 0], sizes = [4, 32], strides = [1, 1]} : vector<4x96xf32> to vector<4x32xf32>
    %199 = arith.addf %195, %198 : vector<4x32xf32>
    %200 = arith.negf %199 : vector<4x32xf32>
    %201 = math.exp %200 : vector<4x32xf32>
    %cst_77 = arith.constant 1.000000e+00 : f32
    %202 = vector.broadcast %cst_77 : f32 to vector<4x32xf32>
    %203 = arith.addf %202, %201 : vector<4x32xf32>
    %204 = arith.divf %202, %203 : vector<4x32xf32>
    %205 = vector.extract_strided_slice %194 {offsets = [0, 32], sizes = [4, 32], strides = [1, 1]} : vector<4x96xf32> to vector<4x32xf32>
    %206 = arith.addf %196, %205 : vector<4x32xf32>
    %207 = arith.negf %206 : vector<4x32xf32>
    %208 = math.exp %207 : vector<4x32xf32>
    %cst_78 = arith.constant 1.000000e+00 : f32
    %209 = vector.broadcast %cst_78 : f32 to vector<4x32xf32>
    %210 = arith.addf %209, %208 : vector<4x32xf32>
    %211 = arith.divf %209, %210 : vector<4x32xf32>
    %212 = vector.extract_strided_slice %194 {offsets = [0, 64], sizes = [4, 32], strides = [1, 1]} : vector<4x96xf32> to vector<4x32xf32>
    %213 = vector.broadcast %42 : vector<1x32xf32> to vector<4x32xf32>
    %214 = arith.addf %212, %213 : vector<4x32xf32>
    %215 = arith.mulf %204, %214 : vector<4x32xf32>
    %216 = arith.addf %197, %215 : vector<4x32xf32>
    %217 = math.tanh %216 : vector<4x32xf32>
    %cst_79 = arith.constant 1.000000e+00 : f32
    %218 = vector.broadcast %cst_79 : f32 to vector<4x32xf32>
    %219 = arith.subf %218, %211 : vector<4x32xf32>
    %220 = arith.mulf %219, %217 : vector<4x32xf32>
    %221 = arith.mulf %211, %155 : vector<4x32xf32>
    %222 = arith.addf %220, %221 : vector<4x32xf32>
    %223 = vector.broadcast %12 : vector<4x1xf32> to vector<4x32xf32>
    %224 = arith.mulf %223, %222 : vector<4x32xf32>
    %cst_80 = arith.constant 1.000000e+00 : f32
    %225 = vector.broadcast %cst_80 : f32 to vector<4x1xf32>
    %226 = arith.subf %225, %12 : vector<4x1xf32>
    %227 = vector.broadcast %226 : vector<4x1xf32> to vector<4x32xf32>
    %228 = arith.mulf %227, %155 : vector<4x32xf32>
    %229 = arith.addf %224, %228 : vector<4x32xf32>
    %cst_81 = arith.constant dense<0.000000e+00> : vector<4x96xf32>
    %230 = tpu.matmul %191, %41, %cst_81 {dimension_numbers = #tpu.dot_dimension_numbers<[1], [0], [0], [1], [0, 0, 1, 1], [], []>} : vector<4x32xf32>, vector<32x96xf32>, vector<4x96xf32> -> vector<4x96xf32>
    %c20 = arith.constant 20 : index
    %c96_82 = arith.constant 96 : index
    %231 = vector.load %arg16[%c20, %c96_82] : memref<32x192xf32, #tpu.memory_space<vmem>>, vector<4x32xf32>
    %c20_83 = arith.constant 20 : index
    %c128_84 = arith.constant 128 : index
    %232 = vector.load %arg16[%c20_83, %c128_84] : memref<32x192xf32, #tpu.memory_space<vmem>>, vector<4x32xf32>
    %c20_85 = arith.constant 20 : index
    %c160_86 = arith.constant 160 : index
    %233 = vector.load %arg16[%c20_85, %c160_86] : memref<32x192xf32, #tpu.memory_space<vmem>>, vector<4x32xf32>
    %234 = vector.extract_strided_slice %230 {offsets = [0, 0], sizes = [4, 32], strides = [1, 1]} : vector<4x96xf32> to vector<4x32xf32>
    %235 = arith.addf %231, %234 : vector<4x32xf32>
    %236 = arith.negf %235 : vector<4x32xf32>
    %237 = math.exp %236 : vector<4x32xf32>
    %cst_87 = arith.constant 1.000000e+00 : f32
    %238 = vector.broadcast %cst_87 : f32 to vector<4x32xf32>
    %239 = arith.addf %238, %237 : vector<4x32xf32>
    %240 = arith.divf %238, %239 : vector<4x32xf32>
    %241 = vector.extract_strided_slice %230 {offsets = [0, 32], sizes = [4, 32], strides = [1, 1]} : vector<4x96xf32> to vector<4x32xf32>
    %242 = arith.addf %232, %241 : vector<4x32xf32>
    %243 = arith.negf %242 : vector<4x32xf32>
    %244 = math.exp %243 : vector<4x32xf32>
    %cst_88 = arith.constant 1.000000e+00 : f32
    %245 = vector.broadcast %cst_88 : f32 to vector<4x32xf32>
    %246 = arith.addf %245, %244 : vector<4x32xf32>
    %247 = arith.divf %245, %246 : vector<4x32xf32>
    %248 = vector.extract_strided_slice %230 {offsets = [0, 64], sizes = [4, 32], strides = [1, 1]} : vector<4x96xf32> to vector<4x32xf32>
    %249 = vector.broadcast %43 : vector<1x32xf32> to vector<4x32xf32>
    %250 = arith.addf %248, %249 : vector<4x32xf32>
    %251 = arith.mulf %240, %250 : vector<4x32xf32>
    %252 = arith.addf %233, %251 : vector<4x32xf32>
    %253 = math.tanh %252 : vector<4x32xf32>
    %cst_89 = arith.constant 1.000000e+00 : f32
    %254 = vector.broadcast %cst_89 : f32 to vector<4x32xf32>
    %255 = arith.subf %254, %247 : vector<4x32xf32>
    %256 = arith.mulf %255, %253 : vector<4x32xf32>
    %257 = arith.mulf %247, %191 : vector<4x32xf32>
    %258 = arith.addf %256, %257 : vector<4x32xf32>
    %259 = vector.broadcast %24 : vector<4x1xf32> to vector<4x32xf32>
    %260 = arith.mulf %259, %258 : vector<4x32xf32>
    %cst_90 = arith.constant 1.000000e+00 : f32
    %261 = vector.broadcast %cst_90 : f32 to vector<4x1xf32>
    %262 = arith.subf %261, %24 : vector<4x1xf32>
    %263 = vector.broadcast %262 : vector<4x1xf32> to vector<4x32xf32>
    %264 = arith.mulf %263, %191 : vector<4x32xf32>
    %265 = arith.addf %260, %264 : vector<4x32xf32>
    %c8_91 = arith.constant 8 : index
    %c0_92 = arith.constant 0 : index
    %266 = vector.load %arg18[%c8_91, %c0_92] : memref<32x64xf32, #tpu.memory_space<vmem>>, vector<4x32xf32>
    tpu.vector_store %arg18[%c8_91, %c0_92], %229 {strides = array<i32>} : memref<32x64xf32, #tpu.memory_space<vmem>>, vector<4x32xf32>,
    %c20_93 = arith.constant 20 : index
    %c32_94 = arith.constant 32 : index
    %267 = vector.load %arg18[%c20_93, %c32_94] : memref<32x64xf32, #tpu.memory_space<vmem>>, vector<4x32xf32>
    tpu.vector_store %arg18[%c20_93, %c32_94], %265 {strides = array<i32>} : memref<32x64xf32, #tpu.memory_space<vmem>>, vector<4x32xf32>,
    %cst_95 = arith.constant dense<0.000000e+00> : vector<4x96xf32>
    %268 = tpu.matmul %229, %40, %cst_95 {dimension_numbers = #tpu.dot_dimension_numbers<[1], [0], [0], [1], [0, 0, 1, 1], [], []>} : vector<4x32xf32>, vector<32x96xf32>, vector<4x96xf32> -> vector<4x96xf32>
    %c12 = arith.constant 12 : index
    %c0_96 = arith.constant 0 : index
    %269 = vector.load %arg16[%c12, %c0_96] : memref<32x192xf32, #tpu.memory_space<vmem>>, vector<4x32xf32>
    %c12_97 = arith.constant 12 : index
    %c32_98 = arith.constant 32 : index
    %270 = vector.load %arg16[%c12_97, %c32_98] : memref<32x192xf32, #tpu.memory_space<vmem>>, vector<4x32xf32>
    %c12_99 = arith.constant 12 : index
    %c64_100 = arith.constant 64 : index
    %271 = vector.load %arg16[%c12_99, %c64_100] : memref<32x192xf32, #tpu.memory_space<vmem>>, vector<4x32xf32>
    %272 = vector.extract_strided_slice %268 {offsets = [0, 0], sizes = [4, 32], strides = [1, 1]} : vector<4x96xf32> to vector<4x32xf32>
    %273 = arith.addf %269, %272 : vector<4x32xf32>
    %274 = arith.negf %273 : vector<4x32xf32>
    %275 = math.exp %274 : vector<4x32xf32>
    %cst_101 = arith.constant 1.000000e+00 : f32
    %276 = vector.broadcast %cst_101 : f32 to vector<4x32xf32>
    %277 = arith.addf %276, %275 : vector<4x32xf32>
    %278 = arith.divf %276, %277 : vector<4x32xf32>
    %279 = vector.extract_strided_slice %268 {offsets = [0, 32], sizes = [4, 32], strides = [1, 1]} : vector<4x96xf32> to vector<4x32xf32>
    %280 = arith.addf %270, %279 : vector<4x32xf32>
    %281 = arith.negf %280 : vector<4x32xf32>
    %282 = math.exp %281 : vector<4x32xf32>
    %cst_102 = arith.constant 1.000000e+00 : f32
    %283 = vector.broadcast %cst_102 : f32 to vector<4x32xf32>
    %284 = arith.addf %283, %282 : vector<4x32xf32>
    %285 = arith.divf %283, %284 : vector<4x32xf32>
    %286 = vector.extract_strided_slice %268 {offsets = [0, 64], sizes = [4, 32], strides = [1, 1]} : vector<4x96xf32> to vector<4x32xf32>
    %287 = vector.broadcast %42 : vector<1x32xf32> to vector<4x32xf32>
    %288 = arith.addf %286, %287 : vector<4x32xf32>
    %289 = arith.mulf %278, %288 : vector<4x32xf32>
    %290 = arith.addf %271, %289 : vector<4x32xf32>
    %291 = math.tanh %290 : vector<4x32xf32>
    %cst_103 = arith.constant 1.000000e+00 : f32
    %292 = vector.broadcast %cst_103 : f32 to vector<4x32xf32>
    %293 = arith.subf %292, %285 : vector<4x32xf32>
    %294 = arith.mulf %293, %291 : vector<4x32xf32>
    %295 = arith.mulf %285, %229 : vector<4x32xf32>
    %296 = arith.addf %294, %295 : vector<4x32xf32>
    %297 = vector.broadcast %16 : vector<4x1xf32> to vector<4x32xf32>
    %298 = arith.mulf %297, %296 : vector<4x32xf32>
    %cst_104 = arith.constant 1.000000e+00 : f32
    %299 = vector.broadcast %cst_104 : f32 to vector<4x1xf32>
    %300 = arith.subf %299, %16 : vector<4x1xf32>
    %301 = vector.broadcast %300 : vector<4x1xf32> to vector<4x32xf32>
    %302 = arith.mulf %301, %229 : vector<4x32xf32>
    %303 = arith.addf %298, %302 : vector<4x32xf32>
    %cst_105 = arith.constant dense<0.000000e+00> : vector<4x96xf32>
    %304 = tpu.matmul %265, %41, %cst_105 {dimension_numbers = #tpu.dot_dimension_numbers<[1], [0], [0], [1], [0, 0, 1, 1], [], []>} : vector<4x32xf32>, vector<32x96xf32>, vector<4x96xf32> -> vector<4x96xf32>
    %c16 = arith.constant 16 : index
    %c96_106 = arith.constant 96 : index
    %305 = vector.load %arg16[%c16, %c96_106] : memref<32x192xf32, #tpu.memory_space<vmem>>, vector<4x32xf32>
    %c16_107 = arith.constant 16 : index
    %c128_108 = arith.constant 128 : index
    %306 = vector.load %arg16[%c16_107, %c128_108] : memref<32x192xf32, #tpu.memory_space<vmem>>, vector<4x32xf32>
    %c16_109 = arith.constant 16 : index
    %c160_110 = arith.constant 160 : index
    %307 = vector.load %arg16[%c16_109, %c160_110] : memref<32x192xf32, #tpu.memory_space<vmem>>, vector<4x32xf32>
    %308 = vector.extract_strided_slice %304 {offsets = [0, 0], sizes = [4, 32], strides = [1, 1]} : vector<4x96xf32> to vector<4x32xf32>
    %309 = arith.addf %305, %308 : vector<4x32xf32>
    %310 = arith.negf %309 : vector<4x32xf32>
    %311 = math.exp %310 : vector<4x32xf32>
    %cst_111 = arith.constant 1.000000e+00 : f32
    %312 = vector.broadcast %cst_111 : f32 to vector<4x32xf32>
    %313 = arith.addf %312, %311 : vector<4x32xf32>
    %314 = arith.divf %312, %313 : vector<4x32xf32>
    %315 = vector.extract_strided_slice %304 {offsets = [0, 32], sizes = [4, 32], strides = [1, 1]} : vector<4x96xf32> to vector<4x32xf32>
    %316 = arith.addf %306, %315 : vector<4x32xf32>
    %317 = arith.negf %316 : vector<4x32xf32>
    %318 = math.exp %317 : vector<4x32xf32>
    %cst_112 = arith.constant 1.000000e+00 : f32
    %319 = vector.broadcast %cst_112 : f32 to vector<4x32xf32>
    %320 = arith.addf %319, %318 : vector<4x32xf32>
    %321 = arith.divf %319, %320 : vector<4x32xf32>
    %322 = vector.extract_strided_slice %304 {offsets = [0, 64], sizes = [4, 32], strides = [1, 1]} : vector<4x96xf32> to vector<4x32xf32>
    %323 = vector.broadcast %43 : vector<1x32xf32> to vector<4x32xf32>
    %324 = arith.addf %322, %323 : vector<4x32xf32>
    %325 = arith.mulf %314, %324 : vector<4x32xf32>
    %326 = arith.addf %307, %325 : vector<4x32xf32>
    %327 = math.tanh %326 : vector<4x32xf32>
    %cst_113 = arith.constant 1.000000e+00 : f32
    %328 = vector.broadcast %cst_113 : f32 to vector<4x32xf32>
    %329 = arith.subf %328, %321 : vector<4x32xf32>
    %330 = arith.mulf %329, %327 : vector<4x32xf32>
    %331 = arith.mulf %321, %265 : vector<4x32xf32>
    %332 = arith.addf %330, %331 : vector<4x32xf32>
    %333 = vector.broadcast %20 : vector<4x1xf32> to vector<4x32xf32>
    %334 = arith.mulf %333, %332 : vector<4x32xf32>
    %cst_114 = arith.constant 1.000000e+00 : f32
    %335 = vector.broadcast %cst_114 : f32 to vector<4x1xf32>
    %336 = arith.subf %335, %20 : vector<4x1xf32>
    %337 = vector.broadcast %336 : vector<4x1xf32> to vector<4x32xf32>
    %338 = arith.mulf %337, %265 : vector<4x32xf32>
    %339 = arith.addf %334, %338 : vector<4x32xf32>
    %c12_115 = arith.constant 12 : index
    %c0_116 = arith.constant 0 : index
    %340 = vector.load %arg18[%c12_115, %c0_116] : memref<32x64xf32, #tpu.memory_space<vmem>>, vector<4x32xf32>
    tpu.vector_store %arg18[%c12_115, %c0_116], %303 {strides = array<i32>} : memref<32x64xf32, #tpu.memory_space<vmem>>, vector<4x32xf32>,
    %c16_117 = arith.constant 16 : index
    %c32_118 = arith.constant 32 : index
    %341 = vector.load %arg18[%c16_117, %c32_118] : memref<32x64xf32, #tpu.memory_space<vmem>>, vector<4x32xf32>
    tpu.vector_store %arg18[%c16_117, %c32_118], %339 {strides = array<i32>} : memref<32x64xf32, #tpu.memory_space<vmem>>, vector<4x32xf32>,
    %cst_119 = arith.constant dense<0.000000e+00> : vector<4x96xf32>
    %342 = tpu.matmul %303, %40, %cst_119 {dimension_numbers = #tpu.dot_dimension_numbers<[1], [0], [0], [1], [0, 0, 1, 1], [], []>} : vector<4x32xf32>, vector<32x96xf32>, vector<4x96xf32> -> vector<4x96xf32>
    %c16_120 = arith.constant 16 : index
    %c0_121 = arith.constant 0 : index
    %343 = vector.load %arg16[%c16_120, %c0_121] : memref<32x192xf32, #tpu.memory_space<vmem>>, vector<4x32xf32>
    %c16_122 = arith.constant 16 : index
    %c32_123 = arith.constant 32 : index
    %344 = vector.load %arg16[%c16_122, %c32_123] : memref<32x192xf32, #tpu.memory_space<vmem>>, vector<4x32xf32>
    %c16_124 = arith.constant 16 : index
    %c64_125 = arith.constant 64 : index
    %345 = vector.load %arg16[%c16_124, %c64_125] : memref<32x192xf32, #tpu.memory_space<vmem>>, vector<4x32xf32>
    %346 = vector.extract_strided_slice %342 {offsets = [0, 0], sizes = [4, 32], strides = [1, 1]} : vector<4x96xf32> to vector<4x32xf32>
    %347 = arith.addf %343, %346 : vector<4x32xf32>
    %348 = arith.negf %347 : vector<4x32xf32>
    %349 = math.exp %348 : vector<4x32xf32>
    %cst_126 = arith.constant 1.000000e+00 : f32
    %350 = vector.broadcast %cst_126 : f32 to vector<4x32xf32>
    %351 = arith.addf %350, %349 : vector<4x32xf32>
    %352 = arith.divf %350, %351 : vector<4x32xf32>
    %353 = vector.extract_strided_slice %342 {offsets = [0, 32], sizes = [4, 32], strides = [1, 1]} : vector<4x96xf32> to vector<4x32xf32>
    %354 = arith.addf %344, %353 : vector<4x32xf32>
    %355 = arith.negf %354 : vector<4x32xf32>
    %356 = math.exp %355 : vector<4x32xf32>
    %cst_127 = arith.constant 1.000000e+00 : f32
    %357 = vector.broadcast %cst_127 : f32 to vector<4x32xf32>
    %358 = arith.addf %357, %356 : vector<4x32xf32>
    %359 = arith.divf %357, %358 : vector<4x32xf32>
    %360 = vector.extract_strided_slice %342 {offsets = [0, 64], sizes = [4, 32], strides = [1, 1]} : vector<4x96xf32> to vector<4x32xf32>
    %361 = vector.broadcast %42 : vector<1x32xf32> to vector<4x32xf32>
    %362 = arith.addf %360, %361 : vector<4x32xf32>
    %363 = arith.mulf %352, %362 : vector<4x32xf32>
    %364 = arith.addf %345, %363 : vector<4x32xf32>
    %365 = math.tanh %364 : vector<4x32xf32>
    %cst_128 = arith.constant 1.000000e+00 : f32
    %366 = vector.broadcast %cst_128 : f32 to vector<4x32xf32>
    %367 = arith.subf %366, %359 : vector<4x32xf32>
    %368 = arith.mulf %367, %365 : vector<4x32xf32>
    %369 = arith.mulf %359, %303 : vector<4x32xf32>
    %370 = arith.addf %368, %369 : vector<4x32xf32>
    %371 = vector.broadcast %20 : vector<4x1xf32> to vector<4x32xf32>
    %372 = arith.mulf %371, %370 : vector<4x32xf32>
    %cst_129 = arith.constant 1.000000e+00 : f32
    %373 = vector.broadcast %cst_129 : f32 to vector<4x1xf32>
    %374 = arith.subf %373, %20 : vector<4x1xf32>
    %375 = vector.broadcast %374 : vector<4x1xf32> to vector<4x32xf32>
    %376 = arith.mulf %375, %303 : vector<4x32xf32>
    %377 = arith.addf %372, %376 : vector<4x32xf32>
    %cst_130 = arith.constant dense<0.000000e+00> : vector<4x96xf32>
    %378 = tpu.matmul %339, %41, %cst_130 {dimension_numbers = #tpu.dot_dimension_numbers<[1], [0], [0], [1], [0, 0, 1, 1], [], []>} : vector<4x32xf32>, vector<32x96xf32>, vector<4x96xf32> -> vector<4x96xf32>
    %c12_131 = arith.constant 12 : index
    %c96_132 = arith.constant 96 : index
    %379 = vector.load %arg16[%c12_131, %c96_132] : memref<32x192xf32, #tpu.memory_space<vmem>>, vector<4x32xf32>
    %c12_133 = arith.constant 12 : index
    %c128_134 = arith.constant 128 : index
    %380 = vector.load %arg16[%c12_133, %c128_134] : memref<32x192xf32, #tpu.memory_space<vmem>>, vector<4x32xf32>
    %c12_135 = arith.constant 12 : index
    %c160_136 = arith.constant 160 : index
    %381 = vector.load %arg16[%c12_135, %c160_136] : memref<32x192xf32, #tpu.memory_space<vmem>>, vector<4x32xf32>
    %382 = vector.extract_strided_slice %378 {offsets = [0, 0], sizes = [4, 32], strides = [1, 1]} : vector<4x96xf32> to vector<4x32xf32>
    %383 = arith.addf %379, %382 : vector<4x32xf32>
    %384 = arith.negf %383 : vector<4x32xf32>
    %385 = math.exp %384 : vector<4x32xf32>
    %cst_137 = arith.constant 1.000000e+00 : f32
    %386 = vector.broadcast %cst_137 : f32 to vector<4x32xf32>
    %387 = arith.addf %386, %385 : vector<4x32xf32>
    %388 = arith.divf %386, %387 : vector<4x32xf32>
    %389 = vector.extract_strided_slice %378 {offsets = [0, 32], sizes = [4, 32], strides = [1, 1]} : vector<4x96xf32> to vector<4x32xf32>
    %390 = arith.addf %380, %389 : vector<4x32xf32>
    %391 = arith.negf %390 : vector<4x32xf32>
    %392 = math.exp %391 : vector<4x32xf32>
    %cst_138 = arith.constant 1.000000e+00 : f32
    %393 = vector.broadcast %cst_138 : f32 to vector<4x32xf32>
    %394 = arith.addf %393, %392 : vector<4x32xf32>
    %395 = arith.divf %393, %394 : vector<4x32xf32>
    %396 = vector.extract_strided_slice %378 {offsets = [0, 64], sizes = [4, 32], strides = [1, 1]} : vector<4x96xf32> to vector<4x32xf32>
    %397 = vector.broadcast %43 : vector<1x32xf32> to vector<4x32xf32>
    %398 = arith.addf %396, %397 : vector<4x32xf32>
    %399 = arith.mulf %388, %398 : vector<4x32xf32>
    %400 = arith.addf %381, %399 : vector<4x32xf32>
    %401 = math.tanh %400 : vector<4x32xf32>
    %cst_139 = arith.constant 1.000000e+00 : f32
    %402 = vector.broadcast %cst_139 : f32 to vector<4x32xf32>
    %403 = arith.subf %402, %395 : vector<4x32xf32>
    %404 = arith.mulf %403, %401 : vector<4x32xf32>
    %405 = arith.mulf %395, %339 : vector<4x32xf32>
    %406 = arith.addf %404, %405 : vector<4x32xf32>
    %407 = vector.broadcast %16 : vector<4x1xf32> to vector<4x32xf32>
    %408 = arith.mulf %407, %406 : vector<4x32xf32>
    %cst_140 = arith.constant 1.000000e+00 : f32
    %409 = vector.broadcast %cst_140 : f32 to vector<4x1xf32>
    %410 = arith.subf %409, %16 : vector<4x1xf32>
    %411 = vector.broadcast %410 : vector<4x1xf32> to vector<4x32xf32>
    %412 = arith.mulf %411, %339 : vector<4x32xf32>
    %413 = arith.addf %408, %412 : vector<4x32xf32>
    %c16_141 = arith.constant 16 : index
    %c0_142 = arith.constant 0 : index
    %414 = vector.load %arg18[%c16_141, %c0_142] : memref<32x64xf32, #tpu.memory_space<vmem>>, vector<4x32xf32>
    tpu.vector_store %arg18[%c16_141, %c0_142], %377 {strides = array<i32>} : memref<32x64xf32, #tpu.memory_space<vmem>>, vector<4x32xf32>,
    %c12_143 = arith.constant 12 : index
    %c32_144 = arith.constant 32 : index
    %415 = vector.load %arg18[%c12_143, %c32_144] : memref<32x64xf32, #tpu.memory_space<vmem>>, vector<4x32xf32>
    tpu.vector_store %arg18[%c12_143, %c32_144], %413 {strides = array<i32>} : memref<32x64xf32, #tpu.memory_space<vmem>>, vector<4x32xf32>,
    %cst_145 = arith.constant dense<0.000000e+00> : vector<4x96xf32>
    %416 = tpu.matmul %377, %40, %cst_145 {dimension_numbers = #tpu.dot_dimension_numbers<[1], [0], [0], [1], [0, 0, 1, 1], [], []>} : vector<4x32xf32>, vector<32x96xf32>, vector<4x96xf32> -> vector<4x96xf32>
    %c20_146 = arith.constant 20 : index
    %c0_147 = arith.constant 0 : index
    %417 = vector.load %arg16[%c20_146, %c0_147] : memref<32x192xf32, #tpu.memory_space<vmem>>, vector<4x32xf32>
    %c20_148 = arith.constant 20 : index
    %c32_149 = arith.constant 32 : index
    %418 = vector.load %arg16[%c20_148, %c32_149] : memref<32x192xf32, #tpu.memory_space<vmem>>, vector<4x32xf32>
    %c20_150 = arith.constant 20 : index
    %c64_151 = arith.constant 64 : index
    %419 = vector.load %arg16[%c20_150, %c64_151] : memref<32x192xf32, #tpu.memory_space<vmem>>, vector<4x32xf32>
    %420 = vector.extract_strided_slice %416 {offsets = [0, 0], sizes = [4, 32], strides = [1, 1]} : vector<4x96xf32> to vector<4x32xf32>
    %421 = arith.addf %417, %420 : vector<4x32xf32>
    %422 = arith.negf %421 : vector<4x32xf32>
    %423 = math.exp %422 : vector<4x32xf32>
    %cst_152 = arith.constant 1.000000e+00 : f32
    %424 = vector.broadcast %cst_152 : f32 to vector<4x32xf32>
    %425 = arith.addf %424, %423 : vector<4x32xf32>
    %426 = arith.divf %424, %425 : vector<4x32xf32>
    %427 = vector.extract_strided_slice %416 {offsets = [0, 32], sizes = [4, 32], strides = [1, 1]} : vector<4x96xf32> to vector<4x32xf32>
    %428 = arith.addf %418, %427 : vector<4x32xf32>
    %429 = arith.negf %428 : vector<4x32xf32>
    %430 = math.exp %429 : vector<4x32xf32>
    %cst_153 = arith.constant 1.000000e+00 : f32
    %431 = vector.broadcast %cst_153 : f32 to vector<4x32xf32>
    %432 = arith.addf %431, %430 : vector<4x32xf32>
    %433 = arith.divf %431, %432 : vector<4x32xf32>
    %434 = vector.extract_strided_slice %416 {offsets = [0, 64], sizes = [4, 32], strides = [1, 1]} : vector<4x96xf32> to vector<4x32xf32>
    %435 = vector.broadcast %42 : vector<1x32xf32> to vector<4x32xf32>
    %436 = arith.addf %434, %435 : vector<4x32xf32>
    %437 = arith.mulf %426, %436 : vector<4x32xf32>
    %438 = arith.addf %419, %437 : vector<4x32xf32>
    %439 = math.tanh %438 : vector<4x32xf32>
    %cst_154 = arith.constant 1.000000e+00 : f32
    %440 = vector.broadcast %cst_154 : f32 to vector<4x32xf32>
    %441 = arith.subf %440, %433 : vector<4x32xf32>
    %442 = arith.mulf %441, %439 : vector<4x32xf32>
    %443 = arith.mulf %433, %377 : vector<4x32xf32>
    %444 = arith.addf %442, %443 : vector<4x32xf32>
    %445 = vector.broadcast %24 : vector<4x1xf32> to vector<4x32xf32>
    %446 = arith.mulf %445, %444 : vector<4x32xf32>
    %cst_155 = arith.constant 1.000000e+00 : f32
    %447 = vector.broadcast %cst_155 : f32 to vector<4x1xf32>
    %448 = arith.subf %447, %24 : vector<4x1xf32>
    %449 = vector.broadcast %448 : vector<4x1xf32> to vector<4x32xf32>
    %450 = arith.mulf %449, %377 : vector<4x32xf32>
    %451 = arith.addf %446, %450 : vector<4x32xf32>
    %cst_156 = arith.constant dense<0.000000e+00> : vector<4x96xf32>
    %452 = tpu.matmul %413, %41, %cst_156 {dimension_numbers = #tpu.dot_dimension_numbers<[1], [0], [0], [1], [0, 0, 1, 1], [], []>} : vector<4x32xf32>, vector<32x96xf32>, vector<4x96xf32> -> vector<4x96xf32>
    %c8_157 = arith.constant 8 : index
    %c96_158 = arith.constant 96 : index
    %453 = vector.load %arg16[%c8_157, %c96_158] : memref<32x192xf32, #tpu.memory_space<vmem>>, vector<4x32xf32>
    %c8_159 = arith.constant 8 : index
    %c128_160 = arith.constant 128 : index
    %454 = vector.load %arg16[%c8_159, %c128_160] : memref<32x192xf32, #tpu.memory_space<vmem>>, vector<4x32xf32>
    %c8_161 = arith.constant 8 : index
    %c160_162 = arith.constant 160 : index
    %455 = vector.load %arg16[%c8_161, %c160_162] : memref<32x192xf32, #tpu.memory_space<vmem>>, vector<4x32xf32>
    %456 = vector.extract_strided_slice %452 {offsets = [0, 0], sizes = [4, 32], strides = [1, 1]} : vector<4x96xf32> to vector<4x32xf32>
    %457 = arith.addf %453, %456 : vector<4x32xf32>
    %458 = arith.negf %457 : vector<4x32xf32>
    %459 = math.exp %458 : vector<4x32xf32>
    %cst_163 = arith.constant 1.000000e+00 : f32
    %460 = vector.broadcast %cst_163 : f32 to vector<4x32xf32>
    %461 = arith.addf %460, %459 : vector<4x32xf32>
    %462 = arith.divf %460, %461 : vector<4x32xf32>
    %463 = vector.extract_strided_slice %452 {offsets = [0, 32], sizes = [4, 32], strides = [1, 1]} : vector<4x96xf32> to vector<4x32xf32>
    %464 = arith.addf %454, %463 : vector<4x32xf32>
    %465 = arith.negf %464 : vector<4x32xf32>
    %466 = math.exp %465 : vector<4x32xf32>
    %cst_164 = arith.constant 1.000000e+00 : f32
    %467 = vector.broadcast %cst_164 : f32 to vector<4x32xf32>
    %468 = arith.addf %467, %466 : vector<4x32xf32>
    %469 = arith.divf %467, %468 : vector<4x32xf32>
    %470 = vector.extract_strided_slice %452 {offsets = [0, 64], sizes = [4, 32], strides = [1, 1]} : vector<4x96xf32> to vector<4x32xf32>
    %471 = vector.broadcast %43 : vector<1x32xf32> to vector<4x32xf32>
    %472 = arith.addf %470, %471 : vector<4x32xf32>
    %473 = arith.mulf %462, %472 : vector<4x32xf32>
    %474 = arith.addf %455, %473 : vector<4x32xf32>
    %475 = math.tanh %474 : vector<4x32xf32>
    %cst_165 = arith.constant 1.000000e+00 : f32
    %476 = vector.broadcast %cst_165 : f32 to vector<4x32xf32>
    %477 = arith.subf %476, %469 : vector<4x32xf32>
    %478 = arith.mulf %477, %475 : vector<4x32xf32>
    %479 = arith.mulf %469, %413 : vector<4x32xf32>
    %480 = arith.addf %478, %479 : vector<4x32xf32>
    %481 = vector.broadcast %12 : vector<4x1xf32> to vector<4x32xf32>
    %482 = arith.mulf %481, %480 : vector<4x32xf32>
    %cst_166 = arith.constant 1.000000e+00 : f32
    %483 = vector.broadcast %cst_166 : f32 to vector<4x1xf32>
    %484 = arith.subf %483, %12 : vector<4x1xf32>
    %485 = vector.broadcast %484 : vector<4x1xf32> to vector<4x32xf32>
    %486 = arith.mulf %485, %413 : vector<4x32xf32>
    %487 = arith.addf %482, %486 : vector<4x32xf32>
    %c20_167 = arith.constant 20 : index
    %c0_168 = arith.constant 0 : index
    %488 = vector.load %arg18[%c20_167, %c0_168] : memref<32x64xf32, #tpu.memory_space<vmem>>, vector<4x32xf32>
    tpu.vector_store %arg18[%c20_167, %c0_168], %451 {strides = array<i32>} : memref<32x64xf32, #tpu.memory_space<vmem>>, vector<4x32xf32>,
    %c8_169 = arith.constant 8 : index
    %c32_170 = arith.constant 32 : index
    %489 = vector.load %arg18[%c8_169, %c32_170] : memref<32x64xf32, #tpu.memory_space<vmem>>, vector<4x32xf32>
    tpu.vector_store %arg18[%c8_169, %c32_170], %487 {strides = array<i32>} : memref<32x64xf32, #tpu.memory_space<vmem>>, vector<4x32xf32>,
    %cst_171 = arith.constant dense<0.000000e+00> : vector<4x96xf32>
    %490 = tpu.matmul %451, %40, %cst_171 {dimension_numbers = #tpu.dot_dimension_numbers<[1], [0], [0], [1], [0, 0, 1, 1], [], []>} : vector<4x32xf32>, vector<32x96xf32>, vector<4x96xf32> -> vector<4x96xf32>
    %c24_172 = arith.constant 24 : index
    %c0_173 = arith.constant 0 : index
    %491 = vector.load %arg16[%c24_172, %c0_173] : memref<32x192xf32, #tpu.memory_space<vmem>>, vector<4x32xf32>
    %c24_174 = arith.constant 24 : index
    %c32_175 = arith.constant 32 : index
    %492 = vector.load %arg16[%c24_174, %c32_175] : memref<32x192xf32, #tpu.memory_space<vmem>>, vector<4x32xf32>
    %c24_176 = arith.constant 24 : index
    %c64_177 = arith.constant 64 : index
    %493 = vector.load %arg16[%c24_176, %c64_177] : memref<32x192xf32, #tpu.memory_space<vmem>>, vector<4x32xf32>
    %494 = vector.extract_strided_slice %490 {offsets = [0, 0], sizes = [4, 32], strides = [1, 1]} : vector<4x96xf32> to vector<4x32xf32>
    %495 = arith.addf %491, %494 : vector<4x32xf32>
    %496 = arith.negf %495 : vector<4x32xf32>
    %497 = math.exp %496 : vector<4x32xf32>
    %cst_178 = arith.constant 1.000000e+00 : f32
    %498 = vector.broadcast %cst_178 : f32 to vector<4x32xf32>
    %499 = arith.addf %498, %497 : vector<4x32xf32>
    %500 = arith.divf %498, %499 : vector<4x32xf32>
    %501 = vector.extract_strided_slice %490 {offsets = [0, 32], sizes = [4, 32], strides = [1, 1]} : vector<4x96xf32> to vector<4x32xf32>
    %502 = arith.addf %492, %501 : vector<4x32xf32>
    %503 = arith.negf %502 : vector<4x32xf32>
    %504 = math.exp %503 : vector<4x32xf32>
    %cst_179 = arith.constant 1.000000e+00 : f32
    %505 = vector.broadcast %cst_179 : f32 to vector<4x32xf32>
    %506 = arith.addf %505, %504 : vector<4x32xf32>
    %507 = arith.divf %505, %506 : vector<4x32xf32>
    %508 = vector.extract_strided_slice %490 {offsets = [0, 64], sizes = [4, 32], strides = [1, 1]} : vector<4x96xf32> to vector<4x32xf32>
    %509 = vector.broadcast %42 : vector<1x32xf32> to vector<4x32xf32>
    %510 = arith.addf %508, %509 : vector<4x32xf32>
    %511 = arith.mulf %500, %510 : vector<4x32xf32>
    %512 = arith.addf %493, %511 : vector<4x32xf32>
    %513 = math.tanh %512 : vector<4x32xf32>
    %cst_180 = arith.constant 1.000000e+00 : f32
    %514 = vector.broadcast %cst_180 : f32 to vector<4x32xf32>
    %515 = arith.subf %514, %507 : vector<4x32xf32>
    %516 = arith.mulf %515, %513 : vector<4x32xf32>
    %517 = arith.mulf %507, %451 : vector<4x32xf32>
    %518 = arith.addf %516, %517 : vector<4x32xf32>
    %519 = vector.broadcast %28 : vector<4x1xf32> to vector<4x32xf32>
    %520 = arith.mulf %519, %518 : vector<4x32xf32>
    %cst_181 = arith.constant 1.000000e+00 : f32
    %521 = vector.broadcast %cst_181 : f32 to vector<4x1xf32>
    %522 = arith.subf %521, %28 : vector<4x1xf32>
    %523 = vector.broadcast %522 : vector<4x1xf32> to vector<4x32xf32>
    %524 = arith.mulf %523, %451 : vector<4x32xf32>
    %525 = arith.addf %520, %524 : vector<4x32xf32>
    %cst_182 = arith.constant dense<0.000000e+00> : vector<4x96xf32>
    %526 = tpu.matmul %487, %41, %cst_182 {dimension_numbers = #tpu.dot_dimension_numbers<[1], [0], [0], [1], [0, 0, 1, 1], [], []>} : vector<4x32xf32>, vector<32x96xf32>, vector<4x96xf32> -> vector<4x96xf32>
    %c4_183 = arith.constant 4 : index
    %c96_184 = arith.constant 96 : index
    %527 = vector.load %arg16[%c4_183, %c96_184] : memref<32x192xf32, #tpu.memory_space<vmem>>, vector<4x32xf32>
    %c4_185 = arith.constant 4 : index
    %c128_186 = arith.constant 128 : index
    %528 = vector.load %arg16[%c4_185, %c128_186] : memref<32x192xf32, #tpu.memory_space<vmem>>, vector<4x32xf32>
    %c4_187 = arith.constant 4 : index
    %c160_188 = arith.constant 160 : index
    %529 = vector.load %arg16[%c4_187, %c160_188] : memref<32x192xf32, #tpu.memory_space<vmem>>, vector<4x32xf32>
    %530 = vector.extract_strided_slice %526 {offsets = [0, 0], sizes = [4, 32], strides = [1, 1]} : vector<4x96xf32> to vector<4x32xf32>
    %531 = arith.addf %527, %530 : vector<4x32xf32>
    %532 = arith.negf %531 : vector<4x32xf32>
    %533 = math.exp %532 : vector<4x32xf32>
    %cst_189 = arith.constant 1.000000e+00 : f32
    %534 = vector.broadcast %cst_189 : f32 to vector<4x32xf32>
    %535 = arith.addf %534, %533 : vector<4x32xf32>
    %536 = arith.divf %534, %535 : vector<4x32xf32>
    %537 = vector.extract_strided_slice %526 {offsets = [0, 32], sizes = [4, 32], strides = [1, 1]} : vector<4x96xf32> to vector<4x32xf32>
    %538 = arith.addf %528, %537 : vector<4x32xf32>
    %539 = arith.negf %538 : vector<4x32xf32>
    %540 = math.exp %539 : vector<4x32xf32>
    %cst_190 = arith.constant 1.000000e+00 : f32
    %541 = vector.broadcast %cst_190 : f32 to vector<4x32xf32>
    %542 = arith.addf %541, %540 : vector<4x32xf32>
    %543 = arith.divf %541, %542 : vector<4x32xf32>
    %544 = vector.extract_strided_slice %526 {offsets = [0, 64], sizes = [4, 32], strides = [1, 1]} : vector<4x96xf32> to vector<4x32xf32>
    %545 = vector.broadcast %43 : vector<1x32xf32> to vector<4x32xf32>
    %546 = arith.addf %544, %545 : vector<4x32xf32>
    %547 = arith.mulf %536, %546 : vector<4x32xf32>
    %548 = arith.addf %529, %547 : vector<4x32xf32>
    %549 = math.tanh %548 : vector<4x32xf32>
    %cst_191 = arith.constant 1.000000e+00 : f32
    %550 = vector.broadcast %cst_191 : f32 to vector<4x32xf32>
    %551 = arith.subf %550, %543 : vector<4x32xf32>
    %552 = arith.mulf %551, %549 : vector<4x32xf32>
    %553 = arith.mulf %543, %487 : vector<4x32xf32>
    %554 = arith.addf %552, %553 : vector<4x32xf32>
    %555 = vector.broadcast %8 : vector<4x1xf32> to vector<4x32xf32>
    %556 = arith.mulf %555, %554 : vector<4x32xf32>
    %cst_192 = arith.constant 1.000000e+00 : f32
    %557 = vector.broadcast %cst_192 : f32 to vector<4x1xf32>
    %558 = arith.subf %557, %8 : vector<4x1xf32>
    %559 = vector.broadcast %558 : vector<4x1xf32> to vector<4x32xf32>
    %560 = arith.mulf %559, %487 : vector<4x32xf32>
    %561 = arith.addf %556, %560 : vector<4x32xf32>
    %c24_193 = arith.constant 24 : index
    %c0_194 = arith.constant 0 : index
    %562 = vector.load %arg18[%c24_193, %c0_194] : memref<32x64xf32, #tpu.memory_space<vmem>>, vector<4x32xf32>
    tpu.vector_store %arg18[%c24_193, %c0_194], %525 {strides = array<i32>} : memref<32x64xf32, #tpu.memory_space<vmem>>, vector<4x32xf32>,
    %c4_195 = arith.constant 4 : index
    %c32_196 = arith.constant 32 : index
    %563 = vector.load %arg18[%c4_195, %c32_196] : memref<32x64xf32, #tpu.memory_space<vmem>>, vector<4x32xf32>
    tpu.vector_store %arg18[%c4_195, %c32_196], %561 {strides = array<i32>} : memref<32x64xf32, #tpu.memory_space<vmem>>, vector<4x32xf32>,
    %cst_197 = arith.constant dense<0.000000e+00> : vector<4x96xf32>
    %564 = tpu.matmul %525, %40, %cst_197 {dimension_numbers = #tpu.dot_dimension_numbers<[1], [0], [0], [1], [0, 0, 1, 1], [], []>} : vector<4x32xf32>, vector<32x96xf32>, vector<4x96xf32> -> vector<4x96xf32>
    %c28_198 = arith.constant 28 : index
    %c0_199 = arith.constant 0 : index
    %565 = vector.load %arg16[%c28_198, %c0_199] : memref<32x192xf32, #tpu.memory_space<vmem>>, vector<4x32xf32>
    %c28_200 = arith.constant 28 : index
    %c32_201 = arith.constant 32 : index
    %566 = vector.load %arg16[%c28_200, %c32_201] : memref<32x192xf32, #tpu.memory_space<vmem>>, vector<4x32xf32>
    %c28_202 = arith.constant 28 : index
    %c64_203 = arith.constant 64 : index
    %567 = vector.load %arg16[%c28_202, %c64_203] : memref<32x192xf32, #tpu.memory_space<vmem>>, vector<4x32xf32>
    %568 = vector.extract_strided_slice %564 {offsets = [0, 0], sizes = [4, 32], strides = [1, 1]} : vector<4x96xf32> to vector<4x32xf32>
    %569 = arith.addf %565, %568 : vector<4x32xf32>
    %570 = arith.negf %569 : vector<4x32xf32>
    %571 = math.exp %570 : vector<4x32xf32>
    %cst_204 = arith.constant 1.000000e+00 : f32
    %572 = vector.broadcast %cst_204 : f32 to vector<4x32xf32>
    %573 = arith.addf %572, %571 : vector<4x32xf32>
    %574 = arith.divf %572, %573 : vector<4x32xf32>
    %575 = vector.extract_strided_slice %564 {offsets = [0, 32], sizes = [4, 32], strides = [1, 1]} : vector<4x96xf32> to vector<4x32xf32>
    %576 = arith.addf %566, %575 : vector<4x32xf32>
    %577 = arith.negf %576 : vector<4x32xf32>
    %578 = math.exp %577 : vector<4x32xf32>
    %cst_205 = arith.constant 1.000000e+00 : f32
    %579 = vector.broadcast %cst_205 : f32 to vector<4x32xf32>
    %580 = arith.addf %579, %578 : vector<4x32xf32>
    %581 = arith.divf %579, %580 : vector<4x32xf32>
    %582 = vector.extract_strided_slice %564 {offsets = [0, 64], sizes = [4, 32], strides = [1, 1]} : vector<4x96xf32> to vector<4x32xf32>
    %583 = vector.broadcast %42 : vector<1x32xf32> to vector<4x32xf32>
    %584 = arith.addf %582, %583 : vector<4x32xf32>
    %585 = arith.mulf %574, %584 : vector<4x32xf32>
    %586 = arith.addf %567, %585 : vector<4x32xf32>
    %587 = math.tanh %586 : vector<4x32xf32>
    %cst_206 = arith.constant 1.000000e+00 : f32
    %588 = vector.broadcast %cst_206 : f32 to vector<4x32xf32>
    %589 = arith.subf %588, %581 : vector<4x32xf32>
    %590 = arith.mulf %589, %587 : vector<4x32xf32>
    %591 = arith.mulf %581, %525 : vector<4x32xf32>
    %592 = arith.addf %590, %591 : vector<4x32xf32>
    %593 = vector.broadcast %32 : vector<4x1xf32> to vector<4x32xf32>
    %594 = arith.mulf %593, %592 : vector<4x32xf32>
    %cst_207 = arith.constant 1.000000e+00 : f32
    %595 = vector.broadcast %cst_207 : f32 to vector<4x1xf32>
    %596 = arith.subf %595, %32 : vector<4x1xf32>
    %597 = vector.broadcast %596 : vector<4x1xf32> to vector<4x32xf32>
    %598 = arith.mulf %597, %525 : vector<4x32xf32>
    %599 = arith.addf %594, %598 : vector<4x32xf32>
    %cst_208 = arith.constant dense<0.000000e+00> : vector<4x96xf32>
    %600 = tpu.matmul %561, %41, %cst_208 {dimension_numbers = #tpu.dot_dimension_numbers<[1], [0], [0], [1], [0, 0, 1, 1], [], []>} : vector<4x32xf32>, vector<32x96xf32>, vector<4x96xf32> -> vector<4x96xf32>
    %c0_209 = arith.constant 0 : index
    %c96_210 = arith.constant 96 : index
    %601 = vector.load %arg16[%c0_209, %c96_210] : memref<32x192xf32, #tpu.memory_space<vmem>>, vector<4x32xf32>
    %c0_211 = arith.constant 0 : index
    %c128_212 = arith.constant 128 : index
    %602 = vector.load %arg16[%c0_211, %c128_212] : memref<32x192xf32, #tpu.memory_space<vmem>>, vector<4x32xf32>
    %c0_213 = arith.constant 0 : index
    %c160_214 = arith.constant 160 : index
    %603 = vector.load %arg16[%c0_213, %c160_214] : memref<32x192xf32, #tpu.memory_space<vmem>>, vector<4x32xf32>
    %604 = vector.extract_strided_slice %600 {offsets = [0, 0], sizes = [4, 32], strides = [1, 1]} : vector<4x96xf32> to vector<4x32xf32>
    %605 = arith.addf %601, %604 : vector<4x32xf32>
    %606 = arith.negf %605 : vector<4x32xf32>
    %607 = math.exp %606 : vector<4x32xf32>
    %cst_215 = arith.constant 1.000000e+00 : f32
    %608 = vector.broadcast %cst_215 : f32 to vector<4x32xf32>
    %609 = arith.addf %608, %607 : vector<4x32xf32>
    %610 = arith.divf %608, %609 : vector<4x32xf32>
    %611 = vector.extract_strided_slice %600 {offsets = [0, 32], sizes = [4, 32], strides = [1, 1]} : vector<4x96xf32> to vector<4x32xf32>
    %612 = arith.addf %602, %611 : vector<4x32xf32>
    %613 = arith.negf %612 : vector<4x32xf32>
    %614 = math.exp %613 : vector<4x32xf32>
    %cst_216 = arith.constant 1.000000e+00 : f32
    %615 = vector.broadcast %cst_216 : f32 to vector<4x32xf32>
    %616 = arith.addf %615, %614 : vector<4x32xf32>
    %617 = arith.divf %615, %616 : vector<4x32xf32>
    %618 = vector.extract_strided_slice %600 {offsets = [0, 64], sizes = [4, 32], strides = [1, 1]} : vector<4x96xf32> to vector<4x32xf32>
    %619 = vector.broadcast %43 : vector<1x32xf32> to vector<4x32xf32>
    %620 = arith.addf %618, %619 : vector<4x32xf32>
    %621 = arith.mulf %610, %620 : vector<4x32xf32>
    %622 = arith.addf %603, %621 : vector<4x32xf32>
    %623 = math.tanh %622 : vector<4x32xf32>
    %cst_217 = arith.constant 1.000000e+00 : f32
    %624 = vector.broadcast %cst_217 : f32 to vector<4x32xf32>
    %625 = arith.subf %624, %617 : vector<4x32xf32>
    %626 = arith.mulf %625, %623 : vector<4x32xf32>
    %627 = arith.mulf %617, %561 : vector<4x32xf32>
    %628 = arith.addf %626, %627 : vector<4x32xf32>
    %629 = vector.broadcast %4 : vector<4x1xf32> to vector<4x32xf32>
    %630 = arith.mulf %629, %628 : vector<4x32xf32>
    %cst_218 = arith.constant 1.000000e+00 : f32
    %631 = vector.broadcast %cst_218 : f32 to vector<4x1xf32>
    %632 = arith.subf %631, %4 : vector<4x1xf32>
    %633 = vector.broadcast %632 : vector<4x1xf32> to vector<4x32xf32>
    %634 = arith.mulf %633, %561 : vector<4x32xf32>
    %635 = arith.addf %630, %634 : vector<4x32xf32>
    %c28_219 = arith.constant 28 : index
    %c0_220 = arith.constant 0 : index
    %636 = vector.load %arg18[%c28_219, %c0_220] : memref<32x64xf32, #tpu.memory_space<vmem>>, vector<4x32xf32>
    tpu.vector_store %arg18[%c28_219, %c0_220], %599 {strides = array<i32>} : memref<32x64xf32, #tpu.memory_space<vmem>>, vector<4x32xf32>,
    %c0_221 = arith.constant 0 : index
    %c32_222 = arith.constant 32 : index
    %637 = vector.load %arg18[%c0_221, %c32_222] : memref<32x64xf32, #tpu.memory_space<vmem>>, vector<4x32xf32>
    tpu.vector_store %arg18[%c0_221, %c32_222], %635 {strides = array<i32>} : memref<32x64xf32, #tpu.memory_space<vmem>>, vector<4x32xf32>,
    %c0_223 = arith.constant 0 : index
    %c0_224 = arith.constant 0 : index
    %638 = vector.load %arg18[%c0_223, %c0_224] : memref<32x64xf32, #tpu.memory_space<vmem>>, vector<32x64xf32>
    %c0_225 = arith.constant 0 : index
    %c0_226 = arith.constant 0 : index
    %639 = vector.load %arg8[%c0_225, %c0_226] : memref<64x192xf32, #tpu.memory_space<vmem>>, vector<64x192xf32>
    %cst_227 = arith.constant dense<0.000000e+00> : vector<32x192xf32>
    %640 = tpu.matmul %638, %639, %cst_227 {dimension_numbers = #tpu.dot_dimension_numbers<[1], [0], [0], [1], [0, 0, 1, 1], [], []>} : vector<32x64xf32>, vector<64x192xf32>, vector<32x192xf32> -> vector<32x192xf32>
    %c0_228 = arith.constant 0 : index
    %c0_229 = arith.constant 0 : index
    %641 = vector.load %arg11[%c0_228, %c0_229] : memref<1x192xf32, #tpu.memory_space<vmem>>, vector<1x192xf32>
    %642 = vector.broadcast %641 : vector<1x192xf32> to vector<32x192xf32>
    %643 = arith.addf %640, %642 : vector<32x192xf32>
    %c0_230 = arith.constant 0 : index
    %c0_231 = arith.constant 0 : index
    %644 = vector.load %arg17[%c0_230, %c0_231] : memref<32x192xf32, #tpu.memory_space<vmem>>, vector<32x192xf32>
    tpu.vector_store %arg17[%c0_230, %c0_231], %643 {strides = array<i32>} : memref<32x192xf32, #tpu.memory_space<vmem>>, vector<32x192xf32>,
    %c0_232 = arith.constant 0 : index
    %c0_233 = arith.constant 0 : index
    %645 = vector.load %arg9[%c0_232, %c0_233] : memref<32x96xf32, #tpu.memory_space<vmem>>, vector<32x96xf32>
    %c0_234 = arith.constant 0 : index
    %c0_235 = arith.constant 0 : index
    %646 = vector.load %arg10[%c0_234, %c0_235] : memref<32x96xf32, #tpu.memory_space<vmem>>, vector<32x96xf32>
    %c0_236 = arith.constant 0 : index
    %c0_237 = arith.constant 0 : index
    %647 = vector.load %arg12[%c0_236, %c0_237] : memref<1x64xf32, #tpu.memory_space<vmem>>, vector<1x32xf32>
    %c0_238 = arith.constant 0 : index
    %c32_239 = arith.constant 32 : index
    %648 = vector.load %arg12[%c0_238, %c32_239] : memref<1x64xf32, #tpu.memory_space<vmem>>, vector<1x32xf32>
    %cst_240 = arith.constant 0.000000e+00 : f32
    %649 = vector.broadcast %cst_240 : f32 to vector<4x32xf32>
    %cst_241 = arith.constant 0.000000e+00 : f32
    %650 = vector.broadcast %cst_241 : f32 to vector<4x32xf32>
    %cst_242 = arith.constant dense<0.000000e+00> : vector<4x96xf32>
    %651 = tpu.matmul %649, %645, %cst_242 {dimension_numbers = #tpu.dot_dimension_numbers<[1], [0], [0], [1], [0, 0, 1, 1], [], []>} : vector<4x32xf32>, vector<32x96xf32>, vector<4x96xf32> -> vector<4x96xf32>
    %c0_243 = arith.constant 0 : index
    %c0_244 = arith.constant 0 : index
    %652 = vector.load %arg17[%c0_243, %c0_244] : memref<32x192xf32, #tpu.memory_space<vmem>>, vector<4x32xf32>
    %c0_245 = arith.constant 0 : index
    %c32_246 = arith.constant 32 : index
    %653 = vector.load %arg17[%c0_245, %c32_246] : memref<32x192xf32, #tpu.memory_space<vmem>>, vector<4x32xf32>
    %c0_247 = arith.constant 0 : index
    %c64_248 = arith.constant 64 : index
    %654 = vector.load %arg17[%c0_247, %c64_248] : memref<32x192xf32, #tpu.memory_space<vmem>>, vector<4x32xf32>
    %655 = vector.extract_strided_slice %651 {offsets = [0, 0], sizes = [4, 32], strides = [1, 1]} : vector<4x96xf32> to vector<4x32xf32>
    %656 = arith.addf %652, %655 : vector<4x32xf32>
    %657 = arith.negf %656 : vector<4x32xf32>
    %658 = math.exp %657 : vector<4x32xf32>
    %cst_249 = arith.constant 1.000000e+00 : f32
    %659 = vector.broadcast %cst_249 : f32 to vector<4x32xf32>
    %660 = arith.addf %659, %658 : vector<4x32xf32>
    %661 = arith.divf %659, %660 : vector<4x32xf32>
    %662 = vector.extract_strided_slice %651 {offsets = [0, 32], sizes = [4, 32], strides = [1, 1]} : vector<4x96xf32> to vector<4x32xf32>
    %663 = arith.addf %653, %662 : vector<4x32xf32>
    %664 = arith.negf %663 : vector<4x32xf32>
    %665 = math.exp %664 : vector<4x32xf32>
    %cst_250 = arith.constant 1.000000e+00 : f32
    %666 = vector.broadcast %cst_250 : f32 to vector<4x32xf32>
    %667 = arith.addf %666, %665 : vector<4x32xf32>
    %668 = arith.divf %666, %667 : vector<4x32xf32>
    %669 = vector.extract_strided_slice %651 {offsets = [0, 64], sizes = [4, 32], strides = [1, 1]} : vector<4x96xf32> to vector<4x32xf32>
    %670 = vector.broadcast %647 : vector<1x32xf32> to vector<4x32xf32>
    %671 = arith.addf %669, %670 : vector<4x32xf32>
    %672 = arith.mulf %661, %671 : vector<4x32xf32>
    %673 = arith.addf %654, %672 : vector<4x32xf32>
    %674 = math.tanh %673 : vector<4x32xf32>
    %cst_251 = arith.constant 1.000000e+00 : f32
    %675 = vector.broadcast %cst_251 : f32 to vector<4x32xf32>
    %676 = arith.subf %675, %668 : vector<4x32xf32>
    %677 = arith.mulf %676, %674 : vector<4x32xf32>
    %678 = arith.mulf %668, %649 : vector<4x32xf32>
    %679 = arith.addf %677, %678 : vector<4x32xf32>
    %680 = vector.broadcast %4 : vector<4x1xf32> to vector<4x32xf32>
    %681 = arith.mulf %680, %679 : vector<4x32xf32>
    %cst_252 = arith.constant 1.000000e+00 : f32
    %682 = vector.broadcast %cst_252 : f32 to vector<4x1xf32>
    %683 = arith.subf %682, %4 : vector<4x1xf32>
    %684 = vector.broadcast %683 : vector<4x1xf32> to vector<4x32xf32>
    %685 = arith.mulf %684, %649 : vector<4x32xf32>
    %686 = arith.addf %681, %685 : vector<4x32xf32>
    %cst_253 = arith.constant dense<0.000000e+00> : vector<4x96xf32>
    %687 = tpu.matmul %650, %646, %cst_253 {dimension_numbers = #tpu.dot_dimension_numbers<[1], [0], [0], [1], [0, 0, 1, 1], [], []>} : vector<4x32xf32>, vector<32x96xf32>, vector<4x96xf32> -> vector<4x96xf32>
    %c28_254 = arith.constant 28 : index
    %c96_255 = arith.constant 96 : index
    %688 = vector.load %arg17[%c28_254, %c96_255] : memref<32x192xf32, #tpu.memory_space<vmem>>, vector<4x32xf32>
    %c28_256 = arith.constant 28 : index
    %c128_257 = arith.constant 128 : index
    %689 = vector.load %arg17[%c28_256, %c128_257] : memref<32x192xf32, #tpu.memory_space<vmem>>, vector<4x32xf32>
    %c28_258 = arith.constant 28 : index
    %c160_259 = arith.constant 160 : index
    %690 = vector.load %arg17[%c28_258, %c160_259] : memref<32x192xf32, #tpu.memory_space<vmem>>, vector<4x32xf32>
    %691 = vector.extract_strided_slice %687 {offsets = [0, 0], sizes = [4, 32], strides = [1, 1]} : vector<4x96xf32> to vector<4x32xf32>
    %692 = arith.addf %688, %691 : vector<4x32xf32>
    %693 = arith.negf %692 : vector<4x32xf32>
    %694 = math.exp %693 : vector<4x32xf32>
    %cst_260 = arith.constant 1.000000e+00 : f32
    %695 = vector.broadcast %cst_260 : f32 to vector<4x32xf32>
    %696 = arith.addf %695, %694 : vector<4x32xf32>
    %697 = arith.divf %695, %696 : vector<4x32xf32>
    %698 = vector.extract_strided_slice %687 {offsets = [0, 32], sizes = [4, 32], strides = [1, 1]} : vector<4x96xf32> to vector<4x32xf32>
    %699 = arith.addf %689, %698 : vector<4x32xf32>
    %700 = arith.negf %699 : vector<4x32xf32>
    %701 = math.exp %700 : vector<4x32xf32>
    %cst_261 = arith.constant 1.000000e+00 : f32
    %702 = vector.broadcast %cst_261 : f32 to vector<4x32xf32>
    %703 = arith.addf %702, %701 : vector<4x32xf32>
    %704 = arith.divf %702, %703 : vector<4x32xf32>
    %705 = vector.extract_strided_slice %687 {offsets = [0, 64], sizes = [4, 32], strides = [1, 1]} : vector<4x96xf32> to vector<4x32xf32>
    %706 = vector.broadcast %648 : vector<1x32xf32> to vector<4x32xf32>
    %707 = arith.addf %705, %706 : vector<4x32xf32>
    %708 = arith.mulf %697, %707 : vector<4x32xf32>
    %709 = arith.addf %690, %708 : vector<4x32xf32>
    %710 = math.tanh %709 : vector<4x32xf32>
    %cst_262 = arith.constant 1.000000e+00 : f32
    %711 = vector.broadcast %cst_262 : f32 to vector<4x32xf32>
    %712 = arith.subf %711, %704 : vector<4x32xf32>
    %713 = arith.mulf %712, %710 : vector<4x32xf32>
    %714 = arith.mulf %704, %650 : vector<4x32xf32>
    %715 = arith.addf %713, %714 : vector<4x32xf32>
    %716 = vector.broadcast %32 : vector<4x1xf32> to vector<4x32xf32>
    %717 = arith.mulf %716, %715 : vector<4x32xf32>
    %cst_263 = arith.constant 1.000000e+00 : f32
    %718 = vector.broadcast %cst_263 : f32 to vector<4x1xf32>
    %719 = arith.subf %718, %32 : vector<4x1xf32>
    %720 = vector.broadcast %719 : vector<4x1xf32> to vector<4x32xf32>
    %721 = arith.mulf %720, %650 : vector<4x32xf32>
    %722 = arith.addf %717, %721 : vector<4x32xf32>
    %cst_264 = arith.constant dense<0.000000e+00> : vector<4x96xf32>
    %723 = tpu.matmul %686, %645, %cst_264 {dimension_numbers = #tpu.dot_dimension_numbers<[1], [0], [0], [1], [0, 0, 1, 1], [], []>} : vector<4x32xf32>, vector<32x96xf32>, vector<4x96xf32> -> vector<4x96xf32>
    %c4_265 = arith.constant 4 : index
    %c0_266 = arith.constant 0 : index
    %724 = vector.load %arg17[%c4_265, %c0_266] : memref<32x192xf32, #tpu.memory_space<vmem>>, vector<4x32xf32>
    %c4_267 = arith.constant 4 : index
    %c32_268 = arith.constant 32 : index
    %725 = vector.load %arg17[%c4_267, %c32_268] : memref<32x192xf32, #tpu.memory_space<vmem>>, vector<4x32xf32>
    %c4_269 = arith.constant 4 : index
    %c64_270 = arith.constant 64 : index
    %726 = vector.load %arg17[%c4_269, %c64_270] : memref<32x192xf32, #tpu.memory_space<vmem>>, vector<4x32xf32>
    %727 = vector.extract_strided_slice %723 {offsets = [0, 0], sizes = [4, 32], strides = [1, 1]} : vector<4x96xf32> to vector<4x32xf32>
    %728 = arith.addf %724, %727 : vector<4x32xf32>
    %729 = arith.negf %728 : vector<4x32xf32>
    %730 = math.exp %729 : vector<4x32xf32>
    %cst_271 = arith.constant 1.000000e+00 : f32
    %731 = vector.broadcast %cst_271 : f32 to vector<4x32xf32>
    %732 = arith.addf %731, %730 : vector<4x32xf32>
    %733 = arith.divf %731, %732 : vector<4x32xf32>
    %734 = vector.extract_strided_slice %723 {offsets = [0, 32], sizes = [4, 32], strides = [1, 1]} : vector<4x96xf32> to vector<4x32xf32>
    %735 = arith.addf %725, %734 : vector<4x32xf32>
    %736 = arith.negf %735 : vector<4x32xf32>
    %737 = math.exp %736 : vector<4x32xf32>
    %cst_272 = arith.constant 1.000000e+00 : f32
    %738 = vector.broadcast %cst_272 : f32 to vector<4x32xf32>
    %739 = arith.addf %738, %737 : vector<4x32xf32>
    %740 = arith.divf %738, %739 : vector<4x32xf32>
    %741 = vector.extract_strided_slice %723 {offsets = [0, 64], sizes = [4, 32], strides = [1, 1]} : vector<4x96xf32> to vector<4x32xf32>
    %742 = vector.broadcast %647 : vector<1x32xf32> to vector<4x32xf32>
    %743 = arith.addf %741, %742 : vector<4x32xf32>
    %744 = arith.mulf %733, %743 : vector<4x32xf32>
    %745 = arith.addf %726, %744 : vector<4x32xf32>
    %746 = math.tanh %745 : vector<4x32xf32>
    %cst_273 = arith.constant 1.000000e+00 : f32
    %747 = vector.broadcast %cst_273 : f32 to vector<4x32xf32>
    %748 = arith.subf %747, %740 : vector<4x32xf32>
    %749 = arith.mulf %748, %746 : vector<4x32xf32>
    %750 = arith.mulf %740, %686 : vector<4x32xf32>
    %751 = arith.addf %749, %750 : vector<4x32xf32>
    %752 = vector.broadcast %8 : vector<4x1xf32> to vector<4x32xf32>
    %753 = arith.mulf %752, %751 : vector<4x32xf32>
    %cst_274 = arith.constant 1.000000e+00 : f32
    %754 = vector.broadcast %cst_274 : f32 to vector<4x1xf32>
    %755 = arith.subf %754, %8 : vector<4x1xf32>
    %756 = vector.broadcast %755 : vector<4x1xf32> to vector<4x32xf32>
    %757 = arith.mulf %756, %686 : vector<4x32xf32>
    %758 = arith.addf %753, %757 : vector<4x32xf32>
    %cst_275 = arith.constant dense<0.000000e+00> : vector<4x96xf32>
    %759 = tpu.matmul %722, %646, %cst_275 {dimension_numbers = #tpu.dot_dimension_numbers<[1], [0], [0], [1], [0, 0, 1, 1], [], []>} : vector<4x32xf32>, vector<32x96xf32>, vector<4x96xf32> -> vector<4x96xf32>
    %c24_276 = arith.constant 24 : index
    %c96_277 = arith.constant 96 : index
    %760 = vector.load %arg17[%c24_276, %c96_277] : memref<32x192xf32, #tpu.memory_space<vmem>>, vector<4x32xf32>
    %c24_278 = arith.constant 24 : index
    %c128_279 = arith.constant 128 : index
    %761 = vector.load %arg17[%c24_278, %c128_279] : memref<32x192xf32, #tpu.memory_space<vmem>>, vector<4x32xf32>
    %c24_280 = arith.constant 24 : index
    %c160_281 = arith.constant 160 : index
    %762 = vector.load %arg17[%c24_280, %c160_281] : memref<32x192xf32, #tpu.memory_space<vmem>>, vector<4x32xf32>
    %763 = vector.extract_strided_slice %759 {offsets = [0, 0], sizes = [4, 32], strides = [1, 1]} : vector<4x96xf32> to vector<4x32xf32>
    %764 = arith.addf %760, %763 : vector<4x32xf32>
    %765 = arith.negf %764 : vector<4x32xf32>
    %766 = math.exp %765 : vector<4x32xf32>
    %cst_282 = arith.constant 1.000000e+00 : f32
    %767 = vector.broadcast %cst_282 : f32 to vector<4x32xf32>
    %768 = arith.addf %767, %766 : vector<4x32xf32>
    %769 = arith.divf %767, %768 : vector<4x32xf32>
    %770 = vector.extract_strided_slice %759 {offsets = [0, 32], sizes = [4, 32], strides = [1, 1]} : vector<4x96xf32> to vector<4x32xf32>
    %771 = arith.addf %761, %770 : vector<4x32xf32>
    %772 = arith.negf %771 : vector<4x32xf32>
    %773 = math.exp %772 : vector<4x32xf32>
    %cst_283 = arith.constant 1.000000e+00 : f32
    %774 = vector.broadcast %cst_283 : f32 to vector<4x32xf32>
    %775 = arith.addf %774, %773 : vector<4x32xf32>
    %776 = arith.divf %774, %775 : vector<4x32xf32>
    %777 = vector.extract_strided_slice %759 {offsets = [0, 64], sizes = [4, 32], strides = [1, 1]} : vector<4x96xf32> to vector<4x32xf32>
    %778 = vector.broadcast %648 : vector<1x32xf32> to vector<4x32xf32>
    %779 = arith.addf %777, %778 : vector<4x32xf32>
    %780 = arith.mulf %769, %779 : vector<4x32xf32>
    %781 = arith.addf %762, %780 : vector<4x32xf32>
    %782 = math.tanh %781 : vector<4x32xf32>
    %cst_284 = arith.constant 1.000000e+00 : f32
    %783 = vector.broadcast %cst_284 : f32 to vector<4x32xf32>
    %784 = arith.subf %783, %776 : vector<4x32xf32>
    %785 = arith.mulf %784, %782 : vector<4x32xf32>
    %786 = arith.mulf %776, %722 : vector<4x32xf32>
    %787 = arith.addf %785, %786 : vector<4x32xf32>
    %788 = vector.broadcast %28 : vector<4x1xf32> to vector<4x32xf32>
    %789 = arith.mulf %788, %787 : vector<4x32xf32>
    %cst_285 = arith.constant 1.000000e+00 : f32
    %790 = vector.broadcast %cst_285 : f32 to vector<4x1xf32>
    %791 = arith.subf %790, %28 : vector<4x1xf32>
    %792 = vector.broadcast %791 : vector<4x1xf32> to vector<4x32xf32>
    %793 = arith.mulf %792, %722 : vector<4x32xf32>
    %794 = arith.addf %789, %793 : vector<4x32xf32>
    %cst_286 = arith.constant dense<0.000000e+00> : vector<4x96xf32>
    %795 = tpu.matmul %758, %645, %cst_286 {dimension_numbers = #tpu.dot_dimension_numbers<[1], [0], [0], [1], [0, 0, 1, 1], [], []>} : vector<4x32xf32>, vector<32x96xf32>, vector<4x96xf32> -> vector<4x96xf32>
    %c8_287 = arith.constant 8 : index
    %c0_288 = arith.constant 0 : index
    %796 = vector.load %arg17[%c8_287, %c0_288] : memref<32x192xf32, #tpu.memory_space<vmem>>, vector<4x32xf32>
    %c8_289 = arith.constant 8 : index
    %c32_290 = arith.constant 32 : index
    %797 = vector.load %arg17[%c8_289, %c32_290] : memref<32x192xf32, #tpu.memory_space<vmem>>, vector<4x32xf32>
    %c8_291 = arith.constant 8 : index
    %c64_292 = arith.constant 64 : index
    %798 = vector.load %arg17[%c8_291, %c64_292] : memref<32x192xf32, #tpu.memory_space<vmem>>, vector<4x32xf32>
    %799 = vector.extract_strided_slice %795 {offsets = [0, 0], sizes = [4, 32], strides = [1, 1]} : vector<4x96xf32> to vector<4x32xf32>
    %800 = arith.addf %796, %799 : vector<4x32xf32>
    %801 = arith.negf %800 : vector<4x32xf32>
    %802 = math.exp %801 : vector<4x32xf32>
    %cst_293 = arith.constant 1.000000e+00 : f32
    %803 = vector.broadcast %cst_293 : f32 to vector<4x32xf32>
    %804 = arith.addf %803, %802 : vector<4x32xf32>
    %805 = arith.divf %803, %804 : vector<4x32xf32>
    %806 = vector.extract_strided_slice %795 {offsets = [0, 32], sizes = [4, 32], strides = [1, 1]} : vector<4x96xf32> to vector<4x32xf32>
    %807 = arith.addf %797, %806 : vector<4x32xf32>
    %808 = arith.negf %807 : vector<4x32xf32>
    %809 = math.exp %808 : vector<4x32xf32>
    %cst_294 = arith.constant 1.000000e+00 : f32
    %810 = vector.broadcast %cst_294 : f32 to vector<4x32xf32>
    %811 = arith.addf %810, %809 : vector<4x32xf32>
    %812 = arith.divf %810, %811 : vector<4x32xf32>
    %813 = vector.extract_strided_slice %795 {offsets = [0, 64], sizes = [4, 32], strides = [1, 1]} : vector<4x96xf32> to vector<4x32xf32>
    %814 = vector.broadcast %647 : vector<1x32xf32> to vector<4x32xf32>
    %815 = arith.addf %813, %814 : vector<4x32xf32>
    %816 = arith.mulf %805, %815 : vector<4x32xf32>
    %817 = arith.addf %798, %816 : vector<4x32xf32>
    %818 = math.tanh %817 : vector<4x32xf32>
    %cst_295 = arith.constant 1.000000e+00 : f32
    %819 = vector.broadcast %cst_295 : f32 to vector<4x32xf32>
    %820 = arith.subf %819, %812 : vector<4x32xf32>
    %821 = arith.mulf %820, %818 : vector<4x32xf32>
    %822 = arith.mulf %812, %758 : vector<4x32xf32>
    %823 = arith.addf %821, %822 : vector<4x32xf32>
    %824 = vector.broadcast %12 : vector<4x1xf32> to vector<4x32xf32>
    %825 = arith.mulf %824, %823 : vector<4x32xf32>
    %cst_296 = arith.constant 1.000000e+00 : f32
    %826 = vector.broadcast %cst_296 : f32 to vector<4x1xf32>
    %827 = arith.subf %826, %12 : vector<4x1xf32>
    %828 = vector.broadcast %827 : vector<4x1xf32> to vector<4x32xf32>
    %829 = arith.mulf %828, %758 : vector<4x32xf32>
    %830 = arith.addf %825, %829 : vector<4x32xf32>
    %cst_297 = arith.constant dense<0.000000e+00> : vector<4x96xf32>
    %831 = tpu.matmul %794, %646, %cst_297 {dimension_numbers = #tpu.dot_dimension_numbers<[1], [0], [0], [1], [0, 0, 1, 1], [], []>} : vector<4x32xf32>, vector<32x96xf32>, vector<4x96xf32> -> vector<4x96xf32>
    %c20_298 = arith.constant 20 : index
    %c96_299 = arith.constant 96 : index
    %832 = vector.load %arg17[%c20_298, %c96_299] : memref<32x192xf32, #tpu.memory_space<vmem>>, vector<4x32xf32>
    %c20_300 = arith.constant 20 : index
    %c128_301 = arith.constant 128 : index
    %833 = vector.load %arg17[%c20_300, %c128_301] : memref<32x192xf32, #tpu.memory_space<vmem>>, vector<4x32xf32>
    %c20_302 = arith.constant 20 : index
    %c160_303 = arith.constant 160 : index
    %834 = vector.load %arg17[%c20_302, %c160_303] : memref<32x192xf32, #tpu.memory_space<vmem>>, vector<4x32xf32>
    %835 = vector.extract_strided_slice %831 {offsets = [0, 0], sizes = [4, 32], strides = [1, 1]} : vector<4x96xf32> to vector<4x32xf32>
    %836 = arith.addf %832, %835 : vector<4x32xf32>
    %837 = arith.negf %836 : vector<4x32xf32>
    %838 = math.exp %837 : vector<4x32xf32>
    %cst_304 = arith.constant 1.000000e+00 : f32
    %839 = vector.broadcast %cst_304 : f32 to vector<4x32xf32>
    %840 = arith.addf %839, %838 : vector<4x32xf32>
    %841 = arith.divf %839, %840 : vector<4x32xf32>
    %842 = vector.extract_strided_slice %831 {offsets = [0, 32], sizes = [4, 32], strides = [1, 1]} : vector<4x96xf32> to vector<4x32xf32>
    %843 = arith.addf %833, %842 : vector<4x32xf32>
    %844 = arith.negf %843 : vector<4x32xf32>
    %845 = math.exp %844 : vector<4x32xf32>
    %cst_305 = arith.constant 1.000000e+00 : f32
    %846 = vector.broadcast %cst_305 : f32 to vector<4x32xf32>
    %847 = arith.addf %846, %845 : vector<4x32xf32>
    %848 = arith.divf %846, %847 : vector<4x32xf32>
    %849 = vector.extract_strided_slice %831 {offsets = [0, 64], sizes = [4, 32], strides = [1, 1]} : vector<4x96xf32> to vector<4x32xf32>
    %850 = vector.broadcast %648 : vector<1x32xf32> to vector<4x32xf32>
    %851 = arith.addf %849, %850 : vector<4x32xf32>
    %852 = arith.mulf %841, %851 : vector<4x32xf32>
    %853 = arith.addf %834, %852 : vector<4x32xf32>
    %854 = math.tanh %853 : vector<4x32xf32>
    %cst_306 = arith.constant 1.000000e+00 : f32
    %855 = vector.broadcast %cst_306 : f32 to vector<4x32xf32>
    %856 = arith.subf %855, %848 : vector<4x32xf32>
    %857 = arith.mulf %856, %854 : vector<4x32xf32>
    %858 = arith.mulf %848, %794 : vector<4x32xf32>
    %859 = arith.addf %857, %858 : vector<4x32xf32>
    %860 = vector.broadcast %24 : vector<4x1xf32> to vector<4x32xf32>
    %861 = arith.mulf %860, %859 : vector<4x32xf32>
    %cst_307 = arith.constant 1.000000e+00 : f32
    %862 = vector.broadcast %cst_307 : f32 to vector<4x1xf32>
    %863 = arith.subf %862, %24 : vector<4x1xf32>
    %864 = vector.broadcast %863 : vector<4x1xf32> to vector<4x32xf32>
    %865 = arith.mulf %864, %794 : vector<4x32xf32>
    %866 = arith.addf %861, %865 : vector<4x32xf32>
    %cst_308 = arith.constant dense<0.000000e+00> : vector<4x96xf32>
    %867 = tpu.matmul %830, %645, %cst_308 {dimension_numbers = #tpu.dot_dimension_numbers<[1], [0], [0], [1], [0, 0, 1, 1], [], []>} : vector<4x32xf32>, vector<32x96xf32>, vector<4x96xf32> -> vector<4x96xf32>
    %c12_309 = arith.constant 12 : index
    %c0_310 = arith.constant 0 : index
    %868 = vector.load %arg17[%c12_309, %c0_310] : memref<32x192xf32, #tpu.memory_space<vmem>>, vector<4x32xf32>
    %c12_311 = arith.constant 12 : index
    %c32_312 = arith.constant 32 : index
    %869 = vector.load %arg17[%c12_311, %c32_312] : memref<32x192xf32, #tpu.memory_space<vmem>>, vector<4x32xf32>
    %c12_313 = arith.constant 12 : index
    %c64_314 = arith.constant 64 : index
    %870 = vector.load %arg17[%c12_313, %c64_314] : memref<32x192xf32, #tpu.memory_space<vmem>>, vector<4x32xf32>
    %871 = vector.extract_strided_slice %867 {offsets = [0, 0], sizes = [4, 32], strides = [1, 1]} : vector<4x96xf32> to vector<4x32xf32>
    %872 = arith.addf %868, %871 : vector<4x32xf32>
    %873 = arith.negf %872 : vector<4x32xf32>
    %874 = math.exp %873 : vector<4x32xf32>
    %cst_315 = arith.constant 1.000000e+00 : f32
    %875 = vector.broadcast %cst_315 : f32 to vector<4x32xf32>
    %876 = arith.addf %875, %874 : vector<4x32xf32>
    %877 = arith.divf %875, %876 : vector<4x32xf32>
    %878 = vector.extract_strided_slice %867 {offsets = [0, 32], sizes = [4, 32], strides = [1, 1]} : vector<4x96xf32> to vector<4x32xf32>
    %879 = arith.addf %869, %878 : vector<4x32xf32>
    %880 = arith.negf %879 : vector<4x32xf32>
    %881 = math.exp %880 : vector<4x32xf32>
    %cst_316 = arith.constant 1.000000e+00 : f32
    %882 = vector.broadcast %cst_316 : f32 to vector<4x32xf32>
    %883 = arith.addf %882, %881 : vector<4x32xf32>
    %884 = arith.divf %882, %883 : vector<4x32xf32>
    %885 = vector.extract_strided_slice %867 {offsets = [0, 64], sizes = [4, 32], strides = [1, 1]} : vector<4x96xf32> to vector<4x32xf32>
    %886 = vector.broadcast %647 : vector<1x32xf32> to vector<4x32xf32>
    %887 = arith.addf %885, %886 : vector<4x32xf32>
    %888 = arith.mulf %877, %887 : vector<4x32xf32>
    %889 = arith.addf %870, %888 : vector<4x32xf32>
    %890 = math.tanh %889 : vector<4x32xf32>
    %cst_317 = arith.constant 1.000000e+00 : f32
    %891 = vector.broadcast %cst_317 : f32 to vector<4x32xf32>
    %892 = arith.subf %891, %884 : vector<4x32xf32>
    %893 = arith.mulf %892, %890 : vector<4x32xf32>
    %894 = arith.mulf %884, %830 : vector<4x32xf32>
    %895 = arith.addf %893, %894 : vector<4x32xf32>
    %896 = vector.broadcast %16 : vector<4x1xf32> to vector<4x32xf32>
    %897 = arith.mulf %896, %895 : vector<4x32xf32>
    %cst_318 = arith.constant 1.000000e+00 : f32
    %898 = vector.broadcast %cst_318 : f32 to vector<4x1xf32>
    %899 = arith.subf %898, %16 : vector<4x1xf32>
    %900 = vector.broadcast %899 : vector<4x1xf32> to vector<4x32xf32>
    %901 = arith.mulf %900, %830 : vector<4x32xf32>
    %902 = arith.addf %897, %901 : vector<4x32xf32>
    %cst_319 = arith.constant dense<0.000000e+00> : vector<4x96xf32>
    %903 = tpu.matmul %866, %646, %cst_319 {dimension_numbers = #tpu.dot_dimension_numbers<[1], [0], [0], [1], [0, 0, 1, 1], [], []>} : vector<4x32xf32>, vector<32x96xf32>, vector<4x96xf32> -> vector<4x96xf32>
    %c16_320 = arith.constant 16 : index
    %c96_321 = arith.constant 96 : index
    %904 = vector.load %arg17[%c16_320, %c96_321] : memref<32x192xf32, #tpu.memory_space<vmem>>, vector<4x32xf32>
    %c16_322 = arith.constant 16 : index
    %c128_323 = arith.constant 128 : index
    %905 = vector.load %arg17[%c16_322, %c128_323] : memref<32x192xf32, #tpu.memory_space<vmem>>, vector<4x32xf32>
    %c16_324 = arith.constant 16 : index
    %c160_325 = arith.constant 160 : index
    %906 = vector.load %arg17[%c16_324, %c160_325] : memref<32x192xf32, #tpu.memory_space<vmem>>, vector<4x32xf32>
    %907 = vector.extract_strided_slice %903 {offsets = [0, 0], sizes = [4, 32], strides = [1, 1]} : vector<4x96xf32> to vector<4x32xf32>
    %908 = arith.addf %904, %907 : vector<4x32xf32>
    %909 = arith.negf %908 : vector<4x32xf32>
    %910 = math.exp %909 : vector<4x32xf32>
    %cst_326 = arith.constant 1.000000e+00 : f32
    %911 = vector.broadcast %cst_326 : f32 to vector<4x32xf32>
    %912 = arith.addf %911, %910 : vector<4x32xf32>
    %913 = arith.divf %911, %912 : vector<4x32xf32>
    %914 = vector.extract_strided_slice %903 {offsets = [0, 32], sizes = [4, 32], strides = [1, 1]} : vector<4x96xf32> to vector<4x32xf32>
    %915 = arith.addf %905, %914 : vector<4x32xf32>
    %916 = arith.negf %915 : vector<4x32xf32>
    %917 = math.exp %916 : vector<4x32xf32>
    %cst_327 = arith.constant 1.000000e+00 : f32
    %918 = vector.broadcast %cst_327 : f32 to vector<4x32xf32>
    %919 = arith.addf %918, %917 : vector<4x32xf32>
    %920 = arith.divf %918, %919 : vector<4x32xf32>
    %921 = vector.extract_strided_slice %903 {offsets = [0, 64], sizes = [4, 32], strides = [1, 1]} : vector<4x96xf32> to vector<4x32xf32>
    %922 = vector.broadcast %648 : vector<1x32xf32> to vector<4x32xf32>
    %923 = arith.addf %921, %922 : vector<4x32xf32>
    %924 = arith.mulf %913, %923 : vector<4x32xf32>
    %925 = arith.addf %906, %924 : vector<4x32xf32>
    %926 = math.tanh %925 : vector<4x32xf32>
    %cst_328 = arith.constant 1.000000e+00 : f32
    %927 = vector.broadcast %cst_328 : f32 to vector<4x32xf32>
    %928 = arith.subf %927, %920 : vector<4x32xf32>
    %929 = arith.mulf %928, %926 : vector<4x32xf32>
    %930 = arith.mulf %920, %866 : vector<4x32xf32>
    %931 = arith.addf %929, %930 : vector<4x32xf32>
    %932 = vector.broadcast %20 : vector<4x1xf32> to vector<4x32xf32>
    %933 = arith.mulf %932, %931 : vector<4x32xf32>
    %cst_329 = arith.constant 1.000000e+00 : f32
    %934 = vector.broadcast %cst_329 : f32 to vector<4x1xf32>
    %935 = arith.subf %934, %20 : vector<4x1xf32>
    %936 = vector.broadcast %935 : vector<4x1xf32> to vector<4x32xf32>
    %937 = arith.mulf %936, %866 : vector<4x32xf32>
    %938 = arith.addf %933, %937 : vector<4x32xf32>
    %cst_330 = arith.constant dense<0.000000e+00> : vector<4x96xf32>
    %939 = tpu.matmul %902, %645, %cst_330 {dimension_numbers = #tpu.dot_dimension_numbers<[1], [0], [0], [1], [0, 0, 1, 1], [], []>} : vector<4x32xf32>, vector<32x96xf32>, vector<4x96xf32> -> vector<4x96xf32>
    %c16_331 = arith.constant 16 : index
    %c0_332 = arith.constant 0 : index
    %940 = vector.load %arg17[%c16_331, %c0_332] : memref<32x192xf32, #tpu.memory_space<vmem>>, vector<4x32xf32>
    %c16_333 = arith.constant 16 : index
    %c32_334 = arith.constant 32 : index
    %941 = vector.load %arg17[%c16_333, %c32_334] : memref<32x192xf32, #tpu.memory_space<vmem>>, vector<4x32xf32>
    %c16_335 = arith.constant 16 : index
    %c64_336 = arith.constant 64 : index
    %942 = vector.load %arg17[%c16_335, %c64_336] : memref<32x192xf32, #tpu.memory_space<vmem>>, vector<4x32xf32>
    %943 = vector.extract_strided_slice %939 {offsets = [0, 0], sizes = [4, 32], strides = [1, 1]} : vector<4x96xf32> to vector<4x32xf32>
    %944 = arith.addf %940, %943 : vector<4x32xf32>
    %945 = arith.negf %944 : vector<4x32xf32>
    %946 = math.exp %945 : vector<4x32xf32>
    %cst_337 = arith.constant 1.000000e+00 : f32
    %947 = vector.broadcast %cst_337 : f32 to vector<4x32xf32>
    %948 = arith.addf %947, %946 : vector<4x32xf32>
    %949 = arith.divf %947, %948 : vector<4x32xf32>
    %950 = vector.extract_strided_slice %939 {offsets = [0, 32], sizes = [4, 32], strides = [1, 1]} : vector<4x96xf32> to vector<4x32xf32>
    %951 = arith.addf %941, %950 : vector<4x32xf32>
    %952 = arith.negf %951 : vector<4x32xf32>
    %953 = math.exp %952 : vector<4x32xf32>
    %cst_338 = arith.constant 1.000000e+00 : f32
    %954 = vector.broadcast %cst_338 : f32 to vector<4x32xf32>
    %955 = arith.addf %954, %953 : vector<4x32xf32>
    %956 = arith.divf %954, %955 : vector<4x32xf32>
    %957 = vector.extract_strided_slice %939 {offsets = [0, 64], sizes = [4, 32], strides = [1, 1]} : vector<4x96xf32> to vector<4x32xf32>
    %958 = vector.broadcast %647 : vector<1x32xf32> to vector<4x32xf32>
    %959 = arith.addf %957, %958 : vector<4x32xf32>
    %960 = arith.mulf %949, %959 : vector<4x32xf32>
    %961 = arith.addf %942, %960 : vector<4x32xf32>
    %962 = math.tanh %961 : vector<4x32xf32>
    %cst_339 = arith.constant 1.000000e+00 : f32
    %963 = vector.broadcast %cst_339 : f32 to vector<4x32xf32>
    %964 = arith.subf %963, %956 : vector<4x32xf32>
    %965 = arith.mulf %964, %962 : vector<4x32xf32>
    %966 = arith.mulf %956, %902 : vector<4x32xf32>
    %967 = arith.addf %965, %966 : vector<4x32xf32>
    %968 = vector.broadcast %20 : vector<4x1xf32> to vector<4x32xf32>
    %969 = arith.mulf %968, %967 : vector<4x32xf32>
    %cst_340 = arith.constant 1.000000e+00 : f32
    %970 = vector.broadcast %cst_340 : f32 to vector<4x1xf32>
    %971 = arith.subf %970, %20 : vector<4x1xf32>
    %972 = vector.broadcast %971 : vector<4x1xf32> to vector<4x32xf32>
    %973 = arith.mulf %972, %902 : vector<4x32xf32>
    %974 = arith.addf %969, %973 : vector<4x32xf32>
    %cst_341 = arith.constant dense<0.000000e+00> : vector<4x96xf32>
    %975 = tpu.matmul %938, %646, %cst_341 {dimension_numbers = #tpu.dot_dimension_numbers<[1], [0], [0], [1], [0, 0, 1, 1], [], []>} : vector<4x32xf32>, vector<32x96xf32>, vector<4x96xf32> -> vector<4x96xf32>
    %c12_342 = arith.constant 12 : index
    %c96_343 = arith.constant 96 : index
    %976 = vector.load %arg17[%c12_342, %c96_343] : memref<32x192xf32, #tpu.memory_space<vmem>>, vector<4x32xf32>
    %c12_344 = arith.constant 12 : index
    %c128_345 = arith.constant 128 : index
    %977 = vector.load %arg17[%c12_344, %c128_345] : memref<32x192xf32, #tpu.memory_space<vmem>>, vector<4x32xf32>
    %c12_346 = arith.constant 12 : index
    %c160_347 = arith.constant 160 : index
    %978 = vector.load %arg17[%c12_346, %c160_347] : memref<32x192xf32, #tpu.memory_space<vmem>>, vector<4x32xf32>
    %979 = vector.extract_strided_slice %975 {offsets = [0, 0], sizes = [4, 32], strides = [1, 1]} : vector<4x96xf32> to vector<4x32xf32>
    %980 = arith.addf %976, %979 : vector<4x32xf32>
    %981 = arith.negf %980 : vector<4x32xf32>
    %982 = math.exp %981 : vector<4x32xf32>
    %cst_348 = arith.constant 1.000000e+00 : f32
    %983 = vector.broadcast %cst_348 : f32 to vector<4x32xf32>
    %984 = arith.addf %983, %982 : vector<4x32xf32>
    %985 = arith.divf %983, %984 : vector<4x32xf32>
    %986 = vector.extract_strided_slice %975 {offsets = [0, 32], sizes = [4, 32], strides = [1, 1]} : vector<4x96xf32> to vector<4x32xf32>
    %987 = arith.addf %977, %986 : vector<4x32xf32>
    %988 = arith.negf %987 : vector<4x32xf32>
    %989 = math.exp %988 : vector<4x32xf32>
    %cst_349 = arith.constant 1.000000e+00 : f32
    %990 = vector.broadcast %cst_349 : f32 to vector<4x32xf32>
    %991 = arith.addf %990, %989 : vector<4x32xf32>
    %992 = arith.divf %990, %991 : vector<4x32xf32>
    %993 = vector.extract_strided_slice %975 {offsets = [0, 64], sizes = [4, 32], strides = [1, 1]} : vector<4x96xf32> to vector<4x32xf32>
    %994 = vector.broadcast %648 : vector<1x32xf32> to vector<4x32xf32>
    %995 = arith.addf %993, %994 : vector<4x32xf32>
    %996 = arith.mulf %985, %995 : vector<4x32xf32>
    %997 = arith.addf %978, %996 : vector<4x32xf32>
    %998 = math.tanh %997 : vector<4x32xf32>
    %cst_350 = arith.constant 1.000000e+00 : f32
    %999 = vector.broadcast %cst_350 : f32 to vector<4x32xf32>
    %1000 = arith.subf %999, %992 : vector<4x32xf32>
    %1001 = arith.mulf %1000, %998 : vector<4x32xf32>
    %1002 = arith.mulf %992, %938 : vector<4x32xf32>
    %1003 = arith.addf %1001, %1002 : vector<4x32xf32>
    %1004 = vector.broadcast %16 : vector<4x1xf32> to vector<4x32xf32>
    %1005 = arith.mulf %1004, %1003 : vector<4x32xf32>
    %cst_351 = arith.constant 1.000000e+00 : f32
    %1006 = vector.broadcast %cst_351 : f32 to vector<4x1xf32>
    %1007 = arith.subf %1006, %16 : vector<4x1xf32>
    %1008 = vector.broadcast %1007 : vector<4x1xf32> to vector<4x32xf32>
    %1009 = arith.mulf %1008, %938 : vector<4x32xf32>
    %1010 = arith.addf %1005, %1009 : vector<4x32xf32>
    %cst_352 = arith.constant dense<0.000000e+00> : vector<4x96xf32>
    %1011 = tpu.matmul %974, %645, %cst_352 {dimension_numbers = #tpu.dot_dimension_numbers<[1], [0], [0], [1], [0, 0, 1, 1], [], []>} : vector<4x32xf32>, vector<32x96xf32>, vector<4x96xf32> -> vector<4x96xf32>
    %c20_353 = arith.constant 20 : index
    %c0_354 = arith.constant 0 : index
    %1012 = vector.load %arg17[%c20_353, %c0_354] : memref<32x192xf32, #tpu.memory_space<vmem>>, vector<4x32xf32>
    %c20_355 = arith.constant 20 : index
    %c32_356 = arith.constant 32 : index
    %1013 = vector.load %arg17[%c20_355, %c32_356] : memref<32x192xf32, #tpu.memory_space<vmem>>, vector<4x32xf32>
    %c20_357 = arith.constant 20 : index
    %c64_358 = arith.constant 64 : index
    %1014 = vector.load %arg17[%c20_357, %c64_358] : memref<32x192xf32, #tpu.memory_space<vmem>>, vector<4x32xf32>
    %1015 = vector.extract_strided_slice %1011 {offsets = [0, 0], sizes = [4, 32], strides = [1, 1]} : vector<4x96xf32> to vector<4x32xf32>
    %1016 = arith.addf %1012, %1015 : vector<4x32xf32>
    %1017 = arith.negf %1016 : vector<4x32xf32>
    %1018 = math.exp %1017 : vector<4x32xf32>
    %cst_359 = arith.constant 1.000000e+00 : f32
    %1019 = vector.broadcast %cst_359 : f32 to vector<4x32xf32>
    %1020 = arith.addf %1019, %1018 : vector<4x32xf32>
    %1021 = arith.divf %1019, %1020 : vector<4x32xf32>
    %1022 = vector.extract_strided_slice %1011 {offsets = [0, 32], sizes = [4, 32], strides = [1, 1]} : vector<4x96xf32> to vector<4x32xf32>
    %1023 = arith.addf %1013, %1022 : vector<4x32xf32>
    %1024 = arith.negf %1023 : vector<4x32xf32>
    %1025 = math.exp %1024 : vector<4x32xf32>
    %cst_360 = arith.constant 1.000000e+00 : f32
    %1026 = vector.broadcast %cst_360 : f32 to vector<4x32xf32>
    %1027 = arith.addf %1026, %1025 : vector<4x32xf32>
    %1028 = arith.divf %1026, %1027 : vector<4x32xf32>
    %1029 = vector.extract_strided_slice %1011 {offsets = [0, 64], sizes = [4, 32], strides = [1, 1]} : vector<4x96xf32> to vector<4x32xf32>
    %1030 = vector.broadcast %647 : vector<1x32xf32> to vector<4x32xf32>
    %1031 = arith.addf %1029, %1030 : vector<4x32xf32>
    %1032 = arith.mulf %1021, %1031 : vector<4x32xf32>
    %1033 = arith.addf %1014, %1032 : vector<4x32xf32>
    %1034 = math.tanh %1033 : vector<4x32xf32>
    %cst_361 = arith.constant 1.000000e+00 : f32
    %1035 = vector.broadcast %cst_361 : f32 to vector<4x32xf32>
    %1036 = arith.subf %1035, %1028 : vector<4x32xf32>
    %1037 = arith.mulf %1036, %1034 : vector<4x32xf32>
    %1038 = arith.mulf %1028, %974 : vector<4x32xf32>
    %1039 = arith.addf %1037, %1038 : vector<4x32xf32>
    %1040 = vector.broadcast %24 : vector<4x1xf32> to vector<4x32xf32>
    %1041 = arith.mulf %1040, %1039 : vector<4x32xf32>
    %cst_362 = arith.constant 1.000000e+00 : f32
    %1042 = vector.broadcast %cst_362 : f32 to vector<4x1xf32>
    %1043 = arith.subf %1042, %24 : vector<4x1xf32>
    %1044 = vector.broadcast %1043 : vector<4x1xf32> to vector<4x32xf32>
    %1045 = arith.mulf %1044, %974 : vector<4x32xf32>
    %1046 = arith.addf %1041, %1045 : vector<4x32xf32>
    %cst_363 = arith.constant dense<0.000000e+00> : vector<4x96xf32>
    %1047 = tpu.matmul %1010, %646, %cst_363 {dimension_numbers = #tpu.dot_dimension_numbers<[1], [0], [0], [1], [0, 0, 1, 1], [], []>} : vector<4x32xf32>, vector<32x96xf32>, vector<4x96xf32> -> vector<4x96xf32>
    %c8_364 = arith.constant 8 : index
    %c96_365 = arith.constant 96 : index
    %1048 = vector.load %arg17[%c8_364, %c96_365] : memref<32x192xf32, #tpu.memory_space<vmem>>, vector<4x32xf32>
    %c8_366 = arith.constant 8 : index
    %c128_367 = arith.constant 128 : index
    %1049 = vector.load %arg17[%c8_366, %c128_367] : memref<32x192xf32, #tpu.memory_space<vmem>>, vector<4x32xf32>
    %c8_368 = arith.constant 8 : index
    %c160_369 = arith.constant 160 : index
    %1050 = vector.load %arg17[%c8_368, %c160_369] : memref<32x192xf32, #tpu.memory_space<vmem>>, vector<4x32xf32>
    %1051 = vector.extract_strided_slice %1047 {offsets = [0, 0], sizes = [4, 32], strides = [1, 1]} : vector<4x96xf32> to vector<4x32xf32>
    %1052 = arith.addf %1048, %1051 : vector<4x32xf32>
    %1053 = arith.negf %1052 : vector<4x32xf32>
    %1054 = math.exp %1053 : vector<4x32xf32>
    %cst_370 = arith.constant 1.000000e+00 : f32
    %1055 = vector.broadcast %cst_370 : f32 to vector<4x32xf32>
    %1056 = arith.addf %1055, %1054 : vector<4x32xf32>
    %1057 = arith.divf %1055, %1056 : vector<4x32xf32>
    %1058 = vector.extract_strided_slice %1047 {offsets = [0, 32], sizes = [4, 32], strides = [1, 1]} : vector<4x96xf32> to vector<4x32xf32>
    %1059 = arith.addf %1049, %1058 : vector<4x32xf32>
    %1060 = arith.negf %1059 : vector<4x32xf32>
    %1061 = math.exp %1060 : vector<4x32xf32>
    %cst_371 = arith.constant 1.000000e+00 : f32
    %1062 = vector.broadcast %cst_371 : f32 to vector<4x32xf32>
    %1063 = arith.addf %1062, %1061 : vector<4x32xf32>
    %1064 = arith.divf %1062, %1063 : vector<4x32xf32>
    %1065 = vector.extract_strided_slice %1047 {offsets = [0, 64], sizes = [4, 32], strides = [1, 1]} : vector<4x96xf32> to vector<4x32xf32>
    %1066 = vector.broadcast %648 : vector<1x32xf32> to vector<4x32xf32>
    %1067 = arith.addf %1065, %1066 : vector<4x32xf32>
    %1068 = arith.mulf %1057, %1067 : vector<4x32xf32>
    %1069 = arith.addf %1050, %1068 : vector<4x32xf32>
    %1070 = math.tanh %1069 : vector<4x32xf32>
    %cst_372 = arith.constant 1.000000e+00 : f32
    %1071 = vector.broadcast %cst_372 : f32 to vector<4x32xf32>
    %1072 = arith.subf %1071, %1064 : vector<4x32xf32>
    %1073 = arith.mulf %1072, %1070 : vector<4x32xf32>
    %1074 = arith.mulf %1064, %1010 : vector<4x32xf32>
    %1075 = arith.addf %1073, %1074 : vector<4x32xf32>
    %1076 = vector.broadcast %12 : vector<4x1xf32> to vector<4x32xf32>
    %1077 = arith.mulf %1076, %1075 : vector<4x32xf32>
    %cst_373 = arith.constant 1.000000e+00 : f32
    %1078 = vector.broadcast %cst_373 : f32 to vector<4x1xf32>
    %1079 = arith.subf %1078, %12 : vector<4x1xf32>
    %1080 = vector.broadcast %1079 : vector<4x1xf32> to vector<4x32xf32>
    %1081 = arith.mulf %1080, %1010 : vector<4x32xf32>
    %1082 = arith.addf %1077, %1081 : vector<4x32xf32>
    %cst_374 = arith.constant dense<0.000000e+00> : vector<4x96xf32>
    %1083 = tpu.matmul %1046, %645, %cst_374 {dimension_numbers = #tpu.dot_dimension_numbers<[1], [0], [0], [1], [0, 0, 1, 1], [], []>} : vector<4x32xf32>, vector<32x96xf32>, vector<4x96xf32> -> vector<4x96xf32>
    %c24_375 = arith.constant 24 : index
    %c0_376 = arith.constant 0 : index
    %1084 = vector.load %arg17[%c24_375, %c0_376] : memref<32x192xf32, #tpu.memory_space<vmem>>, vector<4x32xf32>
    %c24_377 = arith.constant 24 : index
    %c32_378 = arith.constant 32 : index
    %1085 = vector.load %arg17[%c24_377, %c32_378] : memref<32x192xf32, #tpu.memory_space<vmem>>, vector<4x32xf32>
    %c24_379 = arith.constant 24 : index
    %c64_380 = arith.constant 64 : index
    %1086 = vector.load %arg17[%c24_379, %c64_380] : memref<32x192xf32, #tpu.memory_space<vmem>>, vector<4x32xf32>
    %1087 = vector.extract_strided_slice %1083 {offsets = [0, 0], sizes = [4, 32], strides = [1, 1]} : vector<4x96xf32> to vector<4x32xf32>
    %1088 = arith.addf %1084, %1087 : vector<4x32xf32>
    %1089 = arith.negf %1088 : vector<4x32xf32>
    %1090 = math.exp %1089 : vector<4x32xf32>
    %cst_381 = arith.constant 1.000000e+00 : f32
    %1091 = vector.broadcast %cst_381 : f32 to vector<4x32xf32>
    %1092 = arith.addf %1091, %1090 : vector<4x32xf32>
    %1093 = arith.divf %1091, %1092 : vector<4x32xf32>
    %1094 = vector.extract_strided_slice %1083 {offsets = [0, 32], sizes = [4, 32], strides = [1, 1]} : vector<4x96xf32> to vector<4x32xf32>
    %1095 = arith.addf %1085, %1094 : vector<4x32xf32>
    %1096 = arith.negf %1095 : vector<4x32xf32>
    %1097 = math.exp %1096 : vector<4x32xf32>
    %cst_382 = arith.constant 1.000000e+00 : f32
    %1098 = vector.broadcast %cst_382 : f32 to vector<4x32xf32>
    %1099 = arith.addf %1098, %1097 : vector<4x32xf32>
    %1100 = arith.divf %1098, %1099 : vector<4x32xf32>
    %1101 = vector.extract_strided_slice %1083 {offsets = [0, 64], sizes = [4, 32], strides = [1, 1]} : vector<4x96xf32> to vector<4x32xf32>
    %1102 = vector.broadcast %647 : vector<1x32xf32> to vector<4x32xf32>
    %1103 = arith.addf %1101, %1102 : vector<4x32xf32>
    %1104 = arith.mulf %1093, %1103 : vector<4x32xf32>
    %1105 = arith.addf %1086, %1104 : vector<4x32xf32>
    %1106 = math.tanh %1105 : vector<4x32xf32>
    %cst_383 = arith.constant 1.000000e+00 : f32
    %1107 = vector.broadcast %cst_383 : f32 to vector<4x32xf32>
    %1108 = arith.subf %1107, %1100 : vector<4x32xf32>
    %1109 = arith.mulf %1108, %1106 : vector<4x32xf32>
    %1110 = arith.mulf %1100, %1046 : vector<4x32xf32>
    %1111 = arith.addf %1109, %1110 : vector<4x32xf32>
    %1112 = vector.broadcast %28 : vector<4x1xf32> to vector<4x32xf32>
    %1113 = arith.mulf %1112, %1111 : vector<4x32xf32>
    %cst_384 = arith.constant 1.000000e+00 : f32
    %1114 = vector.broadcast %cst_384 : f32 to vector<4x1xf32>
    %1115 = arith.subf %1114, %28 : vector<4x1xf32>
    %1116 = vector.broadcast %1115 : vector<4x1xf32> to vector<4x32xf32>
    %1117 = arith.mulf %1116, %1046 : vector<4x32xf32>
    %1118 = arith.addf %1113, %1117 : vector<4x32xf32>
    %cst_385 = arith.constant dense<0.000000e+00> : vector<4x96xf32>
    %1119 = tpu.matmul %1082, %646, %cst_385 {dimension_numbers = #tpu.dot_dimension_numbers<[1], [0], [0], [1], [0, 0, 1, 1], [], []>} : vector<4x32xf32>, vector<32x96xf32>, vector<4x96xf32> -> vector<4x96xf32>
    %c4_386 = arith.constant 4 : index
    %c96_387 = arith.constant 96 : index
    %1120 = vector.load %arg17[%c4_386, %c96_387] : memref<32x192xf32, #tpu.memory_space<vmem>>, vector<4x32xf32>
    %c4_388 = arith.constant 4 : index
    %c128_389 = arith.constant 128 : index
    %1121 = vector.load %arg17[%c4_388, %c128_389] : memref<32x192xf32, #tpu.memory_space<vmem>>, vector<4x32xf32>
    %c4_390 = arith.constant 4 : index
    %c160_391 = arith.constant 160 : index
    %1122 = vector.load %arg17[%c4_390, %c160_391] : memref<32x192xf32, #tpu.memory_space<vmem>>, vector<4x32xf32>
    %1123 = vector.extract_strided_slice %1119 {offsets = [0, 0], sizes = [4, 32], strides = [1, 1]} : vector<4x96xf32> to vector<4x32xf32>
    %1124 = arith.addf %1120, %1123 : vector<4x32xf32>
    %1125 = arith.negf %1124 : vector<4x32xf32>
    %1126 = math.exp %1125 : vector<4x32xf32>
    %cst_392 = arith.constant 1.000000e+00 : f32
    %1127 = vector.broadcast %cst_392 : f32 to vector<4x32xf32>
    %1128 = arith.addf %1127, %1126 : vector<4x32xf32>
    %1129 = arith.divf %1127, %1128 : vector<4x32xf32>
    %1130 = vector.extract_strided_slice %1119 {offsets = [0, 32], sizes = [4, 32], strides = [1, 1]} : vector<4x96xf32> to vector<4x32xf32>
    %1131 = arith.addf %1121, %1130 : vector<4x32xf32>
    %1132 = arith.negf %1131 : vector<4x32xf32>
    %1133 = math.exp %1132 : vector<4x32xf32>
    %cst_393 = arith.constant 1.000000e+00 : f32
    %1134 = vector.broadcast %cst_393 : f32 to vector<4x32xf32>
    %1135 = arith.addf %1134, %1133 : vector<4x32xf32>
    %1136 = arith.divf %1134, %1135 : vector<4x32xf32>
    %1137 = vector.extract_strided_slice %1119 {offsets = [0, 64], sizes = [4, 32], strides = [1, 1]} : vector<4x96xf32> to vector<4x32xf32>
    %1138 = vector.broadcast %648 : vector<1x32xf32> to vector<4x32xf32>
    %1139 = arith.addf %1137, %1138 : vector<4x32xf32>
    %1140 = arith.mulf %1129, %1139 : vector<4x32xf32>
    %1141 = arith.addf %1122, %1140 : vector<4x32xf32>
    %1142 = math.tanh %1141 : vector<4x32xf32>
    %cst_394 = arith.constant 1.000000e+00 : f32
    %1143 = vector.broadcast %cst_394 : f32 to vector<4x32xf32>
    %1144 = arith.subf %1143, %1136 : vector<4x32xf32>
    %1145 = arith.mulf %1144, %1142 : vector<4x32xf32>
    %1146 = arith.mulf %1136, %1082 : vector<4x32xf32>
    %1147 = arith.addf %1145, %1146 : vector<4x32xf32>
    %1148 = vector.broadcast %8 : vector<4x1xf32> to vector<4x32xf32>
    %1149 = arith.mulf %1148, %1147 : vector<4x32xf32>
    %cst_395 = arith.constant 1.000000e+00 : f32
    %1150 = vector.broadcast %cst_395 : f32 to vector<4x1xf32>
    %1151 = arith.subf %1150, %8 : vector<4x1xf32>
    %1152 = vector.broadcast %1151 : vector<4x1xf32> to vector<4x32xf32>
    %1153 = arith.mulf %1152, %1082 : vector<4x32xf32>
    %1154 = arith.addf %1149, %1153 : vector<4x32xf32>
    %cst_396 = arith.constant dense<0.000000e+00> : vector<4x96xf32>
    %1155 = tpu.matmul %1118, %645, %cst_396 {dimension_numbers = #tpu.dot_dimension_numbers<[1], [0], [0], [1], [0, 0, 1, 1], [], []>} : vector<4x32xf32>, vector<32x96xf32>, vector<4x96xf32> -> vector<4x96xf32>
    %c28_397 = arith.constant 28 : index
    %c0_398 = arith.constant 0 : index
    %1156 = vector.load %arg17[%c28_397, %c0_398] : memref<32x192xf32, #tpu.memory_space<vmem>>, vector<4x32xf32>
    %c28_399 = arith.constant 28 : index
    %c32_400 = arith.constant 32 : index
    %1157 = vector.load %arg17[%c28_399, %c32_400] : memref<32x192xf32, #tpu.memory_space<vmem>>, vector<4x32xf32>
    %c28_401 = arith.constant 28 : index
    %c64_402 = arith.constant 64 : index
    %1158 = vector.load %arg17[%c28_401, %c64_402] : memref<32x192xf32, #tpu.memory_space<vmem>>, vector<4x32xf32>
    %1159 = vector.extract_strided_slice %1155 {offsets = [0, 0], sizes = [4, 32], strides = [1, 1]} : vector<4x96xf32> to vector<4x32xf32>
    %1160 = arith.addf %1156, %1159 : vector<4x32xf32>
    %1161 = arith.negf %1160 : vector<4x32xf32>
    %1162 = math.exp %1161 : vector<4x32xf32>
    %cst_403 = arith.constant 1.000000e+00 : f32
    %1163 = vector.broadcast %cst_403 : f32 to vector<4x32xf32>
    %1164 = arith.addf %1163, %1162 : vector<4x32xf32>
    %1165 = arith.divf %1163, %1164 : vector<4x32xf32>
    %1166 = vector.extract_strided_slice %1155 {offsets = [0, 32], sizes = [4, 32], strides = [1, 1]} : vector<4x96xf32> to vector<4x32xf32>
    %1167 = arith.addf %1157, %1166 : vector<4x32xf32>
    %1168 = arith.negf %1167 : vector<4x32xf32>
    %1169 = math.exp %1168 : vector<4x32xf32>
    %cst_404 = arith.constant 1.000000e+00 : f32
    %1170 = vector.broadcast %cst_404 : f32 to vector<4x32xf32>
    %1171 = arith.addf %1170, %1169 : vector<4x32xf32>
    %1172 = arith.divf %1170, %1171 : vector<4x32xf32>
    %1173 = vector.extract_strided_slice %1155 {offsets = [0, 64], sizes = [4, 32], strides = [1, 1]} : vector<4x96xf32> to vector<4x32xf32>
    %1174 = vector.broadcast %647 : vector<1x32xf32> to vector<4x32xf32>
    %1175 = arith.addf %1173, %1174 : vector<4x32xf32>
    %1176 = arith.mulf %1165, %1175 : vector<4x32xf32>
    %1177 = arith.addf %1158, %1176 : vector<4x32xf32>
    %1178 = math.tanh %1177 : vector<4x32xf32>
    %cst_405 = arith.constant 1.000000e+00 : f32
    %1179 = vector.broadcast %cst_405 : f32 to vector<4x32xf32>
    %1180 = arith.subf %1179, %1172 : vector<4x32xf32>
    %1181 = arith.mulf %1180, %1178 : vector<4x32xf32>
    %1182 = arith.mulf %1172, %1118 : vector<4x32xf32>
    %1183 = arith.addf %1181, %1182 : vector<4x32xf32>
    %1184 = vector.broadcast %32 : vector<4x1xf32> to vector<4x32xf32>
    %1185 = arith.mulf %1184, %1183 : vector<4x32xf32>
    %cst_406 = arith.constant 1.000000e+00 : f32
    %1186 = vector.broadcast %cst_406 : f32 to vector<4x1xf32>
    %1187 = arith.subf %1186, %32 : vector<4x1xf32>
    %1188 = vector.broadcast %1187 : vector<4x1xf32> to vector<4x32xf32>
    %1189 = arith.mulf %1188, %1118 : vector<4x32xf32>
    %1190 = arith.addf %1185, %1189 : vector<4x32xf32>
    %cst_407 = arith.constant dense<0.000000e+00> : vector<4x96xf32>
    %1191 = tpu.matmul %1154, %646, %cst_407 {dimension_numbers = #tpu.dot_dimension_numbers<[1], [0], [0], [1], [0, 0, 1, 1], [], []>} : vector<4x32xf32>, vector<32x96xf32>, vector<4x96xf32> -> vector<4x96xf32>
    %c0_408 = arith.constant 0 : index
    %c96_409 = arith.constant 96 : index
    %1192 = vector.load %arg17[%c0_408, %c96_409] : memref<32x192xf32, #tpu.memory_space<vmem>>, vector<4x32xf32>
    %c0_410 = arith.constant 0 : index
    %c128_411 = arith.constant 128 : index
    %1193 = vector.load %arg17[%c0_410, %c128_411] : memref<32x192xf32, #tpu.memory_space<vmem>>, vector<4x32xf32>
    %c0_412 = arith.constant 0 : index
    %c160_413 = arith.constant 160 : index
    %1194 = vector.load %arg17[%c0_412, %c160_413] : memref<32x192xf32, #tpu.memory_space<vmem>>, vector<4x32xf32>
    %1195 = vector.extract_strided_slice %1191 {offsets = [0, 0], sizes = [4, 32], strides = [1, 1]} : vector<4x96xf32> to vector<4x32xf32>
    %1196 = arith.addf %1192, %1195 : vector<4x32xf32>
    %1197 = arith.negf %1196 : vector<4x32xf32>
    %1198 = math.exp %1197 : vector<4x32xf32>
    %cst_414 = arith.constant 1.000000e+00 : f32
    %1199 = vector.broadcast %cst_414 : f32 to vector<4x32xf32>
    %1200 = arith.addf %1199, %1198 : vector<4x32xf32>
    %1201 = arith.divf %1199, %1200 : vector<4x32xf32>
    %1202 = vector.extract_strided_slice %1191 {offsets = [0, 32], sizes = [4, 32], strides = [1, 1]} : vector<4x96xf32> to vector<4x32xf32>
    %1203 = arith.addf %1193, %1202 : vector<4x32xf32>
    %1204 = arith.negf %1203 : vector<4x32xf32>
    %1205 = math.exp %1204 : vector<4x32xf32>
    %cst_415 = arith.constant 1.000000e+00 : f32
    %1206 = vector.broadcast %cst_415 : f32 to vector<4x32xf32>
    %1207 = arith.addf %1206, %1205 : vector<4x32xf32>
    %1208 = arith.divf %1206, %1207 : vector<4x32xf32>
    %1209 = vector.extract_strided_slice %1191 {offsets = [0, 64], sizes = [4, 32], strides = [1, 1]} : vector<4x96xf32> to vector<4x32xf32>
    %1210 = vector.broadcast %648 : vector<1x32xf32> to vector<4x32xf32>
    %1211 = arith.addf %1209, %1210 : vector<4x32xf32>
    %1212 = arith.mulf %1201, %1211 : vector<4x32xf32>
    %1213 = arith.addf %1194, %1212 : vector<4x32xf32>
    %1214 = math.tanh %1213 : vector<4x32xf32>
    %cst_416 = arith.constant 1.000000e+00 : f32
    %1215 = vector.broadcast %cst_416 : f32 to vector<4x32xf32>
    %1216 = arith.subf %1215, %1208 : vector<4x32xf32>
    %1217 = arith.mulf %1216, %1214 : vector<4x32xf32>
    %1218 = arith.mulf %1208, %1154 : vector<4x32xf32>
    %1219 = arith.addf %1217, %1218 : vector<4x32xf32>
    %1220 = vector.broadcast %4 : vector<4x1xf32> to vector<4x32xf32>
    %1221 = arith.mulf %1220, %1219 : vector<4x32xf32>
    %cst_417 = arith.constant 1.000000e+00 : f32
    %1222 = vector.broadcast %cst_417 : f32 to vector<4x1xf32>
    %1223 = arith.subf %1222, %4 : vector<4x1xf32>
    %1224 = vector.broadcast %1223 : vector<4x1xf32> to vector<4x32xf32>
    %1225 = arith.mulf %1224, %1154 : vector<4x32xf32>
    %1226 = arith.addf %1221, %1225 : vector<4x32xf32>
    %c0_418 = arith.constant 0 : index
    %c0_419 = arith.constant 0 : index
    %1227 = vector.load %arg13[%c0_418, %c0_419] : memref<64x1xf32, #tpu.memory_space<vmem>>, vector<32x1xf32>
    %cst_420 = arith.constant dense<0.000000e+00> : vector<4x1xf32>
    %1228 = tpu.matmul %1190, %1227, %cst_420 {dimension_numbers = #tpu.dot_dimension_numbers<[1], [0], [0], [1], [0, 0, 1, 1], [], []>} : vector<4x32xf32>, vector<32x1xf32>, vector<4x1xf32> -> vector<4x1xf32>
    %c32_421 = arith.constant 32 : index
    %c0_422 = arith.constant 0 : index
    %1229 = vector.load %arg13[%c32_421, %c0_422] : memref<64x1xf32, #tpu.memory_space<vmem>>, vector<32x1xf32>
    %cst_423 = arith.constant dense<0.000000e+00> : vector<4x1xf32>
    %1230 = tpu.matmul %1226, %1229, %cst_423 {dimension_numbers = #tpu.dot_dimension_numbers<[1], [0], [0], [1], [0, 0, 1, 1], [], []>} : vector<4x32xf32>, vector<32x1xf32>, vector<4x1xf32> -> vector<4x1xf32>
    %1231 = arith.addf %1228, %1230 : vector<4x1xf32>
    %c0_424 = arith.constant 0 : index
    %c0_425 = arith.constant 0 : index
    %1232 = vector.load %arg14[%c0_424, %c0_425] : memref<1x1xf32, #tpu.memory_space<vmem>>, vector<1x1xf32>
    %1233 = vector.broadcast %1232 : vector<1x1xf32> to vector<4x1xf32>
    %1234 = arith.addf %1231, %1233 : vector<4x1xf32>
    %c0_426 = arith.constant 0 : index
    %c0_427 = arith.constant 0 : index
    %1235 = vector.load %arg15[%c0_426, %c0_427] : memref<4x1xf32, #tpu.memory_space<vmem>>, vector<4x1xf32>
    tpu.vector_store %arg15[%c0_426, %c0_427], %1234 {strides = array<i32>} : memref<4x1xf32, #tpu.memory_space<vmem>>, vector<4x1xf32>,
    return
  }
  func.func @transform_0(%arg0: i32) -> (i32, i32) {
    %c0_i32 = arith.constant 0 : i32
    %c0_i32_0 = arith.constant 0 : i32
    %c0_i32_1 = arith.constant 0 : i32
    return %c0_i32, %c0_i32_0 : i32, i32
  }
  func.func @transform_1(%arg0: i32) -> (i32, i32) {
    %c0_i32 = arith.constant 0 : i32
    %c0_i32_0 = arith.constant 0 : i32
    %c0_i32_1 = arith.constant 0 : i32
    return %c0_i32, %c0_i32_0 : i32, i32
  }
  func.func @transform_2(%arg0: i32) -> (i32, i32) {
    %c0_i32 = arith.constant 0 : i32
    %c0_i32_0 = arith.constant 0 : i32
    %c0_i32_1 = arith.constant 0 : i32
    return %c0_i32, %c0_i32_0 : i32, i32
  }
  func.func @transform_3(%arg0: i32) -> (i32, i32) {
    %c0_i32 = arith.constant 0 : i32
    %c0_i32_0 = arith.constant 0 : i32
    %c0_i32_1 = arith.constant 0 : i32
    return %c0_i32, %c0_i32_0 : i32, i32
  }
  func.func @transform_4(%arg0: i32) -> (i32, i32) {
    %c0_i32 = arith.constant 0 : i32
    %c0_i32_0 = arith.constant 0 : i32
    %c0_i32_1 = arith.constant 0 : i32
    return %c0_i32, %c0_i32_0 : i32, i32
  }
  func.func @transform_5(%arg0: i32) -> (i32, i32) {
    %c0_i32 = arith.constant 0 : i32
    %c0_i32_0 = arith.constant 0 : i32
    %c0_i32_1 = arith.constant 0 : i32
    return %c0_i32, %c0_i32_0 : i32, i32
  }
  func.func @transform_6(%arg0: i32) -> (i32, i32) {
    %c0_i32 = arith.constant 0 : i32
    %c0_i32_0 = arith.constant 0 : i32
    %c0_i32_1 = arith.constant 0 : i32
    return %c0_i32, %c0_i32_0 : i32, i32
  }
  func.func @transform_7(%arg0: i32) -> (i32, i32) {
    %c0_i32 = arith.constant 0 : i32
    %c0_i32_0 = arith.constant 0 : i32
    %c0_i32_1 = arith.constant 0 : i32
    return %c0_i32, %c0_i32_0 : i32, i32
  }
  func.func @transform_8(%arg0: i32) -> (i32, i32) {
    %c0_i32 = arith.constant 0 : i32
    %c0_i32_0 = arith.constant 0 : i32
    %c0_i32_1 = arith.constant 0 : i32
    return %c0_i32, %c0_i32_0 : i32, i32
  }
  func.func @transform_9(%arg0: i32) -> (i32, i32) {
    %c0_i32 = arith.constant 0 : i32
    %c0_i32_0 = arith.constant 0 : i32
    %c0_i32_1 = arith.constant 0 : i32
    return %c0_i32, %c0_i32_0 : i32, i32
  }
  func.func @transform_10(%arg0: i32) -> (i32, i32) {
    %c0_i32 = arith.constant 0 : i32
    %c0_i32_0 = arith.constant 0 : i32
    %c0_i32_1 = arith.constant 0 : i32
    return %c0_i32, %c0_i32_0 : i32, i32
  }
  func.func @transform_11(%arg0: i32) -> (i32, i32) {
    %c0_i32 = arith.constant 0 : i32
    %c0_i32_0 = arith.constant 0 : i32
    %c0_i32_1 = arith.constant 0 : i32
    return %c0_i32, %c0_i32_0 : i32, i32
  }
  func.func @transform_12(%arg0: i32) -> (i32, i32) {
    %c0_i32 = arith.constant 0 : i32
    %c0_i32_0 = arith.constant 0 : i32
    %c0_i32_1 = arith.constant 0 : i32
    return %c0_i32, %c0_i32_0 : i32, i32
  }
  func.func @transform_13(%arg0: i32) -> (i32, i32) {
    %c0_i32 = arith.constant 0 : i32
    %c0_i32_0 = arith.constant 0 : i32
    %c0_i32_1 = arith.constant 0 : i32
    return %c0_i32, %c0_i32_0 : i32, i32
  }
  func.func @transform_14(%arg0: i32) -> (i32, i32) {
    %c0_i32 = arith.constant 0 : i32
    %c0_i32_0 = arith.constant 0 : i32
    %c0_i32_1 = arith.constant 0 : i32
    return %c0_i32, %c0_i32_0 : i32, i32
  }
}

</mosaic_0001>

<bundles_post_ra>
// kernel: forward.1
= control target key start
LH: loop header
LB: loop body
LE: loop exit
PB: predicated region body
PF: predicated region fallthrough
CT: control target
= control target key end

     0   :  { %v5560_v0 = vmov 0.0|0.0   ;;  %vm5561_vm0 = vmmov 0   ;;  %v5562_v4 = vmov 0.0   ;;  %s5564_s26 = smov 32   ;;  %vm98_vm1 = vcmask 261120   ;;  %s6650_s2 = inlined_call_operand.vmem [shape: f32[32,192], index: 2, kind: input, shape index: {}]   ;;  %s6651_s3 = inlined_call_operand.vmem [shape: f32[32,96], index: 3, kind: input, shape index: {}]   ;;  %s6652_s4 = inlined_call_operand.vmem [shape: f32[32,96], index: 4, kind: input, shape index: {}]   ;;  %s6653_s6 = inlined_call_operand.vmem [shape: f32[1,64], index: 6, kind: input, shape index: {}]   ;;  %s6654_s0 = inlined_call_operand.vmem [shape: f32[32,32], index: 0, kind: input, shape index: {}]   ;;  %s6655_s5 = inlined_call_operand.vmem [shape: f32[1,192], index: 5, kind: input, shape index: {}]   ;;  %s6656_s1 = inlined_call_operand.vmem [shape: f32[4,1], index: 1, kind: input, shape index: {}]   ;;  %s6657_s8 = inlined_call_operand.vmem [shape: f32[32,96], index: 8, kind: input, shape index: {}]   ;;  %s6658_s7 = inlined_call_operand.vmem [shape: f32[64,192], index: 7, kind: input, shape index: {}]   ;;  %s6659_s11 = inlined_call_operand.vmem [shape: f32[1,64], index: 11, kind: input, shape index: {}]   ;;  %s6660_s9 = inlined_call_operand.vmem [shape: f32[32,96], index: 9, kind: input, shape index: {}]   ;;  %s6661_s10 = inlined_call_operand.vmem [shape: f32[1,192], index: 10, kind: input, shape index: {}]   ;;  %s6662_s12 = inlined_call_operand.vmem [shape: f32[64,1], index: 12, kind: input, shape index: {}]   ;;  %s6663_s13 = inlined_call_operand.<no memory space> [shape: f32[1,1], index: 13, kind: input, shape index: {}]   ;;  %s6664_s14 = inlined_call_operand.vmem [shape: f32[4,1], index: 14, kind: output, shape index: {}]  }
   0x1   :  { %5073 = vmatprep.subr.bf16.mxu1 %v5560_v0  ;;  %v79_v1 = vld [vmem:[%s6650_s2 + $0x8] sm:$0xff]  ;;  %v81_v2 = vld [vmem:[%s6650_s2 + $0x18] sm:$0xff]  ;;  %v209_v3 = vld [vmem:[%s6651_s3] sm:$0xff]  ;;  %4699 = vmatprep.mubr.msk.f32.mxu1 %vm5561_vm0, %v5562_v4  ;;  %v88_v31 = vlaneseq  ;;  %vm201_vm2 = vcmask 523264   ;;  %vm477_vm5 = vcmask 257024   ;;  %vm483_vm12 = vcmask 519424  }
   0x2   :  { %v5065_v5 = vpack.c.bf16 %v81_v2, %v79_v1  ;;  %v210_v6 = vld [vmem:[%s6651_s3 + $0x8] sm:$0xff]  ;;  %v78_v7 = vld [vmem:[%s6650_s2] sm:$0xff]  ;;  %v80_v8 = vld [vmem:[%s6650_s2 + $0x10] sm:$0xff]  ;;  %175 = vmatprep.mubr.f32.mxu0 %v5562_v4  ;;  %vm4418_vm13 = vcmask 3072  }
   0x3   :  { %v5664_v9 = vpack.c.bf16 %v210_v6, %v209_v3  ;;  %v5067_v10 = vpack.c.bf16 %v80_v8, %v78_v7  ;;  %v83_v11 = vld [vmem:[%s6650_s2 + $0x28] sm:$0xff]  ;;  %v85_v12 = vld [vmem:[%s6650_s2 + $0x38] sm:$0xff]  ;;  %v211_v13 = vld [vmem:[%s6651_s3 + $0x10] sm:$0xff]  ;;  %v5751_v32 = vshrl.u32 %v88_v31, 7  ;;  %v5566_v7 = vmov 0  }
   0x4   :  { %5066 = vmatprep.subr.bf16.mxu0 %v5065_v5  ;;  %v5069_v14 = vpack.c.bf16 %v85_v12, %v83_v11  ;;  %v212_v15 = vld [vmem:[%s6651_s3 + $0x18] sm:$0xff]  ;;  %v82_v16 = vld [vmem:[%s6650_s2 + $0x20] sm:$0xff]  ;;  %v84_v17 = vld [vmem:[%s6650_s2 + $0x30] sm:$0xff]  ;;  %s5563_s2 = smov 64   ;;  %5300 = vset.pattern.permute.xlu1 %v5566_v7 }
   0x5   :  { %5075 = vmatpush3.bf16.msra.mxu1 %v5664_v9  ;;  %5068 = vmatpush1.bf16.msra.mxu0 %v5067_v10  ;;  %v5685_v18 = vpack.c.bf16 %v212_v15, %v211_v13  ;;  %v5071_v19 = vpack.c.bf16 %v84_v17, %v82_v16  ;;  %v213_v20 = vld [vmem:[%s6652_s4] sm:$0xff]  ;;  %v214_v21 = vld [vmem:[%s6652_s4 + $0x8] sm:$0xff]  ;;  %v215_v25 = vld [vmem:[%s6652_s4 + $0x10] sm:$0xff]  ;;  %v90_v33 = vsub.s32 0, %v5751_v32  ;;  %v94_v35 = vsub.s32 1, %v5751_v32 }
   0x6   :  { %5076 = vmatprep.subr.bf16.mxu1 %v5560_v0  ;;  %5070 = vmatprep.subr.bf16.mxu0 %v5069_v14  ;;  %v4437_v22 = vld [vmem:[%s6653_s6] ss:$0 sm:$0xff]  ;;  %v5703_v24 = vpack.c.bf16 %v214_v21, %v213_v20  ;;  %v216_v26 = vld [vmem:[%s6652_s4 + $0x18] sm:$0xff]  ;;  %v75_v28 = vld [vmem:[%s6654_s0 + $0x8] sm:$0xff] }
   0x7   :  { %304 = vrot.lane.b32.xlu1 %v4437_v22, %s5563_s2  ;;  %432 = vrot.lane.b32.xlu0 %v4437_v22, %s5564_s26  ;;  %v74_v23 = vld [vmem:[%s6654_s0] sm:$0xff]  ;;  %v5716_v27 = vpack.c.bf16 %v216_v26, %v215_v25  ;;  %v76_v29 = vld [vmem:[%s6654_s0 + $0x10] sm:$0xff] }
   0x8   :  { %v77_v30 = vld [vmem:[%s6654_s0 + $0x18] sm:$0xff]  ;;  %v86_v34 = vld [vmem:[%s6655_s5] sm:$0x3]  ;;  %s5565_s5 = smov 96   ;;  %5301 = vset.pattern.permute.xlu0 %v5566_v7 }
   0x9   :  { %5078 = vmatpush3.bf16.msra.mxu1 %v5685_v18  ;;  %5072 = vmatpush1.bf16.msra.mxu0 %v5071_v19  ;;  %v91_v36 = vrot.slane %v86_v34, %v90_v33  ;;  %v95_v37 = vrot.slane %v86_v34, %v94_v35  ;;  %v5778_v11 = vld [vmem:[%s6656_s1] sm:$0xf] }
   0xa   :  { %5079 = vmatprep.subr.bf16.mxu1 %v5560_v0  ;;  %5085 = vmatprep.subr.bf16.mxu0 %v5560_v0  ;;  %vm71_vm3 = vcmp.gt.f32.partialorder %v5778_v11, 7.0  ;;  %vm50_vm4 = vcmp.gt.f32.partialorder %v5778_v11, 0.0  ;;  %vm68_vm6 = vcmp.gt.f32.partialorder %v5778_v11, 6.0  ;;  %vm53_vm7 = vcmp.gt.f32.partialorder %v5778_v11, 1.0 }
   0xb   :  { %v4431_v17 = vsel %vm71_vm3, 1.0, %v5562_v4  ;;  %v4424_v26 = vsel %vm50_vm4, 1.0, %v5562_v4  ;;  %vm65_vm8 = vcmp.gt.f32.partialorder %v5778_v11, 5.0  ;;  %vm56_vm9 = vcmp.gt.f32.partialorder %v5778_v11, 2.0 }
   0xc   :  { %4700 = vmatmul.mubr.f32.vlgmr.msra.gmra.mrb[0].mxu1 %v5562_v4  ;;  %4432 = vmatmul.mubr.msk.f32.vlgmr.msra.gmra.mrb[0].mxu0 %vm98_vm1, %v74_v23  ;;  %v465_v19 = vsub.f32 1.0, %v4431_v17  ;;  %vm62_vm10 = vcmp.gt.f32.partialorder %v5778_v11, 4.0  ;;  %vm59_vm11 = vcmp.gt.f32.partialorder %v5778_v11, 3.0 }
   0xd   :  { %5081 = vmatpush3.bf16.msra.mxu1 %v5703_v24  ;;  %4710 = vmatprep.mubr.msk.f32.mxu1 %vm5561_vm0, %v5562_v4 }
   0xe   :  { %5082 = vmatprep.subr.bf16.mxu1 %v5560_v0  ;;  %181 = vmatprep.mubr.f32.mxu0 %v5562_v4 }
   0xf   :  { %5087 = vmatpush3.bf16.msra.mxu0 %v5664_v9 }
  0x10   :  { %4433 = vmatmul.mubr.msk.f32.gmra.mrb[2].mxu0 %vm98_vm1, %v75_v28  ;;  %5088 = vmatprep.subr.bf16.mxu0 %v5560_v0  ;;  %v333_v28 = vsub.f32 1.0, %v4424_v26 }
  0x11   :  { %5084 = vmatpush3.bf16.msra.mxu1 %v5716_v27  ;;  %187 = vmatprep.mubr.f32.mxu0 %v5562_v4 }
  0x12   :  { %5091 = vmatprep.subr.bf16.mxu1 %v5560_v0 }
  0x13   :  { %5090 = vmatpush3.bf16.msra.mxu0 %v5685_v18 }
  0x14   :  { %4711 = vmatmul.mubr.f32.vlgmr.msra.gmra.mrb[2].mxu1 %v5562_v4  ;;  %4434 = vmatmul.mubr.msk.f32.gmra.mrb[4].mxu0 %vm98_vm1, %v76_v29 }
  0x15   :  { %193 = vmatprep.mubr.f32.mxu0 %v5562_v4  ;;  %5093 = vmatpush3.bf16.msra.mxu1 %v5703_v24 }
  0x16   :  { %5094 = vmatprep.subr.bf16.mxu1 %v5560_v0  ;;  %4732 = vmatprep.mubr.msk.f32.mxu1 %vm5561_vm0, %v5562_v4 }
  0x17   :  { %5097 = vmatprep.subr.bf16.mxu0 %v5560_v0 }
  0x18   :  { %4435 = vmatmul.mubr.msk.f32.gmra.mrb[6].mxu0 %vm98_vm1, %v77_v30 }
  0x19   :  { %5096 = vmatpush3.bf16.msra.mxu1 %v5716_v27  ;;  %4721 = vmatprep.mubr.msk.f32.mxu0 %vm5561_vm0, %v5562_v4 }
  0x1a   :  { %5103 = vmatprep.subr.bf16.mxu1 %v5560_v0 }
  0x79   :  { %v5763_v47 = vpop.permute.xlu0 %432  ;;  %v5767_v56 = vpop.permute.xlu1 %304 }
  0xdf   :  { %v287_v38 = vpop.f32.mrb[0].mxu1  ;;  %v177_v39 = vpop.f32.mrb[0].mxu0 }
  0xe0   :  { %v178_v40 = vadd.f32 %v177_v39, %v91_v36  ;;  %v4701_v41 = vpop.f32.mrb[1].mxu1  ;;  %v179_v42 = vpop.f32.mrb[1].mxu0  ;;  %v307_v60 = vadd.f32 %v5767_v56, %v287_v38 }
  0xe1   :  { %v180_v43 = vadd.f32 %v179_v42, %v95_v37 }
  0xe2   :  { %200 = vst [vmem:[#allocation2] sm:$0xff] %v178_v40 }
  0xe3   :  { %202 = vst.msk [vmem:[#allocation2 + $0x8] sm:$0xff] %vm201_vm2, %v180_v43  ;;  %v183_v44 = vpop.f32.mrb[2].mxu0 }
  0xe4   :  { %v184_v45 = vadd.f32 %v183_v44, %v91_v36  ;;  %v185_v46 = vpop.f32.mrb[3].mxu0 }
  0xe5   :  { %v186_v48 = vadd.f32 %v185_v46, %v95_v37 }
  0xe6   :  { %203 = vst [vmem:[#allocation2 + $0x10] sm:$0xff] %v184_v45 }
  0xe7   :  { %v407_v49 = vpop.f32.mrb[2].mxu1  ;;  %204 = vst.msk [vmem:[#allocation2 + $0x18] sm:$0xff] %vm201_vm2, %v186_v48  ;;  %v189_v50 = vpop.f32.mrb[4].mxu0 }
  0xe8   :  { %v414_v51 = vrot.slane %v407_v49, 4  ;;  %v435_v52 = vadd.f32 %v5763_v47, %v407_v49  ;;  %v4712_v53 = vpop.f32.mrb[3].mxu1  ;;  %v190_v54 = vadd.f32 %v189_v50, %v91_v36  ;;  %v191_v55 = vpop.f32.mrb[5].mxu0 }
  0xe9   :  { %v192_v57 = vadd.f32 %v191_v55, %v95_v37  ;;  %v291_v1 = vld [vmem:[#allocation2] sm:$0xf] }
  0xea   :  { %v437_v58 = vrot.slane %v435_v52, 4  ;;  %415 = vrot.lane.b32.xlu0 %v414_v51, %s5565_s5  ;;  %205 = vst [vmem:[#allocation2 + $0x20] sm:$0xff] %v190_v54  ;;  %v292_v2 = vadd.f32 %v291_v1, %v287_v38 }
  0xeb   :  { %206 = vst.msk [vmem:[#allocation2 + $0x28] sm:$0xff] %vm201_vm2, %v192_v57  ;;  %v195_v59 = vpop.f32.mrb[6].mxu0 }
  0xec   :  { %438 = vrot.lane.b32.xlu1 %v437_v58, %s5564_s26  ;;  %v196_v61 = vadd.f32 %v195_v59, %v91_v36  ;;  %v197_v62 = vpop.f32.mrb[7].mxu0  ;;  %v4436_v3 = vmul.f32 -1.442695, %v292_v2 }
  0xed   :  { %v198_v63 = vadd.f32 %v197_v62, %v95_v37 }
  0xee   :  { %309 = vrot.lane.b32.xlu0 %v307_v60, %s5563_s2  ;;  %207 = vst [vmem:[#allocation2 + $0x30] sm:$0xff] %v196_v61  ;;  %5302 = vpow2.f32 %v4436_v3 }
  0xef   :  { %208 = vst.msk [vmem:[#allocation2 + $0x38] sm:$0xff] %vm201_vm2, %v198_v63 }
  0xf5   :  { %v411_v8 = vld [vmem:[#allocation2 + $0x30] sm:$0xf0] }
  0xf6   :  { %v412_v29 = vld [vmem:[#allocation2 + $0x38] sm:$0xf0] }
  0xf8   :  { %v5303_v5 = vpop.eup %5302 }
  0xf9   :  { %v296_v6 = vadd.f32 1.0, %v5303_v5 }
  0xfb   :  { %5304 = vrcp.f32 %v296_v6 }
 0x105   :  { %v5305_v14 = vpop.eup %5304 }
 0x106   :  { %v319_v58 = vsub.f32 1.0, %v5305_v14  ;;  %v325_v60 = vmul.f32 0.0, %v5305_v14 }
 0x15c   :  { %v416_v10 = vpop.permute.xlu0 %415 }
 0x15d   :  { %v418_v12 = vadd.f32 %v416_v10, %v411_v8  ;;  %v425_v39 = vadd.f32 %v416_v10, %v412_v29  ;;  %v686_v10 = vld [vmem:[#allocation2 + $0x30] sm:$0xf] }
 0x15e   :  { %v439_v23 = vpop.permute.xlu1 %438 }
 0x15f   :  { %v4438_v13 = vmul.f32 -1.442695, %v418_v12  ;;  %v4439_v40 = vmul.f32 -1.442695, %v425_v39 }
 0x160   :  { %v310_v15 = vpop.permute.xlu0 %309 }
 0x161   :  { %5306 = vpow2.f32 %v4438_v13  ;;  %v312_v16 = vmul.f32 %v5305_v14, %v310_v15 }
 0x163   :  { %314 = vrot.lane.b32.xlu0 %v312_v16, %s5563_s2 }
 0x167   :  { %468 = vperm.xlu0 %5301, %v465_v19  }
 0x16b   :  { %v5307_v20 = vpop.eup %5306  ;;  %336 = vperm.xlu0 %5301, %v333_v28  }
 0x16c   :  { %v422_v21 = vadd.f32 1.0, %v5307_v20 }
 0x16e   :  { %5308 = vrcp.f32 %v422_v21  ;;  %v4430_v21 = vsel %vm68_vm6, 1.0, %v5562_v4 }
 0x178   :  { %v5309_v22 = vpop.eup %5308 }
 0x179   :  { %v441_v25 = vmul.f32 %v5309_v22, %v439_v23  ;;  %v732_v23 = vsub.f32 1.0, %v4430_v21 }
 0x17b   :  { %443 = vrot.lane.b32.xlu1 %v441_v25, %s5563_s2 }
 0x17f   :  { %458 = vperm.xlu1 %5300, %v4431_v17  }
 0x1d5   :  { %v315_v34 = vpop.permute.xlu0 %314 }
 0x1d6   :  { %v317_v36 = vadd.f32 %v315_v34, %v291_v1 }
 0x1e6   :  { %v5790_v50 = vpop.permute.xlu0 %468 }
 0x1e7   :  { %v5793_v53 = vmul.f32 0.0, %v5790_v50 }
 0x1ea   :  { %v5809_v62 = vpop.permute.xlu0 %336 }
 0x1eb   :  { %v5813_v2 = vmul.f32 0.0, %v5809_v62 }
 0x1ed   :  { %v444_v30 = vpop.permute.xlu1 %443 }
 0x1ee   :  { %v446_v31 = vadd.f32 %v444_v30, %v412_v29  ;;  %v557_v30 = vld [vmem:[#allocation2] sm:$0xf0] }
 0x1f0   :  { %5310 = vtanh.f32 %v446_v31 }
 0x1f1   :  { %5312 = vtanh.f32 %v317_v36 }
 0x1f2   :  { %5314 = vpow2.f32 %v4439_v40 }
 0x1fa   :  { %v5311_v37 = vpop.eup %5310 }
 0x1fb   :  { %450 = vrot.lane.b32.xlu1 %v5311_v37, %s5565_s5  ;;  %v5313_v38 = vpop.eup %5312 }
 0x1fc   :  { %v5315_v41 = vpop.eup %5314 }
 0x1fd   :  { %v429_v42 = vadd.f32 1.0, %v5315_v41  ;;  %v687_v41 = vld [vmem:[#allocation2 + $0x38] sm:$0xf] }
 0x1fe   :  { %v5788_v43 = vpop.permute.xlu1 %458 }
 0x1ff   :  { %329 = vperm.xlu1 %5300, %v4424_v26   ;;  %5316 = vrcp.f32 %v429_v42 }
 0x203   :  { %321 = vrot.lane.b32.xlu1 %v5313_v38, %s5565_s5 }
 0x209   :  { %v5317_v44 = vpop.eup %5316 }
 0x20a   :  { %v448_v45 = vsub.f32 1.0, %v5317_v44  ;;  %v454_v48 = vmul.f32 0.0, %v5317_v44 }
 0x26d   :  { %v451_v46 = vpop.permute.xlu1 %450 }
 0x26e   :  { %v453_v49 = vmul.f32 %v451_v46, %v448_v45  ;;  %v4425_v45 = vsel %vm53_vm7, 1.0, %v5562_v4 }
 0x270   :  { %v455_v51 = vadd.f32 %v454_v48, %v453_v49  ;;  %v602_v48 = vsub.f32 1.0, %v4425_v45 }
 0x272   :  { %v462_v52 = vrot.slane %v455_v51, 4 }
 0x274   :  { %v464_v54 = vmul.f32 %v462_v52, %v5788_v43 }
 0x276   :  { %v5797_v55 = vadd.f32 %v5793_v53, %v464_v54 }
 0x278   :  { %4733 = vmatmul.mubr.msk.f32.vlgmr.msra.gmra.mrb[4].mxu1 %vm98_vm1, %v5797_v55 }
 0x279   :  { %5105 = vmatpush3.bf16.msra.mxu1 %v5703_v24  ;;  %4754 = vmatprep.mubr.msk.f32.mxu1 %vm5561_vm0, %v5562_v4 }
 0x27a   :  { %5106 = vmatprep.subr.bf16.mxu1 %v5560_v0 }
 0x27d   :  { %5108 = vmatpush3.bf16.msra.mxu1 %v5716_v27 }
 0x27e   :  { %v5806_v57 = vpop.permute.xlu1 %329  ;;  %5115 = vmatprep.subr.bf16.mxu1 %v5560_v0 }
 0x282   :  { %v322_v59 = vpop.permute.xlu1 %321 }
 0x283   :  { %v324_v61 = vmul.f32 %v322_v59, %v319_v58 }
 0x285   :  { %v326_v63 = vadd.f32 %v325_v60, %v324_v61 }
 0x287   :  { %v332_v1 = vmul.f32 %v5806_v57, %v326_v63 }
 0x289   :  { %v5816_v3 = vadd.f32 %v5813_v2, %v332_v1 }
 0x28b   :  { %474 = vrot.lane.b32.xlu0 %v5816_v3, %s5565_s5 }
 0x2fd   :  { %v475_v5 = vpop.permute.xlu0 %474 }
 0x2fe   :  { %478 = vst.msk [vmem:[#allocation4] sm:$0xf] %vm477_vm5, %v475_v5  ;;  %4722 = vmatmul.mubr.msk.f32.vlgmr.msra.gmra.mrb[8].mxu0 %vm98_vm1, %v475_v5 }
 0x2ff   :  { %5099 = vmatpush3.bf16.msra.mxu0 %v5664_v9  ;;  %4743 = vmatprep.mubr.msk.f32.mxu0 %vm5561_vm0, %v5562_v4 }
 0x300   :  { %5100 = vmatprep.subr.bf16.mxu0 %v5560_v0 }
 0x303   :  { %5102 = vmatpush3.bf16.msra.mxu0 %v5685_v18 }
 0x304   :  { %5109 = vmatprep.subr.bf16.mxu0 %v5560_v0 }
 0x34b   :  { %v682_v6 = vpop.f32.mrb[4].mxu1 }
 0x34c   :  { %v706_v7 = vadd.f32 %v682_v6, %v5763_v47  ;;  %689 = vrot.lane.b32.xlu1 %v682_v6, %s5565_s5  ;;  %v4734_v8 = vpop.f32.mrb[5].mxu1 }
 0x34e   :  { %708 = vrot.lane.b32.xlu0 %v706_v7, %s5564_s26 }
 0x3be   :  { %v690_v12 = vpop.permute.xlu1 %689 }
 0x3bf   :  { %v692_v13 = vadd.f32 %v690_v12, %v686_v10  ;;  %v699_v49 = vadd.f32 %v690_v12, %v687_v41 }
 0x3c0   :  { %v709_v26 = vpop.permute.xlu0 %708 }
 0x3c1   :  { %v4443_v14 = vmul.f32 -1.442695, %v692_v13  ;;  %v4444_v51 = vmul.f32 -1.442695, %v699_v49 }
 0x3c3   :  { %5318 = vpow2.f32 %v4443_v14 }
 0x3cd   :  { %v5319_v15 = vpop.eup %5318 }
 0x3ce   :  { %v696_v16 = vadd.f32 1.0, %v5319_v15 }
 0x3d0   :  { %5320 = vrcp.f32 %v696_v16 }
 0x3d1   :  { %v553_v17 = vpop.f32.mrb[8].mxu0 }
 0x3d2   :  { %v568_v19 = vadd.f32 %v553_v17, %v5767_v56  ;;  %v4723_v20 = vpop.f32.mrb[9].mxu0  ;;  %v559_v29 = vrot.slane %v553_v17, 4 }
 0x3d4   :  { %v570_v22 = vrot.slane %v568_v19, 4  ;;  %v561_v31 = vadd.f32 %v559_v29, %v557_v30  ;;  %v587_v19 = vrot.slane %v5816_v3, 4 }
 0x3d6   :  { %571 = vrot.lane.b32.xlu0 %v570_v22, %s5563_s2  ;;  %v4441_v34 = vmul.f32 -1.442695, %v561_v31 }
 0x3d8   :  { %5322 = vpow2.f32 %v4441_v34 }
 0x3da   :  { %v5321_v25 = vpop.eup %5320  ;;  %735 = vperm.xlu0 %5301, %v732_v23  }
 0x3db   :  { %v711_v28 = vmul.f32 %v5321_v25, %v709_v26 }
 0x3dd   :  { %713 = vrot.lane.b32.xlu1 %v711_v28, %s5563_s2 }
 0x3e1   :  { %728 = vperm.xlu1 %5300, %v4430_v21  }
 0x3e2   :  { %v5323_v36 = vpop.eup %5322 }
 0x3e3   :  { %v565_v37 = vadd.f32 1.0, %v5323_v36 }
 0x3e5   :  { %5324 = vrcp.f32 %v565_v37 }
 0x3ef   :  { %v5325_v38 = vpop.eup %5324 }
 0x3f0   :  { %v581_v17 = vsub.f32 1.0, %v5325_v38  ;;  %v589_v22 = vmul.f32 %v5325_v38, %v587_v19 }
 0x448   :  { %v572_v39 = vpop.permute.xlu0 %571 }
 0x449   :  { %v574_v40 = vmul.f32 %v5325_v38, %v572_v39  ;;  %v940_v39 = vld [vmem:[#allocation2 + $0x20] sm:$0xf0] }
 0x44b   :  { %576 = vrot.lane.b32.xlu0 %v574_v40, %s5563_s2 }
 0x44f   :  { %v714_v42 = vpop.permute.xlu1 %713 }
 0x450   :  { %v716_v44 = vadd.f32 %v714_v42, %v687_v41 }
 0x452   :  { %5326 = vtanh.f32 %v716_v44 }
 0x453   :  { %5328 = vpow2.f32 %v4444_v51  ;;  %v4429_v51 = vsel %vm65_vm8, 1.0, %v5562_v4 }
 0x459   :  { %v5840_v52 = vpop.permute.xlu0 %735 }
 0x45a   :  { %v738_v12 = vmul.f32 %v5840_v52, %v5797_v55 }
 0x45c   :  { %v5327_v46 = vpop.eup %5326 }
 0x45d   :  { %720 = vrot.lane.b32.xlu1 %v5327_v46, %s5565_s5  ;;  %v5329_v54 = vpop.eup %5328 }
 0x45e   :  { %v703_v58 = vadd.f32 1.0, %v5329_v54 }
 0x460   :  { %v5842_v1 = vpop.permute.xlu1 %728 }
 0x461   :  { %605 = vperm.xlu1 %5300, %v602_v48  }
 0x465   :  { %593 = vperm.xlu1 %5300, %v4425_v45  }
 0x4bd   :  { %v577_v59 = vpop.permute.xlu0 %576 }
 0x4be   :  { %v579_v60 = vadd.f32 %v577_v59, %v557_v30 }
 0x4c0   :  { %5330 = vtanh.f32 %v579_v60  ;;  %v993_v60 = vsub.f32 1.0, %v4429_v51 }
 0x4c1   :  { %5332 = vrcp.f32 %v703_v58 }
 0x4ca   :  { %v5331_v61 = vpop.eup %5330 }
 0x4cb   :  { %v5333_v63 = vpop.eup %5332  ;;  %583 = vrot.lane.b32.xlu0 %v5331_v61, %s5565_s5  ;;  %v941_v61 = vld [vmem:[#allocation2 + $0x28] sm:$0xf0] }
 0x4cc   :  { %v718_v5 = vsub.f32 1.0, %v5333_v63  ;;  %v724_v7 = vmul.f32 %v5333_v63, %v5797_v55 }
 0x4cf   :  { %v721_v6 = vpop.permute.xlu1 %720 }
 0x4d0   :  { %v723_v8 = vmul.f32 %v721_v6, %v718_v5  ;;  %v4426_v6 = vsel %vm56_vm9, 1.0, %v5562_v4 }
 0x4d2   :  { %v725_v10 = vadd.f32 %v724_v7, %v723_v8  ;;  %v856_v8 = vsub.f32 1.0, %v4426_v6 }
 0x4d4   :  { %v731_v13 = vmul.f32 %v5842_v1, %v725_v10  ;;  %v819_v10 = vld [vmem:[#allocation2 + $0x10] sm:$0xf] }
 0x4d6   :  { %v5849_v14 = vadd.f32 %v738_v12, %v731_v13 }
 0x4d8   :  { %4755 = vmatmul.mubr.msk.f32.vlgmr.msra.gmra.mrb[6].mxu1 %vm98_vm1, %v5849_v14 }
 0x4d9   :  { %5117 = vmatpush3.bf16.msra.mxu1 %v5703_v24  ;;  %4776 = vmatprep.mubr.msk.f32.mxu1 %vm5561_vm0, %v5562_v4 }
 0x4da   :  { %5118 = vmatprep.subr.bf16.mxu1 %v5560_v0 }
 0x4dd   :  { %5120 = vmatpush3.bf16.msra.mxu1 %v5716_v27 }
 0x4de   :  { %5127 = vmatprep.subr.bf16.mxu1 %v5560_v0 }
 0x4e0   :  { %v5859_v15 = vpop.permute.xlu1 %605 }
 0x4e1   :  { %v608_v16 = vmul.f32 %v5859_v15, %v5816_v3 }
 0x4e3   :  { %610 = vrot.lane.b32.xlu1 %v608_v16, %s5565_s5 }
 0x4e4   :  { %v5869_v34 = vpop.permute.xlu1 %593 }
 0x53d   :  { %v584_v20 = vpop.permute.xlu0 %583 }
 0x53e   :  { %v586_v21 = vmul.f32 %v584_v20, %v581_v17 }
 0x540   :  { %v590_v23 = vadd.f32 %v589_v22, %v586_v21 }
 0x542   :  { %v597_v25 = vrot.slane %v590_v23, 4 }
 0x544   :  { %598 = vrot.lane.b32.xlu0 %v597_v25, %s5565_s5 }
 0x555   :  { %v611_v37 = vpop.permute.xlu1 %610 }
 0x5ab   :  { %v936_v26 = vpop.f32.mrb[6].mxu1 }
 0x5ac   :  { %v943_v28 = vrot.slane %v936_v26, 4  ;;  %v961_v29 = vadd.f32 %v936_v26, %v5763_v47  ;;  %v4756_v30 = vpop.f32.mrb[7].mxu1 }
 0x5ae   :  { %v963_v31 = vrot.slane %v961_v29, 4  ;;  %944 = vrot.lane.b32.xlu0 %v943_v28, %s5565_s5 }
 0x5b0   :  { %964 = vrot.lane.b32.xlu1 %v963_v31, %s5564_s26  ;;  %v980_v31 = vrot.slane %v5849_v14, 4 }
 0x5b6   :  { %v599_v3 = vpop.permute.xlu0 %598 }
 0x5b7   :  { %v601_v36 = vmul.f32 %v599_v3, %v5869_v34 }
 0x5b9   :  { %v5872_v38 = vadd.f32 %v611_v37, %v601_v36 }
 0x5bb   :  { %740 = vst.msk [vmem:[#allocation4 + $0x4] sm:$0xf] %vm477_vm5, %v5872_v38  ;;  %4744 = vmatmul.mubr.msk.f32.vlgmr.msra.gmra.mrb[10].mxu0 %vm98_vm1, %v5872_v38 }
 0x5bc   :  { %5111 = vmatpush3.bf16.msra.mxu0 %v5664_v9  ;;  %4765 = vmatprep.mubr.msk.f32.mxu0 %vm5561_vm0, %v5562_v4 }
 0x5bd   :  { %5112 = vmatprep.subr.bf16.mxu0 %v5560_v0 }
 0x5c0   :  { %5114 = vmatpush3.bf16.msra.mxu0 %v5685_v18 }
 0x5c1   :  { %5121 = vmatprep.subr.bf16.mxu0 %v5560_v0 }
 0x620   :  { %v945_v40 = vpop.permute.xlu0 %944 }
 0x621   :  { %v947_v41 = vadd.f32 %v945_v40, %v940_v39  ;;  %v954_v22 = vadd.f32 %v945_v40, %v941_v61 }
 0x622   :  { %v965_v48 = vpop.permute.xlu1 %964 }
 0x623   :  { %v4448_v42 = vmul.f32 -1.442695, %v947_v41  ;;  %v4449_v23 = vmul.f32 -1.442695, %v954_v22 }
 0x625   :  { %5334 = vpow2.f32 %v4448_v42 }
 0x62f   :  { %v5335_v44 = vpop.eup %5334 }
 0x630   :  { %v951_v45 = vadd.f32 1.0, %v5335_v44 }
 0x632   :  { %5336 = vrcp.f32 %v951_v45 }
 0x63c   :  { %v5337_v46 = vpop.eup %5336 }
 0x63d   :  { %v967_v49 = vmul.f32 %v5337_v46, %v965_v48 }
 0x63f   :  { %969 = vrot.lane.b32.xlu0 %v967_v49, %s5563_s2 }
 0x643   :  { %986 = vperm.xlu0 %5301, %v4429_v51  }
 0x68e   :  { %v815_v54 = vpop.f32.mrb[10].mxu0 }
 0x68f   :  { %v827_v58 = vadd.f32 %v815_v54, %v5767_v56  ;;  %v4745_v59 = vpop.f32.mrb[11].mxu0  ;;  %v820_v12 = vadd.f32 %v819_v10, %v815_v54 }
 0x691   :  { %829 = vrot.lane.b32.xlu1 %v827_v58, %s5563_s2  ;;  %v4446_v13 = vmul.f32 -1.442695, %v820_v12 }
 0x695   :  { %996 = vperm.xlu1 %5300, %v993_v60  }
 0x6b1   :  { %v970_v63 = vpop.permute.xlu0 %969 }
 0x6b2   :  { %v972_v5 = vadd.f32 %v970_v63, %v941_v61 }
 0x6b4   :  { %5338 = vtanh.f32 %v972_v5 }
 0x6b5   :  { %5340 = vpow2.f32 %v4446_v13 }
 0x6be   :  { %v5339_v7 = vpop.eup %5338 }
 0x6bf   :  { %976 = vrot.lane.b32.xlu0 %v5339_v7, %s5565_s5  ;;  %v5341_v16 = vpop.eup %5340 }
 0x6c0   :  { %v824_v17 = vadd.f32 1.0, %v5341_v16  ;;  %v4428_v16 = vsel %vm62_vm10, 1.0, %v5562_v4 }
 0x6c2   :  { %5342 = vrcp.f32 %v824_v17  ;;  %v5895_v29 = vpop.permute.xlu0 %986 }
 0x6c3   :  { %859 = vperm.xlu0 %5301, %v856_v8   ;;  %5344 = vpow2.f32 %v4449_v23 }
 0x6cc   :  { %v5343_v19 = vpop.eup %5342 }
 0x6cd   :  { %v5345_v25 = vpop.eup %5344  ;;  %v839_v60 = vsub.f32 1.0, %v5343_v19 }
 0x6ce   :  { %v958_v26 = vadd.f32 1.0, %v5345_v25 }
 0x6d0   :  { %5346 = vrcp.f32 %v958_v26 }
 0x6da   :  { %v5347_v28 = vpop.eup %5346 }
 0x6db   :  { %v974_v30 = vsub.f32 1.0, %v5347_v28  ;;  %v982_v36 = vmul.f32 %v5347_v28, %v980_v31  ;;  %v1258_v31 = vsub.f32 1.0, %v4428_v16 }
 0x703   :  { %v830_v20 = vpop.permute.xlu1 %829 }
 0x704   :  { %v832_v21 = vmul.f32 %v5343_v19, %v830_v20 }
 0x706   :  { %834 = vrot.lane.b32.xlu1 %v832_v21, %s5563_s2 }
 0x70a   :  { %852 = vperm.xlu1 %5300, %v4426_v6  }
 0x70e   :  { %845 = vrot.lane.b32.xlu1 %v5872_v38, %s5564_s26 }
 0x714   :  { %v5898_v40 = vpop.permute.xlu1 %996 }
 0x715   :  { %v999_v42 = vmul.f32 %v5898_v40, %v5849_v14 }
 0x731   :  { %v977_v3 = vpop.permute.xlu0 %976 }
 0x732   :  { %v979_v37 = vmul.f32 %v977_v3, %v974_v30  ;;  %v1213_v3 = vld [vmem:[#allocation2 + $0x28] sm:$0xf] }
 0x734   :  { %v983_v39 = vadd.f32 %v982_v36, %v979_v37 }
 0x736   :  { %v990_v41 = vrot.slane %v983_v39, 4 }
 0x738   :  { %v992_v44 = vmul.f32 %v990_v41, %v5895_v29 }
 0x73a   :  { %v5903_v45 = vadd.f32 %v999_v42, %v992_v44 }
 0x73c   :  { %4777 = vmatmul.mubr.msk.f32.vlgmr.msra.gmra.mrb[8].mxu1 %vm98_vm1, %v5903_v45 }
 0x73d   :  { %5129 = vmatpush3.bf16.msra.mxu1 %v5703_v24  ;;  %4798 = vmatprep.mubr.msk.f32.mxu1 %vm5561_vm0, %v5562_v4 }
 0x73e   :  { %5130 = vmatprep.subr.bf16.mxu1 %v5560_v0 }
 0x741   :  { %5132 = vmatpush3.bf16.msra.mxu1 %v5716_v27 }
 0x742   :  { %5139 = vmatprep.subr.bf16.mxu1 %v5560_v0  ;;  %v5913_v51 = vpop.permute.xlu0 %859 }
 0x743   :  { %v862_v54 = vmul.f32 %v5913_v51, %v5872_v38 }
 0x778   :  { %v835_v46 = vpop.permute.xlu1 %834 }
 0x779   :  { %v837_v48 = vadd.f32 %v835_v46, %v819_v10  ;;  %v4427_v46 = vsel %vm59_vm11, 1.0, %v5562_v4 }
 0x77b   :  { %5348 = vtanh.f32 %v837_v48 }
 0x785   :  { %v5349_v49 = vpop.eup %5348 }
 0x786   :  { %841 = vrot.lane.b32.xlu0 %v5349_v49, %s5565_s5  ;;  %v1128_v49 = vsub.f32 1.0, %v4427_v46 }
 0x789   :  { %v5919_v58 = vpop.permute.xlu1 %852 }
 0x78a   :  { %864 = vrot.lane.b32.xlu0 %v862_v54, %s5564_s26 }
 0x78d   :  { %v846_v59 = vpop.permute.xlu1 %845 }
 0x78e   :  { %v848_v63 = vmul.f32 %v5343_v19, %v846_v59  ;;  %v1212_v19 = vld [vmem:[#allocation2 + $0x20] sm:$0xf] }
 0x7f8   :  { %v842_v61 = vpop.permute.xlu0 %841 }
 0x7f9   :  { %v844_v5 = vmul.f32 %v842_v61, %v839_v60 }
 0x7fb   :  { %v849_v6 = vadd.f32 %v848_v63, %v844_v5 }
 0x7fc   :  { %v865_v8 = vpop.permute.xlu0 %864 }
 0x7fd   :  { %v855_v7 = vmul.f32 %v5919_v58, %v849_v6 }
 0x7ff   :  { %v5922_v10 = vadd.f32 %v865_v8, %v855_v7 }
 0x801   :  { %1002 = vrot.lane.b32.xlu1 %v5922_v10, %s5565_s5 }
 0x80f   :  { %v1208_v12 = vpop.f32.mrb[8].mxu1 }
 0x810   :  { %v1232_v38 = vadd.f32 %v1208_v12, %v5763_v47  ;;  %v4778_v13 = vpop.f32.mrb[9].mxu1  ;;  %1215 = vrot.lane.b32.xlu0 %v1208_v12, %s5565_s5 }
 0x812   :  { %1234 = vrot.lane.b32.xlu1 %v1232_v38, %s5564_s26 }
 0x816   :  { %1254 = vperm.xlu1 %5300, %v4428_v16  }
 0x873   :  { %v1003_v17 = vpop.permute.xlu1 %1002 }
 0x874   :  { %1005 = vst.msk [vmem:[#allocation4 + $0x8] sm:$0xf] %vm477_vm5, %v1003_v17  ;;  %4766 = vmatmul.mubr.msk.f32.vlgmr.msra.gmra.mrb[12].mxu0 %vm98_vm1, %v1003_v17 }
 0x875   :  { %5123 = vmatpush3.bf16.msra.mxu0 %v5664_v9  ;;  %4787 = vmatprep.mubr.msk.f32.mxu0 %vm5561_vm0, %v5562_v4 }
 0x876   :  { %5124 = vmatprep.subr.bf16.mxu0 %v5560_v0 }
 0x879   :  { %5126 = vmatpush3.bf16.msra.mxu0 %v5685_v18 }
 0x87a   :  { %5133 = vmatprep.subr.bf16.mxu0 %v5560_v0 }
 0x882   :  { %v1216_v20 = vpop.permute.xlu0 %1215 }
 0x883   :  { %v1218_v21 = vadd.f32 %v1216_v20, %v1212_v19  ;;  %v1225_v54 = vadd.f32 %v1216_v20, %v1213_v3  ;;  %v1083_v19 = vld [vmem:[#allocation2 + $0x10] sm:$0xf0] }
 0x884   :  { %v1235_v28 = vpop.permute.xlu1 %1234 }
 0x885   :  { %v4453_v22 = vmul.f32 -1.442695, %v1218_v21  ;;  %v4454_v59 = vmul.f32 -1.442695, %v1225_v54 }
 0x887   :  { %5350 = vpow2.f32 %v4453_v22 }
 0x891   :  { %v5351_v23 = vpop.eup %5350 }
 0x892   :  { %v1222_v25 = vadd.f32 1.0, %v5351_v23 }
 0x894   :  { %5352 = vrcp.f32 %v1222_v25 }
 0x895   :  { %v5945_v11 = vpop.permute.xlu1 %1254 }
 0x89e   :  { %v5353_v26 = vpop.eup %5352 }
 0x89f   :  { %v1237_v30 = vmul.f32 %v5353_v26, %v1235_v28 }
 0x8a1   :  { %1239 = vrot.lane.b32.xlu0 %v1237_v30, %s5563_s2 }
 0x8a5   :  { %1261 = vperm.xlu0 %5301, %v1258_v31  }
 0x913   :  { %v1240_v36 = vpop.permute.xlu0 %1239 }
 0x914   :  { %v1242_v37 = vadd.f32 %v1240_v36, %v1213_v3 }
 0x916   :  { %5354 = vtanh.f32 %v1242_v37 }
 0x917   :  { %5356 = vpow2.f32 %v4454_v59 }
 0x920   :  { %v5355_v39 = vpop.eup %5354 }
 0x921   :  { %1246 = vrot.lane.b32.xlu1 %v5355_v39, %s5565_s5  ;;  %v5357_v60 = vpop.eup %5356 }
 0x922   :  { %v1229_v61 = vadd.f32 1.0, %v5357_v60 }
 0x924   :  { %5358 = vrcp.f32 %v1229_v61  ;;  %v5948_v12 = vpop.permute.xlu0 %1261 }
 0x925   :  { %v1264_v16 = vmul.f32 %v5948_v12, %v5903_v45 }
 0x92e   :  { %v5359_v63 = vpop.eup %5358 }
 0x92f   :  { %v1244_v5 = vsub.f32 1.0, %v5359_v63  ;;  %v1250_v7 = vmul.f32 %v5359_v63, %v5903_v45 }
 0x947   :  { %v1079_v41 = vpop.f32.mrb[12].mxu0 }
 0x948   :  { %v1094_v42 = vadd.f32 %v1079_v41, %v5767_v56  ;;  %v4767_v44 = vpop.f32.mrb[13].mxu0  ;;  %v1085_v13 = vrot.slane %v1079_v41, 4 }
 0x94a   :  { %v1096_v48 = vrot.slane %v1094_v42, 4  ;;  %v1087_v21 = vadd.f32 %v1085_v13, %v1083_v19 }
 0x94c   :  { %1097 = vrot.lane.b32.xlu0 %v1096_v48, %s5563_s2  ;;  %v4451_v22 = vmul.f32 -1.442695, %v1087_v21  ;;  %v1113_v48 = vrot.slane %v5922_v10, 4 }
 0x94e   :  { %5360 = vpow2.f32 %v4451_v22 }
 0x950   :  { %1131 = vperm.xlu0 %5301, %v1128_v49  }
 0x954   :  { %1119 = vperm.xlu0 %5301, %v4427_v46  }
 0x958   :  { %v5361_v23 = vpop.eup %5360 }
 0x959   :  { %v1091_v25 = vadd.f32 1.0, %v5361_v23 }
 0x95b   :  { %5362 = vrcp.f32 %v1091_v25 }
 0x965   :  { %v5363_v26 = vpop.eup %5362 }
 0x966   :  { %v1107_v49 = vsub.f32 1.0, %v5363_v26  ;;  %v1115_v59 = vmul.f32 %v5363_v26, %v1113_v48 }
 0x993   :  { %v1247_v6 = vpop.permute.xlu1 %1246 }
 0x994   :  { %v1249_v8 = vmul.f32 %v1247_v6, %v1244_v5 }
 0x996   :  { %v1251_v38 = vadd.f32 %v1250_v7, %v1249_v8 }
 0x998   :  { %v1257_v17 = vmul.f32 %v5945_v11, %v1251_v38 }
 0x99a   :  { %v5953_v20 = vadd.f32 %v1264_v16, %v1257_v17 }
 0x99c   :  { %4799 = vmatmul.mubr.msk.f32.vlgmr.msra.gmra.mrb[10].mxu1 %vm98_vm1, %v5953_v20 }
 0x99d   :  { %5141 = vmatpush3.bf16.msra.mxu1 %v5703_v24  ;;  %4820 = vmatprep.mubr.msk.f32.mxu1 %vm5561_vm0, %v5562_v4 }
 0x99e   :  { %5142 = vmatprep.subr.bf16.mxu1 %v5560_v0 }
 0x9a1   :  { %5144 = vmatpush3.bf16.msra.mxu1 %v5716_v27 }
 0x9a2   :  { %5151 = vmatprep.subr.bf16.mxu1 %v5560_v0 }
 0x9be   :  { %v1098_v28 = vpop.permute.xlu0 %1097 }
 0x9bf   :  { %v1100_v30 = vmul.f32 %v5363_v26, %v1098_v28  ;;  %v1456_v28 = vld [vmem:[#allocation2 + $0x18] sm:$0xf0] }
 0x9c1   :  { %1102 = vrot.lane.b32.xlu1 %v1100_v30, %s5563_s2 }
 0x9cf   :  { %v5964_v31 = vpop.permute.xlu0 %1131 }
 0x9d0   :  { %v1134_v3 = vmul.f32 %v5964_v31, %v5922_v10  ;;  %v1455_v10 = vld [vmem:[#allocation2 + $0x10] sm:$0xf0] }
 0x9d2   :  { %1136 = vrot.lane.b32.xlu0 %v1134_v3, %s5565_s5 }
 0x9d3   :  { %v5975_v6 = vpop.permute.xlu0 %1119 }
 0xa33   :  { %v1103_v36 = vpop.permute.xlu1 %1102 }
 0xa34   :  { %v1105_v37 = vadd.f32 %v1103_v36, %v1083_v19 }
 0xa36   :  { %5364 = vtanh.f32 %v1105_v37 }
 0xa40   :  { %v5365_v39 = vpop.eup %5364 }
 0xa41   :  { %1109 = vrot.lane.b32.xlu1 %v5365_v39, %s5565_s5 }
 0xa44   :  { %v1137_v38 = vpop.permute.xlu0 %1136 }
 0xa6f   :  { %v1451_v41 = vpop.f32.mrb[10].mxu1 }
 0xa70   :  { %v1476_v42 = vadd.f32 %v1451_v41, %v5763_v47  ;;  %v4800_v44 = vpop.f32.mrb[11].mxu1  ;;  %v1458_v5 = vrot.slane %v1451_v41, 4 }
 0xa72   :  { %v1478_v46 = vrot.slane %v1476_v42, 4 }
 0xa74   :  { %1479 = vrot.lane.b32.xlu0 %v1478_v46, %s5564_s26 }
 0xab3   :  { %v1110_v54 = vpop.permute.xlu1 %1109 }
 0xab4   :  { %v1112_v60 = vmul.f32 %v1110_v54, %v1107_v49 }
 0xab6   :  { %v1116_v61 = vadd.f32 %v1115_v59, %v1112_v60  ;;  %v1495_v59 = vrot.slane %v5953_v20, 4 }
 0xab8   :  { %v1123_v63 = vrot.slane %v1116_v61, 4 }
 0xaba   :  { %1124 = vrot.lane.b32.xlu1 %v1123_v63, %s5565_s5 }
 0xabe   :  { %1459 = vrot.lane.b32.xlu1 %v1458_v5, %s5565_s5 }
 0xae6   :  { %v1480_v25 = vpop.permute.xlu0 %1479 }
 0xb2c   :  { %v1125_v7 = vpop.permute.xlu1 %1124 }
 0xb2d   :  { %v1127_v8 = vmul.f32 %v1125_v7, %v5975_v6 }
 0xb2f   :  { %v5978_v13 = vadd.f32 %v1137_v38, %v1127_v8  ;;  %v1503_v8 = vmul.f32 %v5953_v20, %v5964_v31 }
 0xb30   :  { %v1460_v16 = vpop.permute.xlu1 %1459 }
 0xb31   :  { %1266 = vst.msk [vmem:[#allocation4 + $0xc] sm:$0xf] %vm477_vm5, %v5978_v13  ;;  %v1462_v17 = vadd.f32 %v1460_v16, %v1455_v10  ;;  %4788 = vmatmul.mubr.msk.f32.vlgmr.msra.gmra.mrb[14].mxu0 %vm98_vm1, %v5978_v13  ;;  %v1469_v42 = vadd.f32 %v1460_v16, %v1456_v28  ;;  %v1345_v16 = vld [vmem:[#allocation2 + $0x20] sm:$0xf] }
 0xb32   :  { %5135 = vmatpush3.bf16.msra.mxu0 %v5664_v9  ;;  %4809 = vmatprep.mubr.msk.f32.mxu0 %vm5561_vm0, %v5562_v4 }
 0xb33   :  { %v4458_v19 = vmul.f32 -1.442695, %v1462_v17  ;;  %5136 = vmatprep.subr.bf16.mxu0 %v5560_v0  ;;  %v4459_v44 = vmul.f32 -1.442695, %v1469_v42 }
 0xb35   :  { %5366 = vpow2.f32 %v4458_v19 }
 0xb36   :  { %5138 = vmatpush3.bf16.msra.mxu0 %v5685_v18 }
 0xb37   :  { %5145 = vmatprep.subr.bf16.mxu0 %v5560_v0 }
 0xb3f   :  { %v5367_v21 = vpop.eup %5366 }
 0xb40   :  { %v1466_v22 = vadd.f32 1.0, %v5367_v21 }
 0xb42   :  { %5368 = vrcp.f32 %v1466_v22 }
 0xb4c   :  { %v5369_v23 = vpop.eup %5368 }
 0xb4d   :  { %v1482_v26 = vmul.f32 %v5369_v23, %v1480_v25 }
 0xb4f   :  { %1484 = vrot.lane.b32.xlu1 %v1482_v26, %s5563_s2 }
 0xbc1   :  { %v1485_v30 = vpop.permute.xlu1 %1484 }
 0xbc2   :  { %v1487_v3 = vadd.f32 %v1485_v30, %v1456_v28 }
 0xbc4   :  { %5370 = vtanh.f32 %v1487_v3 }
 0xbc5   :  { %5372 = vpow2.f32 %v4459_v44 }
 0xbce   :  { %v5371_v36 = vpop.eup %5370 }
 0xbcf   :  { %1491 = vrot.lane.b32.xlu0 %v5371_v36, %s5565_s5  ;;  %v5373_v46 = vpop.eup %5372  ;;  %v1377_v36 = vmul.f32 %v5948_v12, %v5978_v13 }
 0xbd0   :  { %v1473_v48 = vadd.f32 1.0, %v5373_v46 }
 0xbd2   :  { %5374 = vrcp.f32 %v1473_v48 }
 0xbdc   :  { %v5375_v49 = vpop.eup %5374 }
 0xbdd   :  { %v1489_v54 = vsub.f32 1.0, %v5375_v49  ;;  %v1497_v61 = vmul.f32 %v5375_v49, %v1495_v59 }
 0xc04   :  { %v1341_v37 = vpop.f32.mrb[14].mxu0 }
 0xc05   :  { %v1353_v39 = vadd.f32 %v1341_v37, %v5767_v56  ;;  %v4789_v41 = vpop.f32.mrb[15].mxu0  ;;  %v1346_v17 = vadd.f32 %v1345_v16, %v1341_v37 }
 0xc07   :  { %1355 = vrot.lane.b32.xlu1 %v1353_v39, %s5563_s2  ;;  %v4456_v19 = vmul.f32 -1.442695, %v1346_v17 }
 0xc09   :  { %5376 = vpow2.f32 %v4456_v19 }
 0xc13   :  { %v5377_v21 = vpop.eup %5376 }
 0xc14   :  { %v1350_v22 = vadd.f32 1.0, %v5377_v21 }
 0xc16   :  { %5378 = vrcp.f32 %v1350_v22  ;;  %v1706_v22 = vld [vmem:[#allocation2 + $0x18] sm:$0xf] }
 0xc20   :  { %v5379_v23 = vpop.eup %5378 }
 0xc21   :  { %v1365_v42 = vsub.f32 1.0, %v5379_v23 }
 0xc41   :  { %v1492_v60 = vpop.permute.xlu0 %1491 }
 0xc42   :  { %v1494_v63 = vmul.f32 %v1492_v60, %v1489_v54 }
 0xc44   :  { %v1498_v5 = vadd.f32 %v1497_v61, %v1494_v63  ;;  %v1705_v63 = vld [vmem:[#allocation2 + $0x10] sm:$0xf] }
 0xc46   :  { %v1500_v7 = vrot.slane %v1498_v5, 4 }
 0xc48   :  { %v1502_v38 = vmul.f32 %v1500_v7, %v5975_v6 }
 0xc4a   :  { %v5998_v10 = vadd.f32 %v1503_v8, %v1502_v38 }
 0xc4c   :  { %4821 = vmatmul.mubr.msk.f32.vlgmr.msra.gmra.mrb[12].mxu1 %vm98_vm1, %v5998_v10 }
 0xc4d   :  { %5153 = vmatpush3.bf16.msra.mxu1 %v5703_v24  ;;  %4842 = vmatprep.mubr.msk.f32.mxu1 %vm5561_vm0, %v5562_v4 }
 0xc4e   :  { %5154 = vmatprep.subr.bf16.mxu1 %v5560_v0 }
 0xc51   :  { %5156 = vmatpush3.bf16.msra.mxu1 %v5716_v27 }
 0xc52   :  { %5163 = vmatprep.subr.bf16.mxu1 %v5560_v0 }
 0xc79   :  { %v1356_v25 = vpop.permute.xlu1 %1355 }
 0xc7a   :  { %v1358_v26 = vmul.f32 %v5379_v23, %v1356_v25 }
 0xc7c   :  { %1360 = vrot.lane.b32.xlu0 %v1358_v26, %s5563_s2 }
 0xc80   :  { %1371 = vrot.lane.b32.xlu0 %v5978_v13, %s5564_s26 }
 0xcee   :  { %v1361_v28 = vpop.permute.xlu0 %1360 }
 0xcef   :  { %v1363_v30 = vadd.f32 %v1361_v28, %v1345_v16 }
 0xcf1   :  { %5380 = vtanh.f32 %v1363_v30 }
 0xcf2   :  { %v1372_v41 = vpop.permute.xlu0 %1371 }
 0xcf3   :  { %v1374_v46 = vmul.f32 %v5379_v23, %v1372_v41 }
 0xcfb   :  { %v5381_v3 = vpop.eup %5380 }
 0xcfc   :  { %1367 = vrot.lane.b32.xlu1 %v5381_v3, %s5565_s5 }
 0xd00   :  { %1379 = vrot.lane.b32.xlu1 %v1377_v36, %s5564_s26 }
 0xd1f   :  { %v1701_v37 = vpop.f32.mrb[12].mxu1 }
 0xd20   :  { %v4822_v39 = vpop.f32.mrb[13].mxu1  ;;  %1708 = vrot.lane.b32.xlu1 %v1701_v37, %s5565_s5  ;;  %v1725_v13 = vadd.f32 %v1701_v37, %v5763_v47 }
 0xd6e   :  { %v1368_v44 = vpop.permute.xlu1 %1367 }
 0xd6f   :  { %v1370_v48 = vmul.f32 %v1368_v44, %v1365_v42 }
 0xd71   :  { %v1375_v49 = vadd.f32 %v1374_v46, %v1370_v48 }
 0xd72   :  { %v1380_v59 = vpop.permute.xlu1 %1379 }
 0xd73   :  { %v1376_v54 = vmul.f32 %v1375_v49, %v5945_v11 }
 0xd75   :  { %v6017_v60 = vadd.f32 %v1380_v59, %v1376_v54 }
 0xd77   :  { %1506 = vrot.lane.b32.xlu0 %v6017_v60, %s5565_s5 }
 0xd7b   :  { %1727 = vrot.lane.b32.xlu0 %v1725_v13, %s5564_s26  ;;  %v1746_v13 = vmul.f32 %v5998_v10, %v5913_v51 }
 0xd92   :  { %v1709_v61 = vpop.permute.xlu1 %1708 }
 0xd93   :  { %v1711_v5 = vadd.f32 %v1709_v61, %v1705_v63  ;;  %v1718_v28 = vadd.f32 %v1709_v61, %v1706_v22 }
 0xd95   :  { %v4463_v7 = vmul.f32 -1.442695, %v1711_v5  ;;  %v4464_v37 = vmul.f32 -1.442695, %v1718_v28 }
 0xd97   :  { %5382 = vpow2.f32 %v4463_v7  ;;  %v1587_v7 = vld [vmem:[#allocation2 + $0x20] sm:$0xf0] }
 0xda1   :  { %v5383_v8 = vpop.eup %5382 }
 0xda2   :  { %v1715_v38 = vadd.f32 1.0, %v5383_v8 }
 0xda4   :  { %5384 = vrcp.f32 %v1715_v38 }
 0xdae   :  { %v5385_v17 = vpop.eup %5384 }
 0xde9   :  { %v6023_v16 = vpop.permute.xlu0 %1506 }
 0xdea   :  { %4810 = vmatmul.mubr.msk.f32.vlgmr.msra.gmra.mrb[16].mxu0 %vm98_vm1, %v6023_v16 }
 0xdeb   :  { %5147 = vmatpush3.bf16.msra.mxu0 %v5664_v9  ;;  %4831 = vmatprep.mubr.msk.f32.mxu0 %vm5561_vm0, %v5562_v4 }
 0xdec   :  { %5148 = vmatprep.subr.bf16.mxu0 %v5560_v0 }
 0xded   :  { %v1728_v19 = vpop.permute.xlu0 %1727 }
 0xdee   :  { %v1730_v21 = vmul.f32 %v5385_v17, %v1728_v19 }
 0xdef   :  { %5150 = vmatpush3.bf16.msra.mxu0 %v5685_v18 }
 0xdf0   :  { %1732 = vrot.lane.b32.xlu1 %v1730_v21, %s5563_s2  ;;  %5157 = vmatprep.subr.bf16.mxu0 %v5560_v0 }
 0xe62   :  { %v1733_v23 = vpop.permute.xlu1 %1732 }
 0xe63   :  { %v1735_v25 = vadd.f32 %v1733_v23, %v1706_v22 }
 0xe65   :  { %5386 = vtanh.f32 %v1735_v25 }
 0xe66   :  { %5388 = vpow2.f32 %v4464_v37 }
 0xe6f   :  { %v5387_v26 = vpop.eup %5386 }
 0xe70   :  { %1739 = vrot.lane.b32.xlu0 %v5387_v26, %s5565_s5  ;;  %v5389_v41 = vpop.eup %5388 }
 0xe71   :  { %v1722_v42 = vadd.f32 1.0, %v5389_v41 }
 0xe73   :  { %5390 = vrcp.f32 %v1722_v42 }
 0xe7d   :  { %v5391_v44 = vpop.eup %5390 }
 0xe7e   :  { %v1737_v46 = vsub.f32 1.0, %v5391_v44  ;;  %v1743_v49 = vmul.f32 %v5391_v44, %v5998_v10 }
 0xebd   :  { %v1583_v30 = vpop.f32.mrb[16].mxu0 }
 0xebe   :  { %v1598_v3 = vadd.f32 %v1583_v30, %v5767_v56  ;;  %v4811_v36 = vpop.f32.mrb[17].mxu0  ;;  %v1589_v5 = vrot.slane %v1583_v30, 4 }
 0xebf   :  { %v1617_v36 = vrot.slane %v6017_v60, 4 }
 0xec0   :  { %v1600_v39 = vrot.slane %v1598_v3, 4  ;;  %v1591_v8 = vadd.f32 %v1589_v5, %v1587_v7  ;;  %v1627_v3 = vmul.f32 %v6017_v60, %v5898_v40 }
 0xec2   :  { %1601 = vrot.lane.b32.xlu1 %v1600_v39, %s5563_s2  ;;  %v4461_v38 = vmul.f32 -1.442695, %v1591_v8 }
 0xec4   :  { %5392 = vpow2.f32 %v4461_v38 }
 0xece   :  { %v5393_v17 = vpop.eup %5392 }
 0xecf   :  { %v1595_v19 = vadd.f32 1.0, %v5393_v17 }
 0xed1   :  { %5394 = vrcp.f32 %v1595_v19 }
 0xedb   :  { %v5395_v21 = vpop.eup %5394 }
 0xedc   :  { %v1611_v37 = vsub.f32 1.0, %v5395_v21  ;;  %v1619_v42 = vmul.f32 %v5395_v21, %v1617_v36 }
 0xee2   :  { %v1740_v48 = vpop.permute.xlu0 %1739 }
 0xee3   :  { %v1742_v54 = vmul.f32 %v1740_v48, %v1737_v46 }
 0xee5   :  { %v1744_v59 = vadd.f32 %v1743_v49, %v1742_v54 }
 0xee7   :  { %v1745_v61 = vmul.f32 %v1744_v59, %v5919_v58  ;;  %v1937_v59 = vld [vmem:[#allocation2] sm:$0xf0] }
 0xee9   :  { %v6041_v63 = vadd.f32 %v1746_v13, %v1745_v61 }
 0xeeb   :  { %4843 = vmatmul.mubr.msk.f32.vlgmr.msra.gmra.mrb[14].mxu1 %vm98_vm1, %v6041_v63 }
 0xeec   :  { %5165 = vmatpush3.bf16.msra.mxu1 %v5703_v24  ;;  %4864 = vmatprep.mubr.msk.f32.mxu1 %vm5561_vm0, %v5562_v4 }
 0xeed   :  { %5166 = vmatprep.subr.bf16.mxu1 %v5560_v0 }
 0xef0   :  { %5168 = vmatpush3.bf16.msra.mxu1 %v5716_v27 }
 0xef1   :  { %5185 = vmatprep.subr.bf16.mxu1 %v5560_v0 }
 0xf34   :  { %v1602_v22 = vpop.permute.xlu1 %1601 }
 0xf35   :  { %v1604_v24 = vmul.f32 %v5395_v21, %v1602_v22 }
 0xf37   :  { %1606 = vrot.lane.b32.xlu0 %v1604_v24, %s5563_s2  ;;  %v1938_v24 = vld [vmem:[#allocation2 + $0x8] sm:$0xf0] }
 0xfa9   :  { %v1607_v23 = vpop.permute.xlu0 %1606 }
 0xfaa   :  { %v1609_v25 = vadd.f32 %v1607_v23, %v1587_v7 }
 0xfac   :  { %5396 = vtanh.f32 %v1609_v25 }
 0xfb6   :  { %v5397_v26 = vpop.eup %5396 }
 0xfb7   :  { %1613 = vrot.lane.b32.xlu1 %v5397_v26, %s5565_s5 }
 0xfbe   :  { %v1933_v27 = vpop.f32.mrb[14].mxu1 }
 0xfbf   :  { %v1940_v28 = vrot.slane %v1933_v27, 4  ;;  %v4844_v30 = vpop.f32.mrb[15].mxu1  ;;  %v1958_v46 = vadd.f32 %v1933_v27, %v5763_v47 }
 0xfc1   :  { %1941 = vrot.lane.b32.xlu0 %v1940_v28, %s5565_s5  ;;  %v1960_v49 = vrot.slane %v1958_v46, 4 }
 0xfc5   :  { %1629 = vrot.lane.b32.xlu0 %v1627_v3, %s5565_s5 }
0x1029   :  { %v1614_v39 = vpop.permute.xlu1 %1613 }
0x102a   :  { %v1616_v41 = vmul.f32 %v1614_v39, %v1611_v37 }
0x102c   :  { %v1620_v44 = vadd.f32 %v1619_v42, %v1616_v41  ;;  %v1977_v41 = vrot.slane %v6041_v63, 4 }
0x102e   :  { %v1622_v48 = vrot.slane %v1620_v44, 4 }
0x1030   :  { %1623 = vrot.lane.b32.xlu1 %v1622_v48, %s5565_s5 }
0x1033   :  { %v1942_v54 = vpop.permute.xlu0 %1941 }
0x1034   :  { %1961 = vrot.lane.b32.xlu1 %v1960_v49, %s5564_s26  ;;  %v1944_v13 = vadd.f32 %v1942_v54, %v1937_v59  ;;  %v1951_v27 = vadd.f32 %v1942_v54, %v1938_v24  ;;  %v1985_v54 = vmul.f32 %v6041_v63, %v5859_v15 }
0x1036   :  { %v4468_v61 = vmul.f32 -1.442695, %v1944_v13  ;;  %v4469_v28 = vmul.f32 -1.442695, %v1951_v27 }
0x1037   :  { %v1630_v38 = vpop.permute.xlu0 %1629 }
0x1038   :  { %5398 = vpow2.f32 %v4468_v61  ;;  %v1827_v61 = vld [vmem:[#allocation2 + $0x30] sm:$0xf] }
0x1042   :  { %v5399_v5 = vpop.eup %5398 }
0x1043   :  { %v1948_v60 = vadd.f32 1.0, %v5399_v5 }
0x1045   :  { %5400 = vrcp.f32 %v1948_v60 }
0x104f   :  { %v5401_v19 = vpop.eup %5400 }
0x10a2   :  { %v1624_v7 = vpop.permute.xlu1 %1623 }
0x10a3   :  { %v1626_v8 = vmul.f32 %v1624_v7, %v5895_v29 }
0x10a5   :  { %v6062_v17 = vadd.f32 %v1630_v38, %v1626_v8 }
0x10a6   :  { %v1962_v21 = vpop.permute.xlu1 %1961 }
0x10a7   :  { %v1964_v22 = vmul.f32 %v5401_v19, %v1962_v21  ;;  %4832 = vmatmul.mubr.msk.f32.vlgmr.msra.gmra.mrb[18].mxu0 %vm98_vm1, %v6062_v17 }
0x10a8   :  { %5159 = vmatpush3.bf16.msra.mxu0 %v5664_v9  ;;  %4853 = vmatprep.mubr.msk.f32.mxu0 %vm5561_vm0, %v5562_v4 }
0x10a9   :  { %1966 = vrot.lane.b32.xlu0 %v1964_v22, %s5563_s2  ;;  %5160 = vmatprep.subr.bf16.mxu0 %v5560_v0 }
0x10ac   :  { %5162 = vmatpush3.bf16.msra.mxu0 %v5685_v18 }
0x111b   :  { %v1967_v23 = vpop.permute.xlu0 %1966 }
0x111c   :  { %v1969_v25 = vadd.f32 %v1967_v23, %v1938_v24 }
0x111e   :  { %5402 = vtanh.f32 %v1969_v25  ;;  %v1859_v25 = vmul.f32 %v6062_v17, %v5840_v52 }
0x111f   :  { %5404 = vpow2.f32 %v4469_v28 }
0x1128   :  { %v5403_v26 = vpop.eup %5402 }
0x1129   :  { %1973 = vrot.lane.b32.xlu1 %v5403_v26, %s5565_s5  ;;  %v5405_v36 = vpop.eup %5404 }
0x112a   :  { %v1955_v37 = vadd.f32 1.0, %v5405_v36 }
0x112c   :  { %5406 = vrcp.f32 %v1955_v37 }
0x1136   :  { %v5407_v18 = vpop.eup %5406 }
0x1137   :  { %v1971_v39 = vsub.f32 1.0, %v5407_v18  ;;  %v1979_v44 = vmul.f32 %v5407_v18, %v1977_v41 }
0x117a   :  { %v1823_v30 = vpop.f32.mrb[18].mxu0 }
0x117b   :  { %v1835_v9 = vadd.f32 %v1823_v30, %v5767_v56  ;;  %v4833_v3 = vpop.f32.mrb[19].mxu0  ;;  %v1828_v5 = vadd.f32 %v1827_v61, %v1823_v30 }
0x117d   :  { %1837 = vrot.lane.b32.xlu0 %v1835_v9, %s5563_s2  ;;  %v4466_v60 = vmul.f32 -1.442695, %v1828_v5 }
0x117f   :  { %5408 = vpow2.f32 %v4466_v60  ;;  %v2377_v60 = vld [vmem:[%s6657_s8] sm:$0xff] }
0x1189   :  { %v5409_v7 = vpop.eup %5408 }
0x118a   :  { %v1832_v8 = vadd.f32 1.0, %v5409_v7  ;;  %v2378_v7 = vld [vmem:[%s6657_s8 + $0x8] sm:$0xff] }
0x118c   :  { %5410 = vrcp.f32 %v1832_v8  ;;  %v2379_v8 = vld [vmem:[%s6657_s8 + $0x10] sm:$0xff] }
0x1196   :  { %v5411_v38 = vpop.eup %5410 }
0x1197   :  { %v1847_v9 = vsub.f32 1.0, %v5411_v38 }
0x119b   :  { %v1974_v42 = vpop.permute.xlu1 %1973 }
0x119c   :  { %v1976_v46 = vmul.f32 %v1974_v42, %v1971_v39 }
0x119e   :  { %v1980_v48 = vadd.f32 %v1979_v44, %v1976_v46  ;;  %v2187_v44 = vld [vmem:[#allocation2] sm:$0xf] }
0x11a0   :  { %v1982_v49 = vrot.slane %v1980_v48, 4 }
0x11a2   :  { %v1984_v59 = vmul.f32 %v1982_v49, %v5869_v34 }
0x11a4   :  { %v6079_v13 = vadd.f32 %v1985_v54, %v1984_v59 }
0x11a6   :  { %4865 = vmatmul.mubr.msk.f32.vlgmr.msra.gmra.mrb[16].mxu1 %vm98_vm1, %v6079_v13 }
0x11a7   :  { %4875 = vmatprep.mubr.msk.f32.mxu1 %vm5561_vm0, %v5562_v4 }
0x11ef   :  { %v1838_v19 = vpop.permute.xlu0 %1837 }
0x11f0   :  { %v1840_v21 = vmul.f32 %v5411_v38, %v1838_v19  ;;  %v2380_v19 = vld [vmem:[%s6657_s8 + $0x18] sm:$0xff] }
0x11f2   :  { %1842 = vrot.lane.b32.xlu1 %v1840_v21, %s5563_s2  ;;  %v6118_v21 = vpack.c.bf16 %v2380_v19, %v2379_v8  ;;  %v2248_v8 = vld [vmem:[%s6658_s7 + $0x40] sm:$0xff] }
0x11f6   :  { %1853 = vrot.lane.b32.xlu1 %v6062_v17, %s5564_s26 }
0x1264   :  { %v1843_v22 = vpop.permute.xlu1 %1842 }
0x1265   :  { %v1845_v24 = vadd.f32 %v1843_v22, %v1827_v61 }
0x1267   :  { %5412 = vtanh.f32 %v1845_v24  ;;  %v2188_v24 = vld [vmem:[#allocation2 + $0x8] sm:$0xf] }
0x1268   :  { %v1854_v30 = vpop.permute.xlu1 %1853 }
0x1269   :  { %v1856_v36 = vmul.f32 %v5411_v38, %v1854_v30  ;;  %v6110_v38 = vpack.c.bf16 %v2378_v7, %v2377_v60  ;;  %v2243_v30 = vld [vmem:[%s6658_s7 + $0x18] sm:$0xff] }
0x126a   :  { %v2251_v60 = vld [vmem:[%s6658_s7 + $0x58] sm:$0xff] }
0x126b   :  { %5187 = vmatpush3.bf16.msra.mxu1 %v6110_v38 }
0x126c   :  { %5188 = vmatprep.subr.bf16.mxu1 %v5560_v0 }
0x126f   :  { %5190 = vmatpush3.bf16.msra.mxu1 %v6118_v21 }
0x1270   :  { %5191 = vmatprep.subr.bf16.mxu1 %v5560_v0 }
0x1271   :  { %v5413_v23 = vpop.eup %5412 }
0x1272   :  { %1849 = vrot.lane.b32.xlu0 %v5413_v23, %s5565_s5  ;;  %4876 = vmatmul.mubr.f32.vlgmr.msra.gmra.mrb[18].mxu1 %v5562_v4 }
0x1273   :  { %4886 = vmatprep.mubr.msk.f32.mxu1 %vm5561_vm0, %v5562_v4 }
0x1276   :  { %1861 = vrot.lane.b32.xlu0 %v1859_v25, %s5564_s26 }
0x1279   :  { %v2183_v26 = vpop.f32.mrb[16].mxu1 }
0x127a   :  { %v2207_v27 = vadd.f32 %v2183_v26, %v5763_v47  ;;  %v4866_v28 = vpop.f32.mrb[17].mxu1  ;;  %2190 = vrot.lane.b32.xlu1 %v2183_v26, %s5565_s5 }
0x127b   :  { %v2241_v28 = vld [vmem:[%s6658_s7 + $0x8] sm:$0xff] }
0x127c   :  { %2209 = vrot.lane.b32.xlu0 %v2207_v27, %s5564_s26 }
0x12e4   :  { %v1850_v3 = vpop.permute.xlu0 %1849 }
0x12e5   :  { %v1852_v37 = vmul.f32 %v1850_v3, %v1847_v9  ;;  %v2240_v9 = vld [vmem:[%s6658_s7] sm:$0xff]  ;;  %v5169_v3 = vpack.c.bf16 %v2243_v30, %v2241_v28  ;;  %v2254_v28 = vld [vmem:[%s6658_s7 + $0x70] sm:$0xff] }
0x12e7   :  { %v1857_v18 = vadd.f32 %v1856_v36, %v1852_v37  ;;  %v2242_v36 = vld [vmem:[%s6658_s7 + $0x10] sm:$0xff]  ;;  %v2245_v37 = vld [vmem:[%s6658_s7 + $0x28] sm:$0xff]  ;;  %5170 = vmatprep.subr.bf16.mxu0 %v5169_v3 }
0x12e8   :  { %v1862_v41 = vpop.permute.xlu0 %1861 }
0x12e9   :  { %v1858_v39 = vmul.f32 %v1857_v18, %v5842_v1  ;;  %v2247_v18 = vld [vmem:[%s6658_s7 + $0x38] sm:$0xff] }
0x12eb   :  { %v6096_v42 = vadd.f32 %v1862_v41, %v1858_v39  ;;  %v5171_v39 = vpack.c.bf16 %v2242_v36, %v2240_v9  ;;  %v5173_v41 = vpack.c.bf16 %v2247_v18, %v2245_v37 }
0x12ec   :  { %v2191_v46 = vpop.permute.xlu1 %2190 }
0x12ed   :  { %v2193_v48 = vadd.f32 %v2191_v46, %v2187_v44  ;;  %1988 = vrot.lane.b32.xlu1 %v6096_v42, %s5565_s5  ;;  %v2244_v44 = vld [vmem:[%s6658_s7 + $0x20] sm:$0xff]  ;;  %v2099_v32 = vrot.slane %v6096_v42, 4 }
0x12ee   :  { %v2210_v61 = vpop.permute.xlu0 %2209 }
0x12ef   :  { %v4473_v47 = vmul.f32 -1.442695, %v2193_v48  ;;  %v2246_v48 = vld [vmem:[%s6658_s7 + $0x30] sm:$0xff] }
0x12f1   :  { %5414 = vpow2.f32 %v4473_v47  ;;  %v5175_v47 = vpack.c.bf16 %v2246_v48, %v2244_v44 }
0x12fb   :  { %v5415_v49 = vpop.eup %5414 }
0x12fc   :  { %v2197_v54 = vadd.f32 1.0, %v5415_v49  ;;  %v2200_v49 = vadd.f32 %v2191_v46, %v2188_v24  ;;  %v2250_v46 = vld [vmem:[%s6658_s7 + $0x50] sm:$0xff] }
0x12fe   :  { %5416 = vrcp.f32 %v2197_v54  ;;  %v4474_v54 = vmul.f32 -1.442695, %v2200_v49 }
0x1308   :  { %v5417_v59 = vpop.eup %5416 }
0x1309   :  { %v2212_v5 = vmul.f32 %v5417_v59, %v2210_v61 }
0x130b   :  { %2214 = vrot.lane.b32.xlu0 %v2212_v5, %s5563_s2  ;;  %v2249_v5 = vld [vmem:[%s6658_s7 + $0x48] sm:$0xff] }
0x130c   :  { %v5177_v7 = vpack.c.bf16 %v2251_v60, %v2249_v5  ;;  %v6194_v5 = vld [vmem:[%s6659_s11] ss:$0 sm:$0xff] }
0x130f   :  { %1993 = vrot.lane.b32.xlu0 %v6079_v13, %s5564_s26 }
0x1345   :  { %v6187_v48 = vpop.f32.mrb[18].mxu1 }
0x135f   :  { %v6126_v22 = vpop.permute.xlu1 %1988 }
0x1360   :  { %4854 = vmatmul.mubr.msk.f32.vlgmr.msra.gmra.mrb[20].mxu0 %vm98_vm1, %v6126_v22 }
0x1361   :  { %2344 = vmatprep.mubr.f32.mxu0 %v5562_v4  ;;  %5172 = vmatpush1.bf16.msra.mxu0 %v5171_v39 }
0x1362   :  { %5174 = vmatprep.subr.bf16.mxu0 %v5173_v41  ;;  %v2228_v41 = vmul.f32 %v6079_v13, %v5809_v62 }
0x1365   :  { %5176 = vmatpush1.bf16.msra.mxu0 %v5175_v47  ;;  %v4877_v47 = vpop.f32.mrb[19].mxu1 }
0x1366   :  { %5178 = vmatprep.subr.bf16.mxu0 %v5177_v7  ;;  %v2069_v7 = vld [vmem:[#allocation2 + $0x30] sm:$0xf0]  ;;  %v2384_v47 = vld [vmem:[%s6660_s9 + $0x18] sm:$0xff] }
0x137d   :  { %v2215_v23 = vpop.permute.xlu0 %2214 }
0x137e   :  { %v2217_v25 = vadd.f32 %v2215_v23, %v2188_v24  ;;  %v5179_v24 = vpack.c.bf16 %v2250_v46, %v2248_v8  ;;  %v2253_v23 = vld [vmem:[%s6658_s7 + $0x68] sm:$0xff] }
0x1380   :  { %5418 = vtanh.f32 %v2217_v25  ;;  %v2255_v25 = vld [vmem:[%s6658_s7 + $0x78] sm:$0xff]  ;;  %5180 = vmatpush1.bf16.msra.mxu0 %v5179_v24 }
0x1381   :  { %v1994_v26 = vpop.permute.xlu0 %1993  ;;  %5420 = vpow2.f32 %v4474_v54 }
0x1382   :  { %1996 = vst.msk [vmem:[#allocation4 + $0x4] sm:$0xf] %vm483_vm12, %v1994_v26  ;;  %v2252_v26 = vld [vmem:[%s6658_s7 + $0x60] sm:$0xff] }
0x1383   :  { %v5183_v30 = vpack.c.bf16 %v2254_v28, %v2252_v26 }
0x138a   :  { %v5419_v27 = vpop.eup %5418 }
0x138b   :  { %2221 = vrot.lane.b32.xlu1 %v5419_v27, %s5565_s5  ;;  %v5421_v59 = vpop.eup %5420  ;;  %v5181_v27 = vpack.c.bf16 %v2255_v25, %v2253_v23 }
0x138c   :  { %v2204_v61 = vadd.f32 1.0, %v5421_v59 }
0x138d   :  { %5182 = vmatprep.subr.bf16.mxu0 %v5181_v27 }
0x138e   :  { %5422 = vrcp.f32 %v2204_v61  ;;  %5184 = vmatpush1.bf16.msra.mxu0 %v5183_v30  ;;  %v2109_v30 = vmul.f32 %v6096_v42, %v5790_v50 }
0x138f   :  { %5203 = vmatprep.subr.bf16.mxu0 %v5560_v0 }
0x1398   :  { %v5423_v19 = vpop.eup %5422 }
0x1399   :  { %v2219_v9 = vsub.f32 1.0, %v5423_v19  ;;  %v2225_v36 = vmul.f32 %v5423_v19, %v6079_v13 }
0x13fd   :  { %v2222_v3 = vpop.permute.xlu1 %2221 }
0x13fe   :  { %v2224_v37 = vmul.f32 %v2222_v3, %v2219_v9 }
0x1400   :  { %v2226_v18 = vadd.f32 %v2225_v36, %v2224_v37 }
0x1402   :  { %v2227_v39 = vmul.f32 %v2226_v18, %v5806_v57 }
0x1404   :  { %v2229_v44 = vadd.f32 %v2228_v41, %v2227_v39  ;;  %v2382_v39 = vld [vmem:[%s6660_s9 + $0x8] sm:$0xff]  ;;  %v2383_v41 = vld [vmem:[%s6660_s9 + $0x10] sm:$0xff] }
0x1406   :  { %2232 = vrot.lane.b32.xlu1 %v2229_v44, %s5564_s26 }
0x1433   :  { %v2065_v49 = vpop.f32.mrb[20].mxu0 }
0x1434   :  { %v2080_v54 = vadd.f32 %v2065_v49, %v5767_v56  ;;  %v4855_v59 = vpop.f32.mrb[21].mxu0  ;;  %v2071_v56 = vrot.slane %v2065_v49, 4 }
0x1436   :  { %v2082_v61 = vrot.slane %v2080_v54, 4  ;;  %v2073_v8 = vadd.f32 %v2071_v56, %v2069_v7 }
0x1438   :  { %2083 = vrot.lane.b32.xlu0 %v2082_v61, %s5563_s2  ;;  %v4471_v46 = vmul.f32 -1.442695, %v2073_v8 }
0x143a   :  { %5424 = vpow2.f32 %v4471_v46 }
0x143c   :  { %2469 = vrot.lane.b32.xlu0 %v6194_v5, %s5563_s2 }
0x1444   :  { %v5425_v19 = vpop.eup %5424 }
0x1445   :  { %v2077_v24 = vadd.f32 1.0, %v5425_v19 }
0x1447   :  { %5426 = vrcp.f32 %v2077_v24 }
0x1451   :  { %v6201_v23 = vpop.eup %5426 }
0x1452   :  { %v2101_v19 = vmul.f32 %v6201_v23, %v2099_v32 }
0x1478   :  { %v2233_v13 = vpop.permute.xlu1 %2232 }
0x1479   :  { %2235 = vst.msk [vmem:[#allocation4] sm:$0xf] %vm483_vm12, %v2233_v13 }
0x1480   :  { %v2236_v60 = vld [vmem:[#allocation4] sm:$0xff] }
0x1481   :  { %4475 = vmatmul.mubr.msk.f32.vlgmr.msra.gmra.mrb[22].mxu0 %vm201_vm2, %v2236_v60 }
0x1482   :  { %2350 = vmatprep.mubr.f32.mxu0 %v5562_v4 }
0x14aa   :  { %v2084_v25 = vpop.permute.xlu0 %2083 }
0x14ab   :  { %v2086_v26 = vmul.f32 %v6201_v23, %v2084_v25 }
0x14ad   :  { %2088 = vrot.lane.b32.xlu1 %v2086_v26, %s5563_s2 }
0x14ae   :  { %v6205_v27 = vpop.permute.xlu0 %2469 }
0x14af   :  { %v2472_v28 = vadd.f32 %v6205_v27, %v6187_v48 }
0x14b1   :  { %2474 = vrot.lane.b32.xlu0 %v2472_v28, %s5563_s2 }
0x14b5   :  { %1750 = vrot.lane.b32.xlu0 %v6041_v63, %s5564_s26 }
0x14b9   :  { %1268 = vrot.lane.b32.xlu0 %v5953_v20, %s5564_s26 }
0x14bd   :  { %2111 = vrot.lane.b32.xlu0 %v2109_v30, %s5565_s5 }
0x14c1   :  { %742 = vrot.lane.b32.xlu0 %v5849_v14, %s5564_s26  ;;  %v2381_v14 = vld [vmem:[%s6660_s9] sm:$0xff] }
0x14c2   :  { %v6239_v44 = vpack.c.bf16 %v2382_v39, %v2381_v14 }
0x14c4   :  { %5193 = vmatpush3.bf16.msra.mxu1 %v6239_v44  ;;  %5205 = vmatpush3.bf16.msra.mxu0 %v6239_v44 }
0x14c5   :  { %5194 = vmatprep.subr.bf16.mxu1 %v5560_v0  ;;  %5206 = vmatprep.subr.bf16.mxu0 %v5560_v0 }
0x151f   :  { %v2089_v9 = vpop.permute.xlu1 %2088 }
0x1520   :  { %v2091_v3 = vadd.f32 %v2089_v9, %v2069_v7 }
0x1522   :  { %5428 = vtanh.f32 %v2091_v3 }
0x1523   :  { %v6219_v36 = vpop.permute.xlu0 %2474 }
0x1527   :  { %v1751_v37 = vpop.permute.xlu0 %1750 }
0x1528   :  { %1753 = vst.msk [vmem:[#allocation4 + $0x8] sm:$0xf] %vm483_vm12, %v1751_v37 }
0x152b   :  { %v1269_v63 = vpop.permute.xlu0 %1268 }
0x152c   :  { %v5429_v18 = vpop.eup %5428  ;;  %1271 = vst.msk [vmem:[#allocation4 + $0x10] sm:$0xf] %vm483_vm12, %v1269_v63 }
0x152d   :  { %1509 = vst.msk [vmem:[#allocation4 + $0x10] sm:$0xf] %vm477_vm5, %v6023_v16  ;;  %2095 = vrot.lane.b32.xlu1 %v5429_v18, %s5565_s5 }
0x152f   :  { %v6226_v20 = vpop.permute.xlu0 %2111 }
0x1531   :  { %1511 = vrot.lane.b32.xlu1 %v5998_v10, %s5564_s26  ;;  %v6250_v10 = vpack.c.bf16 %v2384_v47, %v2383_v41 }
0x1533   :  { %v743_v16 = vpop.permute.xlu0 %742  ;;  %5196 = vmatpush3.bf16.msra.mxu1 %v6250_v10  ;;  %5208 = vmatpush3.bf16.msra.mxu0 %v6250_v10 }
0x1534   :  { %745 = vst.msk [vmem:[#allocation4 + $0x18] sm:$0xf] %vm483_vm12, %v743_v16  ;;  %5197 = vmatprep.subr.bf16.mxu1 %v5560_v0  ;;  %5215 = vmatprep.subr.bf16.mxu0 %v5560_v0 }
0x1535   :  { %1991 = vst.msk [vmem:[#allocation4 + $0x18] sm:$0xf] %vm477_vm5, %v6126_v22  ;;  %1007 = vrot.lane.b32.xlu1 %v5903_v45, %s5564_s26  ;;  %v2256_v45 = vld [vmem:[%s6661_s10] sm:$0x3] }
0x1536   :  { %4887 = vmatmul.mubr.f32.vlgmr.msra.gmra.mrb[20].mxu1 %v5562_v4  ;;  %v6271_v22 = vrot.slane %v2256_v45, %v90_v33  ;;  %v6275_v49 = vrot.slane %v2256_v45, %v94_v35  ;;  %v2093_v35 = vsub.f32 1.0, %v6201_v23 }
0x1537   :  { %5199 = vmatpush3.bf16.msra.mxu1 %v6110_v38  ;;  %4897 = vmatprep.mubr.msk.f32.mxu1 %vm5561_vm0, %v5562_v4 }
0x1538   :  { %5200 = vmatprep.subr.bf16.mxu1 %v5560_v0 }
0x153b   :  { %5202 = vmatpush3.bf16.msra.mxu1 %v6118_v21 }
0x153c   :  { %5209 = vmatprep.subr.bf16.mxu1 %v5560_v0 }
0x1554   :  { %v2346_v54 = vpop.f32.mrb[22].mxu0 }
0x1555   :  { %v2347_v59 = vadd.f32 %v2346_v54, %v6271_v22  ;;  %v2348_v61 = vpop.f32.mrb[23].mxu0 }
0x1556   :  { %v2349_v13 = vadd.f32 %v2348_v61, %v6275_v49 }
0x1557   :  { %2369 = vst [vmem:[#allocation3] sm:$0xff] %v2347_v59 }
0x1558   :  { %2370 = vst.msk [vmem:[#allocation3 + $0x8] sm:$0xff] %vm201_vm2, %v2349_v13 }
0x155e   :  { %v2456_v60 = vld [vmem:[#allocation3] sm:$0xf] }
0x155f   :  { %v2457_v56 = vadd.f32 %v2456_v60, %v6187_v48 }
0x1561   :  { %v4479_v7 = vmul.f32 -1.442695, %v2457_v56 }
0x1563   :  { %5430 = vpow2.f32 %v4479_v7 }
0x156d   :  { %v5431_v33 = vpop.eup %5430 }
0x156e   :  { %v2461_v8 = vadd.f32 1.0, %v5431_v33 }
0x1570   :  { %5432 = vrcp.f32 %v2461_v8 }
0x157a   :  { %v5433_v30 = vpop.eup %5432 }
0x157b   :  { %v2477_v23 = vmul.f32 %v5433_v30, %v6219_v36  ;;  %v2490_v56 = vmul.f32 0.0, %v5433_v30 }
0x159f   :  { %v2096_v46 = vpop.permute.xlu1 %2095 }
0x15a0   :  { %v2098_v24 = vmul.f32 %v2096_v46, %v2093_v35 }
0x15a2   :  { %v2102_v25 = vadd.f32 %v2101_v19, %v2098_v24 }
0x15a3   :  { %v1512_v26 = vpop.permute.xlu1 %1511 }
0x15a4   :  { %v2104_v28 = vrot.slane %v2102_v25, 4  ;;  %1514 = vst.msk [vmem:[#allocation4 + $0xc] sm:$0xf] %vm483_vm12, %v1512_v26 }
0x15a6   :  { %2105 = vrot.lane.b32.xlu1 %v2104_v28, %s5565_s5 }
0x15a7   :  { %v1008_v48 = vpop.permute.xlu1 %1007 }
0x15a8   :  { %1010 = vst.msk [vmem:[#allocation4 + $0x14] sm:$0xf] %vm483_vm12, %v1008_v48 }
0x15a9   :  { %1748 = vst.msk [vmem:[#allocation4 + $0x14] sm:$0xf] %vm477_vm5, %v6062_v17 }
0x15aa   :  { %480 = vrot.lane.b32.xlu1 %v5797_v55, %s5564_s26 }
0x15ab   :  { %v2237_v42 = vld [vmem:[#allocation4 + $0x8] sm:$0xff] }
0x15ac   :  { %4476 = vmatmul.mubr.msk.f32.gmra.mrb[24].mxu0 %vm201_vm2, %v2237_v42 }
0x15ad   :  { %2356 = vmatprep.mubr.f32.mxu0 %v5562_v4 }
0x15ae   :  { %2479 = vrot.lane.b32.xlu1 %v2477_v23, %s5563_s2 }
0x15b0   :  { %v2238_v9 = vld [vmem:[#allocation4 + $0x10] sm:$0xff] }
0x15b1   :  { %4477 = vmatmul.mubr.msk.f32.gmra.mrb[26].mxu0 %vm201_vm2, %v2238_v9 }
0x15b2   :  { %2362 = vmatprep.mubr.f32.mxu0 %v5562_v4 }
0x1609   :  { %v2560_v14 = vpop.f32.mrb[20].mxu1 }
0x160a   :  { %v4888_v39 = vpop.f32.mrb[21].mxu1  ;;  %v2567_v24 = vrot.slane %v2560_v14, 4 }
0x1618   :  { %v2106_v3 = vpop.permute.xlu1 %2105 }
0x1619   :  { %v2108_v17 = vmul.f32 %v2106_v3, %v5788_v43 }
0x161b   :  { %v2114_v37 = vadd.f32 %v6226_v20, %v2108_v17 }
0x161c   :  { %v481_v55 = vpop.permute.xlu1 %480 }
0x161d   :  { %484 = vst.msk [vmem:[#allocation4 + $0x1c] sm:$0xf] %vm483_vm12, %v481_v55 }
0x161e   :  { %2230 = vst.msk [vmem:[#allocation4 + $0x1c] sm:$0xf] %vm477_vm5, %v2114_v37 }
0x1620   :  { %v2480_v36 = vpop.permute.xlu1 %2479 }
0x1621   :  { %v2482_v63 = vadd.f32 %v2480_v36, %v2456_v60  ;;  %v2484_v60 = vsub.f32 1.0, %v5433_v30 }
0x1623   :  { %5434 = vtanh.f32 %v2482_v63 }
0x1625   :  { %v2239_v18 = vld [vmem:[#allocation4 + $0x18] sm:$0xff] }
0x1626   :  { %4478 = vmatmul.mubr.msk.f32.gmra.mrb[28].mxu0 %vm201_vm2, %v2239_v18 }
0x1627   :  { %4908 = vmatprep.mubr.msk.f32.mxu0 %vm5561_vm0, %v5562_v4 }
0x162d   :  { %v5435_v41 = vpop.eup %5434 }
0x162e   :  { %2486 = vrot.lane.b32.xlu0 %v5435_v41, %s5565_s5 }
0x1632   :  { %2585 = vrot.lane.b32.xlu0 %v6194_v5, %s5564_s26 }
0x167f   :  { %v2352_v20 = vpop.f32.mrb[24].mxu0 }
0x1680   :  { %v2353_v16 = vadd.f32 %v2352_v20, %v6271_v22  ;;  %v2354_v47 = vpop.f32.mrb[25].mxu0 }
0x1681   :  { %v2355_v45 = vadd.f32 %v2354_v47, %v6275_v49 }
0x1682   :  { %2371 = vst [vmem:[#allocation3 + $0x10] sm:$0xff] %v2353_v16 }
0x1683   :  { %2372 = vst.msk [vmem:[#allocation3 + $0x18] sm:$0xff] %vm201_vm2, %v2355_v45 }
0x1684   :  { %v2358_v54 = vpop.f32.mrb[26].mxu0 }
0x1685   :  { %v2359_v59 = vadd.f32 %v2358_v54, %v6271_v22  ;;  %v2360_v61 = vpop.f32.mrb[27].mxu0 }
0x1686   :  { %v2361_v13 = vadd.f32 %v2360_v61, %v6275_v49 }
0x1687   :  { %2373 = vst [vmem:[#allocation3 + $0x20] sm:$0xff] %v2359_v59 }
0x1688   :  { %2374 = vst.msk [vmem:[#allocation3 + $0x28] sm:$0xff] %vm201_vm2, %v2361_v13 }
0x16a0   :  { %v2487_v5 = vpop.permute.xlu0 %2486 }
0x16a1   :  { %v2489_v7 = vmul.f32 %v2487_v5, %v2484_v60 }
0x16a3   :  { %v2491_v33 = vadd.f32 %v2490_v56, %v2489_v7 }
0x16a4   :  { %v6313_v8 = vpop.permute.xlu0 %2585 }
0x16a5   :  { %v2492_v32 = vmul.f32 %v2491_v33, %v5806_v57  ;;  %v2588_v35 = vadd.f32 %v6313_v8, %v2560_v14 }
0x16a7   :  { %v6318_v46 = vadd.f32 %v2492_v32, %v5813_v2  ;;  %v2590_v19 = vrot.slane %v2588_v35, 4 }
0x16a9   :  { %2615 = vrot.lane.b32.xlu1 %v6318_v46, %s5565_s5  ;;  %2591 = vrot.lane.b32.xlu0 %v2590_v19, %s5564_s26  ;;  %v6350_v19 = vld [vmem:[#allocation3] sm:$0xf0] }
0x16ad   :  { %2568 = vrot.lane.b32.xlu1 %v2567_v24, %s5565_s5 }
0x16f9   :  { %v2364_v25 = vpop.f32.mrb[28].mxu0 }
0x16fa   :  { %v2365_v26 = vadd.f32 %v2364_v25, %v6271_v22  ;;  %v2366_v28 = vpop.f32.mrb[29].mxu0 }
0x16fb   :  { %v2367_v48 = vadd.f32 %v2366_v28, %v6275_v49 }
0x16fc   :  { %2375 = vst [vmem:[#allocation3 + $0x30] sm:$0xff] %v2365_v26 }
0x16fd   :  { %2376 = vst.msk [vmem:[#allocation3 + $0x38] sm:$0xff] %vm201_vm2, %v2367_v48 }
0x1703   :  { %v2564_v30 = vld [vmem:[#allocation3 + $0x30] sm:$0xf0] }
0x1704   :  { %v2565_v55 = vld [vmem:[#allocation3 + $0x38] sm:$0xf0] }
0x171b   :  { %v2616_v2 = vpop.permute.xlu1 %2615  ;;  %v2592_v3 = vpop.permute.xlu0 %2591 }
0x171c   :  { %4898 = vmatmul.mubr.msk.f32.vlgmr.msra.gmra.mrb[22].mxu1 %vm98_vm1, %v2616_v2 }
0x171d   :  { %5211 = vmatpush3.bf16.msra.mxu1 %v6110_v38  ;;  %4919 = vmatprep.mubr.msk.f32.mxu1 %vm5561_vm0, %v5562_v4 }
0x171e   :  { %5212 = vmatprep.subr.bf16.mxu1 %v5560_v0 }
0x171f   :  { %v2569_v42 = vpop.permute.xlu1 %2568 }
0x1720   :  { %v2571_v23 = vadd.f32 %v2569_v42, %v2564_v30  ;;  %v2578_v16 = vadd.f32 %v2569_v42, %v2565_v55 }
0x1721   :  { %5214 = vmatpush3.bf16.msra.mxu1 %v6118_v21 }
0x1722   :  { %v4481_v22 = vmul.f32 -1.442695, %v2571_v23  ;;  %5221 = vmatprep.subr.bf16.mxu1 %v5560_v0  ;;  %v4482_v47 = vmul.f32 -1.442695, %v2578_v16 }
0x1724   :  { %5436 = vpow2.f32 %v4481_v22  ;;  %v2729_v22 = vmul.f32 %v6318_v46, %v5859_v15 }
0x172e   :  { %v5437_v49 = vpop.eup %5436 }
0x172f   :  { %v2575_v9 = vadd.f32 1.0, %v5437_v49 }
0x1731   :  { %5438 = vrcp.f32 %v2575_v9 }
0x173b   :  { %v5439_v17 = vpop.eup %5438 }
0x173c   :  { %v2594_v37 = vmul.f32 %v5439_v17, %v2592_v3 }
0x173e   :  { %2596 = vrot.lane.b32.xlu1 %v2594_v37, %s5563_s2  ;;  %v2719_v37 = vrot.slane %v6318_v46, 4 }
0x17b0   :  { %v2597_v36 = vpop.permute.xlu1 %2596 }
0x17b1   :  { %v2599_v63 = vadd.f32 %v2597_v36, %v2565_v55 }
0x17b3   :  { %5440 = vtanh.f32 %v2599_v63 }
0x17b4   :  { %5442 = vpow2.f32 %v4482_v47  ;;  %v6367_v47 = vld [vmem:[#allocation3 + $0x30] sm:$0xf] }
0x17bd   :  { %v5441_v18 = vpop.eup %5440 }
0x17be   :  { %2603 = vrot.lane.b32.xlu0 %v5441_v18, %s5565_s5  ;;  %v5443_v45 = vpop.eup %5442 }
0x17bf   :  { %v2582_v54 = vadd.f32 1.0, %v5443_v45 }
0x17c1   :  { %5444 = vrcp.f32 %v2582_v54 }
0x17cb   :  { %v5445_v59 = vpop.eup %5444 }
0x17cc   :  { %v2601_v61 = vsub.f32 1.0, %v5445_v59  ;;  %v2607_v60 = vmul.f32 0.0, %v5445_v59 }
0x17ef   :  { %v2685_v14 = vpop.f32.mrb[22].mxu1 }
0x17f0   :  { %v2700_v39 = vadd.f32 %v2685_v14, %v6205_v27  ;;  %v4899_v41 = vpop.f32.mrb[23].mxu1  ;;  %v2691_v35 = vrot.slane %v2685_v14, 4 }
0x17f2   :  { %v2702_v20 = vrot.slane %v2700_v39, 4 }
0x17f4   :  { %2703 = vrot.lane.b32.xlu1 %v2702_v20, %s5563_s2 }
0x1830   :  { %v2604_v13 = vpop.permute.xlu0 %2603 }
0x1831   :  { %v2606_v5 = vmul.f32 %v2604_v13, %v2601_v61 }
0x1833   :  { %v2608_v56 = vadd.f32 %v2607_v60, %v2606_v5 }
0x1835   :  { %v2610_v7 = vrot.slane %v2608_v56, 4  ;;  %v2809_v56 = vld [vmem:[#allocation3 + $0x38] sm:$0xf] }
0x1837   :  { %v2612_v33 = vmul.f32 %v2610_v7, %v5788_v43 }
0x1839   :  { %v6340_v32 = vadd.f32 %v2612_v33, %v5793_v53  ;;  %v2693_v53 = vadd.f32 %v2691_v35, %v6350_v19 }
0x183b   :  { %4909 = vmatmul.mubr.msk.f32.vlgmr.msra.gmra.mrb[30].mxu0 %vm98_vm1, %v6340_v32  ;;  %v4484_v24 = vmul.f32 -1.442695, %v2693_v53 }
0x183c   :  { %5217 = vmatpush3.bf16.msra.mxu0 %v6239_v44  ;;  %4930 = vmatprep.mubr.msk.f32.mxu0 %vm5561_vm0, %v5562_v4 }
0x183d   :  { %5218 = vmatprep.subr.bf16.mxu0 %v5560_v0  ;;  %5446 = vpow2.f32 %v4484_v24 }
0x1840   :  { %5220 = vmatpush3.bf16.msra.mxu0 %v6250_v10 }
0x1841   :  { %5227 = vmatprep.subr.bf16.mxu0 %v5560_v0 }
0x1847   :  { %v5447_v25 = vpop.eup %5446 }
0x1848   :  { %v2697_v26 = vadd.f32 1.0, %v5447_v25 }
0x184a   :  { %5448 = vrcp.f32 %v2697_v26 }
0x1854   :  { %v5449_v28 = vpop.eup %5448 }
0x1855   :  { %v2713_v17 = vsub.f32 1.0, %v5449_v28  ;;  %v2721_v36 = vmul.f32 %v5449_v28, %v2719_v37 }
0x1866   :  { %v2704_v48 = vpop.permute.xlu1 %2703 }
0x1867   :  { %v2706_v2 = vmul.f32 %v5449_v28, %v2704_v48 }
0x1869   :  { %2708 = vrot.lane.b32.xlu0 %v2706_v2, %s5563_s2 }
0x18db   :  { %v2709_v30 = vpop.permute.xlu0 %2708 }
0x18dc   :  { %v2711_v42 = vadd.f32 %v2709_v30, %v6350_v19 }
0x18de   :  { %5450 = vtanh.f32 %v2711_v42 }
0x18e8   :  { %v5451_v23 = vpop.eup %5450 }
0x18e9   :  { %2715 = vrot.lane.b32.xlu1 %v5451_v23, %s5565_s5 }
0x18ed   :  { %2731 = vrot.lane.b32.xlu1 %v2729_v22, %s5565_s5 }
0x190e   :  { %v2804_v49 = vpop.f32.mrb[30].mxu0 }
0x190f   :  { %v2828_v9 = vadd.f32 %v2804_v49, %v6313_v8  ;;  %v4910_v3 = vpop.f32.mrb[31].mxu0 }
0x1910   :  { %v2849_v3 = vmul.f32 %v6340_v32, %v5840_v52 }
0x1911   :  { %2830 = vrot.lane.b32.xlu1 %v2828_v9, %s5564_s26 }
0x195b   :  { %v2716_v55 = vpop.permute.xlu1 %2715 }
0x195c   :  { %v2718_v63 = vmul.f32 %v2716_v55, %v2713_v17  ;;  %v6396_v55 = vld [vmem:[#allocation3 + $0x10] sm:$0xf] }
0x195e   :  { %v2722_v18 = vadd.f32 %v2721_v36, %v2718_v63 }
0x195f   :  { %v2732_v20 = vpop.permute.xlu1 %2731 }
0x1960   :  { %v2724_v14 = vrot.slane %v2722_v18, 4 }
0x1962   :  { %2725 = vrot.lane.b32.xlu0 %v2724_v14, %s5565_s5 }
0x1966   :  { %2811 = vrot.lane.b32.xlu0 %v2804_v49, %s5565_s5 }
0x1983   :  { %v2831_v60 = vpop.permute.xlu1 %2830 }
0x19d4   :  { %v2726_v39 = vpop.permute.xlu0 %2725 }
0x19d5   :  { %v2728_v41 = vmul.f32 %v2726_v39, %v5869_v34 }
0x19d7   :  { %v6365_v16 = vadd.f32 %v2732_v20, %v2728_v41 }
0x19d8   :  { %v2812_v45 = vpop.permute.xlu0 %2811 }
0x19d9   :  { %v2814_v46 = vadd.f32 %v2812_v45, %v6367_v47  ;;  %4920 = vmatmul.mubr.msk.f32.vlgmr.msra.gmra.mrb[24].mxu1 %vm98_vm1, %v6365_v16  ;;  %v2821_v26 = vadd.f32 %v2812_v45, %v2809_v56 }
0x19da   :  { %5223 = vmatpush3.bf16.msra.mxu1 %v6110_v38  ;;  %4941 = vmatprep.mubr.msk.f32.mxu1 %vm5561_vm0, %v5562_v4 }
0x19db   :  { %v4486_v54 = vmul.f32 -1.442695, %v2814_v46  ;;  %5224 = vmatprep.subr.bf16.mxu1 %v5560_v0  ;;  %v4487_v28 = vmul.f32 -1.442695, %v2821_v26 }
0x19dd   :  { %5452 = vpow2.f32 %v4486_v54  ;;  %v2956_v54 = vmul.f32 %v6365_v16, %v5913_v51 }
0x19de   :  { %5226 = vmatpush3.bf16.msra.mxu1 %v6118_v21 }
0x19df   :  { %5233 = vmatprep.subr.bf16.mxu1 %v5560_v0 }
0x19e7   :  { %v5453_v59 = vpop.eup %5452 }
0x19e8   :  { %v2818_v61 = vadd.f32 1.0, %v5453_v59 }
0x19ea   :  { %5454 = vrcp.f32 %v2818_v61 }
0x19f4   :  { %v5455_v13 = vpop.eup %5454 }
0x19f5   :  { %v2833_v5 = vmul.f32 %v5455_v13, %v2831_v60 }
0x19f7   :  { %2835 = vrot.lane.b32.xlu0 %v2833_v5, %s5563_s2 }
0x1a69   :  { %v2836_v7 = vpop.permute.xlu0 %2835 }
0x1a6a   :  { %v2838_v33 = vadd.f32 %v2836_v7, %v2809_v56 }
0x1a6c   :  { %5456 = vtanh.f32 %v2838_v33 }
0x1a6d   :  { %5458 = vpow2.f32 %v4487_v28  ;;  %v6415_v28 = vld [vmem:[#allocation3 + $0x20] sm:$0xf0] }
0x1a76   :  { %v5457_v35 = vpop.eup %5456 }
0x1a77   :  { %2842 = vrot.lane.b32.xlu1 %v5457_v35, %s5565_s5  ;;  %v5459_v48 = vpop.eup %5458 }
0x1a78   :  { %v2825_v2 = vadd.f32 1.0, %v5459_v48 }
0x1a7a   :  { %5460 = vrcp.f32 %v2825_v2  ;;  %v3036_v2 = vld [vmem:[#allocation3 + $0x28] sm:$0xf0] }
0x1a84   :  { %v5461_v30 = vpop.eup %5460 }
0x1a85   :  { %v2840_v42 = vsub.f32 1.0, %v5461_v30  ;;  %v2846_v22 = vmul.f32 %v5461_v30, %v6340_v32 }
0x1aac   :  { %v2920_v53 = vpop.f32.mrb[24].mxu1 }
0x1aad   :  { %v2932_v24 = vadd.f32 %v2920_v53, %v6205_v27  ;;  %v4921_v25 = vpop.f32.mrb[25].mxu1  ;;  %v2925_v32 = vadd.f32 %v6396_v55, %v2920_v53 }
0x1aaf   :  { %2934 = vrot.lane.b32.xlu0 %v2932_v24, %s5563_s2  ;;  %v4489_v36 = vmul.f32 -1.442695, %v2925_v32 }
0x1ab1   :  { %5462 = vpow2.f32 %v4489_v36 }
0x1abb   :  { %v5463_v63 = vpop.eup %5462 }
0x1abc   :  { %v2929_v18 = vadd.f32 1.0, %v5463_v63 }
0x1abe   :  { %5464 = vrcp.f32 %v2929_v18 }
0x1ac8   :  { %v5465_v14 = vpop.eup %5464 }
0x1ac9   :  { %v2944_v7 = vsub.f32 1.0, %v5465_v14 }
0x1ae9   :  { %v2843_v23 = vpop.permute.xlu1 %2842 }
0x1aea   :  { %v2845_v49 = vmul.f32 %v2843_v23, %v2840_v42 }
0x1aec   :  { %v2847_v9 = vadd.f32 %v2846_v22, %v2845_v49 }
0x1aee   :  { %v2848_v17 = vmul.f32 %v2847_v9, %v5842_v1 }
0x1af0   :  { %v6386_v37 = vadd.f32 %v2849_v3, %v2848_v17 }
0x1af2   :  { %4931 = vmatmul.mubr.msk.f32.vlgmr.msra.gmra.mrb[32].mxu0 %vm98_vm1, %v6386_v37  ;;  %v3075_v63 = vrot.slane %v6386_v37, 4 }
0x1af3   :  { %5229 = vmatpush3.bf16.msra.mxu0 %v6239_v44  ;;  %4952 = vmatprep.mubr.msk.f32.mxu0 %vm5561_vm0, %v5562_v4 }
0x1af4   :  { %5230 = vmatprep.subr.bf16.mxu0 %v5560_v0 }
0x1af7   :  { %5232 = vmatpush3.bf16.msra.mxu0 %v6250_v10 }
0x1af8   :  { %5239 = vmatprep.subr.bf16.mxu0 %v5560_v0 }
0x1b21   :  { %v2935_v39 = vpop.permute.xlu0 %2934 }
0x1b22   :  { %v2937_v41 = vmul.f32 %v5465_v14, %v2935_v39 }
0x1b24   :  { %2939 = vrot.lane.b32.xlu1 %v2937_v41, %s5563_s2 }
0x1b28   :  { %2950 = vrot.lane.b32.xlu1 %v6365_v16, %s5564_s26 }
0x1b96   :  { %v2940_v20 = vpop.permute.xlu1 %2939 }
0x1b97   :  { %v2942_v45 = vadd.f32 %v2940_v20, %v6396_v55 }
0x1b99   :  { %5466 = vtanh.f32 %v2942_v45 }
0x1b9a   :  { %v2951_v56 = vpop.permute.xlu1 %2950 }
0x1b9b   :  { %v2953_v35 = vmul.f32 %v5465_v14, %v2951_v56 }
0x1ba3   :  { %v5467_v46 = vpop.eup %5466 }
0x1ba4   :  { %2946 = vrot.lane.b32.xlu0 %v5467_v46, %s5565_s5 }
0x1ba8   :  { %2958 = vrot.lane.b32.xlu0 %v2956_v54, %s5564_s26 }
0x1bc5   :  { %v3031_v59 = vpop.f32.mrb[32].mxu0 }
0x1bc6   :  { %v3038_v61 = vrot.slane %v3031_v59, 4  ;;  %v3056_v13 = vadd.f32 %v3031_v59, %v6313_v8  ;;  %v4932_v60 = vpop.f32.mrb[33].mxu0 }
0x1bc8   :  { %3039 = vrot.lane.b32.xlu1 %v3038_v61, %s5565_s5  ;;  %v3058_v5 = vrot.slane %v3056_v13, 4 }
0x1bcc   :  { %3059 = vrot.lane.b32.xlu1 %v3058_v5, %s5564_s26  ;;  %v3083_v5 = vmul.f32 %v6386_v37, %v5898_v40 }
0x1c16   :  { %v2947_v33 = vpop.permute.xlu0 %2946 }
0x1c17   :  { %v2949_v53 = vmul.f32 %v2947_v33, %v2944_v7 }
0x1c19   :  { %v2954_v24 = vadd.f32 %v2953_v35, %v2949_v53 }
0x1c1a   :  { %v2959_v25 = vpop.permute.xlu0 %2958 }
0x1c1b   :  { %v2955_v16 = vmul.f32 %v2954_v24, %v5919_v58 }
0x1c1d   :  { %v6411_v26 = vadd.f32 %v2959_v25, %v2955_v16  ;;  %v6443_v16 = vld [vmem:[#allocation3 + $0x10] sm:$0xf0] }
0x1c1f   :  { %3086 = vrot.lane.b32.xlu0 %v6411_v26, %s5565_s5 }
0x1c3a   :  { %v3040_v48 = vpop.permute.xlu1 %3039 }
0x1c3b   :  { %v3042_v30 = vadd.f32 %v3040_v48, %v6415_v28  ;;  %v3049_v42 = vadd.f32 %v3040_v48, %v3036_v2 }
0x1c3d   :  { %v4491_v23 = vmul.f32 -1.442695, %v3042_v30  ;;  %v4492_v22 = vmul.f32 -1.442695, %v3049_v42 }
0x1c3e   :  { %v3060_v36 = vpop.permute.xlu1 %3059 }
0x1c3f   :  { %5468 = vpow2.f32 %v4491_v23 }
0x1c40   :  { %5470 = vpow2.f32 %v4492_v22 }
0x1c49   :  { %v5469_v49 = vpop.eup %5468 }
0x1c4a   :  { %v5471_v9 = vpop.eup %5470  ;;  %v3046_v3 = vadd.f32 1.0, %v5469_v49 }
0x1c4b   :  { %v3053_v17 = vadd.f32 1.0, %v5471_v9 }
0x1c4c   :  { %5472 = vrcp.f32 %v3046_v3 }
0x1c4d   :  { %5474 = vrcp.f32 %v3053_v17 }
0x1c56   :  { %v5473_v32 = vpop.eup %5472 }
0x1c57   :  { %v5475_v18 = vpop.eup %5474  ;;  %v3062_v14 = vmul.f32 %v5473_v32, %v3060_v36 }
0x1c58   :  { %v3077_v39 = vmul.f32 %v5475_v18, %v3075_v63  ;;  %v3069_v54 = vsub.f32 1.0, %v5475_v18  ;;  %v3200_v63 = vmul.f32 %v6411_v26, %v5964_v31 }
0x1c59   :  { %3064 = vrot.lane.b32.xlu0 %v3062_v14, %s5563_s2  ;;  %v6455_v14 = vld [vmem:[#allocation3 + $0x20] sm:$0xf] }
0x1c91   :  { %v3087_v41 = vpop.permute.xlu0 %3086 }
0x1c92   :  { %4942 = vmatmul.mubr.msk.f32.vlgmr.msra.gmra.mrb[26].mxu1 %vm98_vm1, %v3087_v41 }
0x1c93   :  { %5235 = vmatpush3.bf16.msra.mxu1 %v6110_v38  ;;  %4963 = vmatprep.mubr.msk.f32.mxu1 %vm5561_vm0, %v5562_v4 }
0x1c94   :  { %5236 = vmatprep.subr.bf16.mxu1 %v5560_v0 }
0x1c97   :  { %5238 = vmatpush3.bf16.msra.mxu1 %v6118_v21 }
0x1c98   :  { %5245 = vmatprep.subr.bf16.mxu1 %v5560_v0 }
0x1ccb   :  { %v3065_v20 = vpop.permute.xlu0 %3064 }
0x1ccc   :  { %v3067_v45 = vadd.f32 %v3065_v20, %v3036_v2 }
0x1cce   :  { %5476 = vtanh.f32 %v3067_v45 }
0x1cd8   :  { %v5477_v46 = vpop.eup %5476 }
0x1cd9   :  { %3071 = vrot.lane.b32.xlu1 %v5477_v46, %s5565_s5  ;;  %v3190_v46 = vrot.slane %v6411_v26, 4 }
0x1d4b   :  { %v3072_v59 = vpop.permute.xlu1 %3071 }
0x1d4c   :  { %v3074_v61 = vmul.f32 %v3072_v59, %v3069_v54 }
0x1d4e   :  { %v3078_v13 = vadd.f32 %v3077_v39, %v3074_v61 }
0x1d50   :  { %v3080_v60 = vrot.slane %v3078_v13, 4 }
0x1d52   :  { %v3082_v56 = vmul.f32 %v3080_v60, %v5895_v29 }
0x1d54   :  { %v6431_v7 = vadd.f32 %v3083_v5, %v3082_v56 }
0x1d56   :  { %4953 = vmatmul.mubr.msk.f32.vlgmr.msra.gmra.mrb[34].mxu0 %vm98_vm1, %v6431_v7 }
0x1d57   :  { %5241 = vmatpush3.bf16.msra.mxu0 %v6239_v44  ;;  %4974 = vmatprep.mubr.msk.f32.mxu0 %vm5561_vm0, %v5562_v4 }
0x1d58   :  { %5242 = vmatprep.subr.bf16.mxu0 %v5560_v0 }
0x1d5b   :  { %5244 = vmatpush3.bf16.msra.mxu0 %v6250_v10 }
0x1d5c   :  { %5251 = vmatprep.subr.bf16.mxu0 %v5560_v0 }
0x1d65   :  { %v3156_v33 = vpop.f32.mrb[26].mxu1 }
0x1d66   :  { %v3171_v37 = vadd.f32 %v3156_v33, %v6205_v27  ;;  %v4943_v35 = vpop.f32.mrb[27].mxu1  ;;  %v3162_v24 = vrot.slane %v3156_v33, 4 }
0x1d68   :  { %v3173_v53 = vrot.slane %v3171_v37, 4  ;;  %v3164_v25 = vadd.f32 %v3162_v24, %v6443_v16 }
0x1d6a   :  { %3174 = vrot.lane.b32.xlu0 %v3173_v53, %s5563_s2  ;;  %v4494_v48 = vmul.f32 -1.442695, %v3164_v25 }
0x1d6c   :  { %5478 = vpow2.f32 %v4494_v48  ;;  %v3280_v48 = vld [vmem:[#allocation3 + $0x28] sm:$0xf] }
0x1d76   :  { %v5479_v2 = vpop.eup %5478 }
0x1d77   :  { %v3168_v30 = vadd.f32 1.0, %v5479_v2 }
0x1d79   :  { %5480 = vrcp.f32 %v3168_v30 }
0x1d83   :  { %v5481_v42 = vpop.eup %5480 }
0x1d84   :  { %v3184_v54 = vsub.f32 1.0, %v5481_v42  ;;  %v3192_v61 = vmul.f32 %v5481_v42, %v3190_v46 }
0x1ddc   :  { %v3175_v23 = vpop.permute.xlu0 %3174 }
0x1ddd   :  { %v3177_v22 = vmul.f32 %v5481_v42, %v3175_v23 }
0x1ddf   :  { %3179 = vrot.lane.b32.xlu1 %v3177_v22, %s5563_s2 }
0x1e29   :  { %v3275_v49 = vpop.f32.mrb[34].mxu0 }
0x1e2a   :  { %v4954_v9 = vpop.f32.mrb[35].mxu0  ;;  %3282 = vrot.lane.b32.xlu1 %v3275_v49, %s5565_s5  ;;  %v3299_v36 = vadd.f32 %v3275_v49, %v6313_v8 }
0x1e51   :  { %v3180_v3 = vpop.permute.xlu1 %3179 }
0x1e52   :  { %v3182_v17 = vadd.f32 %v3180_v3, %v6443_v16 }
0x1e54   :  { %5482 = vtanh.f32 %v3182_v17 }
0x1e5e   :  { %v5483_v32 = vpop.eup %5482 }
0x1e5f   :  { %3186 = vrot.lane.b32.xlu0 %v5483_v32, %s5565_s5 }
0x1e63   :  { %3301 = vrot.lane.b32.xlu0 %v3299_v36, %s5564_s26 }
0x1e67   :  { %3202 = vrot.lane.b32.xlu0 %v3200_v63, %s5565_s5 }
0x1e9c   :  { %v3283_v18 = vpop.permute.xlu1 %3282 }
0x1e9d   :  { %v3285_v39 = vadd.f32 %v3283_v18, %v6455_v14  ;;  %v3292_v42 = vadd.f32 %v3283_v18, %v3280_v48 }
0x1e9f   :  { %v4496_v41 = vmul.f32 -1.442695, %v3285_v39  ;;  %v4497_v23 = vmul.f32 -1.442695, %v3292_v42  ;;  %v3320_v39 = vmul.f32 %v6431_v7, %v5948_v12  ;;  %v3505_v42 = vld [vmem:[#allocation3 + $0x18] sm:$0xf0] }
0x1ea1   :  { %5484 = vpow2.f32 %v4496_v41 }
0x1eab   :  { %v5485_v20 = vpop.eup %5484 }
0x1eac   :  { %v3289_v45 = vadd.f32 1.0, %v5485_v20 }
0x1eae   :  { %5486 = vrcp.f32 %v3289_v45 }
0x1eb8   :  { %v5487_v33 = vpop.eup %5486 }
0x1ed1   :  { %v3187_v59 = vpop.permute.xlu0 %3186 }
0x1ed2   :  { %v3189_v13 = vmul.f32 %v3187_v59, %v3184_v54 }
0x1ed4   :  { %v3193_v60 = vadd.f32 %v3192_v61, %v3189_v13 }
0x1ed5   :  { %v3302_v56 = vpop.permute.xlu0 %3301 }
0x1ed6   :  { %v3195_v5 = vrot.slane %v3193_v60, 4  ;;  %v3304_v37 = vmul.f32 %v5487_v33, %v3302_v56 }
0x1ed8   :  { %3196 = vrot.lane.b32.xlu1 %v3195_v5, %s5565_s5 }
0x1ed9   :  { %v3203_v24 = vpop.permute.xlu0 %3202 }
0x1edc   :  { %3306 = vrot.lane.b32.xlu1 %v3304_v37, %s5563_s2 }
0x1f4a   :  { %v3197_v35 = vpop.permute.xlu1 %3196 }
0x1f4b   :  { %v3199_v53 = vmul.f32 %v3197_v35, %v5975_v6 }
0x1f4d   :  { %v3205_v25 = vadd.f32 %v3203_v24, %v3199_v53 }
0x1f4e   :  { %v3307_v26 = vpop.permute.xlu1 %3306 }
0x1f4f   :  { %v3309_v2 = vadd.f32 %v3307_v26, %v3280_v48  ;;  %4964 = vmatmul.mubr.msk.f32.vlgmr.msra.gmra.mrb[28].mxu1 %vm98_vm1, %v3205_v25 }
0x1f50   :  { %5247 = vmatpush3.bf16.msra.mxu1 %v6110_v38  ;;  %4985 = vmatprep.mubr.msk.f32.mxu1 %vm5561_vm0, %v5562_v4 }
0x1f51   :  { %5488 = vtanh.f32 %v3309_v2  ;;  %5248 = vmatprep.subr.bf16.mxu1 %v5560_v0  ;;  %v3426_v2 = vmul.f32 %v3205_v25, %v5948_v12 }
0x1f52   :  { %5490 = vpow2.f32 %v4497_v23 }
0x1f54   :  { %5250 = vmatpush3.bf16.msra.mxu1 %v6118_v21 }
0x1f55   :  { %5257 = vmatprep.subr.bf16.mxu1 %v5560_v0 }
0x1f5b   :  { %v5489_v30 = vpop.eup %5488 }
0x1f5c   :  { %3313 = vrot.lane.b32.xlu0 %v5489_v30, %s5565_s5  ;;  %v5491_v22 = vpop.eup %5490 }
0x1f5d   :  { %v3296_v49 = vadd.f32 1.0, %v5491_v22 }
0x1f5f   :  { %5492 = vrcp.f32 %v3296_v49 }
0x1f69   :  { %v5493_v9 = vpop.eup %5492 }
0x1f6a   :  { %v3311_v3 = vsub.f32 1.0, %v5493_v9  ;;  %v3317_v32 = vmul.f32 %v5493_v9, %v6431_v7 }
0x1fce   :  { %v3314_v17 = vpop.permute.xlu0 %3313 }
0x1fcf   :  { %v3316_v36 = vmul.f32 %v3314_v17, %v3311_v3 }
0x1fd1   :  { %v3318_v63 = vadd.f32 %v3317_v32, %v3316_v36 }
0x1fd3   :  { %v3319_v41 = vmul.f32 %v3318_v63, %v5945_v11 }
0x1fd5   :  { %v6474_v20 = vadd.f32 %v3320_v39, %v3319_v41 }
0x1fd7   :  { %4975 = vmatmul.mubr.msk.f32.vlgmr.msra.gmra.mrb[36].mxu0 %vm98_vm1, %v6474_v20 }
0x1fd8   :  { %5253 = vmatpush3.bf16.msra.mxu0 %v6239_v44  ;;  %4996 = vmatprep.mubr.msk.f32.mxu0 %vm5561_vm0, %v5562_v4 }
0x1fd9   :  { %5254 = vmatprep.subr.bf16.mxu0 %v5560_v0 }
0x1fdc   :  { %5256 = vmatpush3.bf16.msra.mxu0 %v6250_v10 }
0x1fdd   :  { %5263 = vmatprep.subr.bf16.mxu0 %v5560_v0 }
0x2022   :  { %v3391_v18 = vpop.f32.mrb[28].mxu1 }
0x2023   :  { %v3402_v7 = vadd.f32 %v3391_v18, %v6205_v27  ;;  %v4965_v45 = vpop.f32.mrb[29].mxu1  ;;  %v3395_v46 = vadd.f32 %v3391_v18, %v6455_v14 }
0x2025   :  { %3404 = vrot.lane.b32.xlu1 %v3402_v7, %s5563_s2  ;;  %v4499_v54 = vmul.f32 -1.442695, %v3395_v46 }
0x2027   :  { %5494 = vpow2.f32 %v4499_v54 }
0x2031   :  { %v5495_v59 = vpop.eup %5494 }
0x2032   :  { %v3399_v61 = vadd.f32 1.0, %v5495_v59 }
0x2034   :  { %5496 = vrcp.f32 %v3399_v61 }
0x203e   :  { %v5497_v13 = vpop.eup %5496 }
0x2097   :  { %v3405_v60 = vpop.permute.xlu1 %3404 }
0x2098   :  { %v3407_v5 = vmul.f32 %v5497_v13, %v3405_v60 }
0x209a   :  { %3409 = vrot.lane.b32.xlu0 %v3407_v5, %s5563_s2 }
0x20aa   :  { %v3501_v56 = vpop.f32.mrb[36].mxu0 }
0x20ab   :  { %v3507_v33 = vrot.slane %v3501_v56, 4  ;;  %v4976_v37 = vpop.f32.mrb[37].mxu0  ;;  %v3525_v35 = vadd.f32 %v3501_v56, %v6313_v8 }
0x20ad   :  { %3508 = vrot.lane.b32.xlu1 %v3507_v33, %s5565_s5  ;;  %v3527_v53 = vrot.slane %v3525_v35, 4 }
0x20b1   :  { %3420 = vrot.lane.b32.xlu1 %v3205_v25, %s5564_s26  ;;  %v3544_v25 = vrot.slane %v6474_v20, 4 }
0x20b5   :  { %3528 = vrot.lane.b32.xlu1 %v3527_v53, %s5564_s26 }
0x210c   :  { %v3410_v24 = vpop.permute.xlu0 %3409 }
0x210d   :  { %v3412_v48 = vadd.f32 %v3410_v24, %v6455_v14 }
0x210f   :  { %5498 = vtanh.f32 %v3412_v48  ;;  %v3552_v48 = vmul.f32 %v6474_v20, %v5964_v31 }
0x2119   :  { %v5499_v26 = vpop.eup %5498 }
0x211a   :  { %3416 = vrot.lane.b32.xlu0 %v5499_v26, %s5565_s5 }
0x211e   :  { %3428 = vrot.lane.b32.xlu0 %v3426_v2, %s5564_s26 }
0x211f   :  { %v3509_v30 = vpop.permute.xlu1 %3508 }
0x2120   :  { %v3511_v23 = vadd.f32 %v3509_v30, %v6443_v16  ;;  %v3518_v22 = vadd.f32 %v3509_v30, %v3505_v42  ;;  %v3414_v16 = vsub.f32 1.0, %v5497_v13 }
0x2122   :  { %v4501_v49 = vmul.f32 -1.442695, %v3511_v23  ;;  %v4502_v9 = vmul.f32 -1.442695, %v3518_v22 }
0x2123   :  { %v3421_v36 = vpop.permute.xlu1 %3420 }
0x2124   :  { %5500 = vpow2.f32 %v4501_v49  ;;  %v3423_v45 = vmul.f32 %v5497_v13, %v3421_v36 }
0x2125   :  { %5502 = vpow2.f32 %v4502_v9 }
0x2127   :  { %v3529_v12 = vpop.permute.xlu1 %3528 }
0x212e   :  { %v5501_v3 = vpop.eup %5500 }
0x212f   :  { %v5503_v17 = vpop.eup %5502  ;;  %v3515_v14 = vadd.f32 1.0, %v5501_v3 }
0x2130   :  { %v3522_v32 = vadd.f32 1.0, %v5503_v17 }
0x2131   :  { %5504 = vrcp.f32 %v3515_v14 }
0x2132   :  { %5506 = vrcp.f32 %v3522_v32 }
0x213b   :  { %v5505_v63 = vpop.eup %5504 }
0x213c   :  { %v5507_v39 = vpop.eup %5506  ;;  %v3531_v41 = vmul.f32 %v5505_v63, %v3529_v12 }
0x213d   :  { %v3546_v18 = vmul.f32 %v5507_v39, %v3544_v25 }
0x213e   :  { %3533 = vrot.lane.b32.xlu1 %v3531_v41, %s5563_s2 }
0x218c   :  { %v3417_v7 = vpop.permute.xlu0 %3416 }
0x218d   :  { %v3419_v46 = vmul.f32 %v3417_v7, %v3414_v16 }
0x218f   :  { %v3424_v54 = vadd.f32 %v3423_v45, %v3419_v46 }
0x2190   :  { %v3429_v61 = vpop.permute.xlu0 %3428 }
0x2191   :  { %v3425_v59 = vmul.f32 %v3424_v54, %v5945_v11  ;;  %v3538_v11 = vsub.f32 1.0, %v5507_v39 }
0x2193   :  { %v6500_v60 = vadd.f32 %v3429_v61, %v3425_v59 }
0x2195   :  { %3555 = vrot.lane.b32.xlu0 %v6500_v60, %s5565_s5  ;;  %v3668_v59 = vmul.f32 %v6500_v60, %v5898_v40 }
0x21b0   :  { %v3534_v5 = vpop.permute.xlu1 %3533 }
0x21b1   :  { %v3536_v56 = vadd.f32 %v3534_v5, %v3505_v42  ;;  %v3747_v5 = vld [vmem:[#allocation3 + $0x18] sm:$0xf] }
0x21b3   :  { %5508 = vtanh.f32 %v3536_v56 }
0x21bd   :  { %v5509_v33 = vpop.eup %5508 }
0x21be   :  { %3540 = vrot.lane.b32.xlu0 %v5509_v33, %s5565_s5  ;;  %v3658_v33 = vrot.slane %v6500_v60, 4 }
0x2207   :  { %v3556_v37 = vpop.permute.xlu0 %3555 }
0x2208   :  { %4986 = vmatmul.mubr.msk.f32.vlgmr.msra.gmra.mrb[30].mxu1 %vm98_vm1, %v3556_v37 }
0x2209   :  { %5259 = vmatpush3.bf16.msra.mxu1 %v6110_v38  ;;  %5007 = vmatprep.mubr.msk.f32.mxu1 %vm5561_vm0, %v5562_v4 }
0x220a   :  { %5260 = vmatprep.subr.bf16.mxu1 %v5560_v0 }
0x220d   :  { %5262 = vmatpush3.bf16.msra.mxu1 %v6118_v21 }
0x220e   :  { %5269 = vmatprep.subr.bf16.mxu1 %v5560_v0 }
0x2230   :  { %v3541_v13 = vpop.permute.xlu0 %3540 }
0x2231   :  { %v3543_v35 = vmul.f32 %v3541_v13, %v3538_v11 }
0x2233   :  { %v3547_v53 = vadd.f32 %v3546_v18, %v3543_v35 }
0x2235   :  { %v3549_v24 = vrot.slane %v3547_v53, 4 }
0x2237   :  { %v3551_v26 = vmul.f32 %v3549_v24, %v5975_v6 }
0x2239   :  { %v6515_v2 = vadd.f32 %v3552_v48, %v3551_v26 }
0x223b   :  { %4997 = vmatmul.mubr.msk.f32.vlgmr.msra.gmra.mrb[38].mxu0 %vm98_vm1, %v6515_v2 }
0x223c   :  { %5265 = vmatpush3.bf16.msra.mxu0 %v6239_v44  ;;  %5018 = vmatprep.mubr.msk.f32.mxu0 %vm5561_vm0, %v5562_v4 }
0x223d   :  { %5266 = vmatprep.subr.bf16.mxu0 %v5560_v0 }
0x2240   :  { %5268 = vmatpush3.bf16.msra.mxu0 %v6250_v10 }
0x2241   :  { %5275 = vmatprep.subr.bf16.mxu0 %v5560_v0 }
0x22db   :  { %v3625_v30 = vpop.f32.mrb[30].mxu1 }
0x22dc   :  { %v3639_v31 = vadd.f32 %v3625_v30, %v6205_v27  ;;  %v4987_v6 = vpop.f32.mrb[31].mxu1  ;;  %v3630_v22 = vrot.slane %v3625_v30, 4 }
0x22de   :  { %v3641_v20 = vrot.slane %v3639_v31, 4  ;;  %v3632_v49 = vadd.f32 %v3630_v22, %v6415_v28 }
0x22e0   :  { %3642 = vrot.lane.b32.xlu1 %v3641_v20, %s5563_s2  ;;  %v4504_v9 = vmul.f32 -1.442695, %v3632_v49 }
0x22e2   :  { %5510 = vpow2.f32 %v4504_v9 }
0x22ec   :  { %v5511_v3 = vpop.eup %5510 }
0x22ed   :  { %v3636_v17 = vadd.f32 1.0, %v5511_v3 }
0x22ef   :  { %5512 = vrcp.f32 %v3636_v17 }
0x22f9   :  { %v5513_v14 = vpop.eup %5512 }
0x22fa   :  { %v3660_v11 = vmul.f32 %v5513_v14, %v3658_v33 }
0x230e   :  { %v3743_v42 = vpop.f32.mrb[38].mxu0 }
0x230f   :  { %3749 = vrot.lane.b32.xlu1 %v3743_v42, %s5565_s5  ;;  %v4998_v23 = vpop.f32.mrb[39].mxu0  ;;  %v3766_v63 = vadd.f32 %v3743_v42, %v6313_v8 }
0x2352   :  { %v3643_v32 = vpop.permute.xlu1 %3642 }
0x2353   :  { %v3645_v36 = vmul.f32 %v5513_v14, %v3643_v32 }
0x2355   :  { %3647 = vrot.lane.b32.xlu0 %v3645_v36, %s5563_s2 }
0x2359   :  { %3768 = vrot.lane.b32.xlu0 %v3766_v63, %s5564_s26 }
0x2381   :  { %v3750_v12 = vpop.permute.xlu1 %3749 }
0x2382   :  { %v3752_v25 = vadd.f32 %v3750_v12, %v6396_v55  ;;  %v3759_v24 = vadd.f32 %v3750_v12, %v3747_v5 }
0x2384   :  { %v4506_v39 = vmul.f32 -1.442695, %v3752_v25  ;;  %v4507_v48 = vmul.f32 -1.442695, %v3759_v24 }
0x2386   :  { %5514 = vpow2.f32 %v4506_v39 }
0x2390   :  { %v5515_v41 = vpop.eup %5514 }
0x2391   :  { %v3756_v18 = vadd.f32 1.0, %v5515_v41 }
0x2393   :  { %5516 = vrcp.f32 %v3756_v18 }
0x239d   :  { %v5517_v45 = vpop.eup %5516 }
0x23c7   :  { %v3648_v16 = vpop.permute.xlu0 %3647 }
0x23c8   :  { %v3650_v7 = vadd.f32 %v3648_v16, %v6415_v28  ;;  %v3652_v28 = vsub.f32 1.0, %v5513_v14 }
0x23ca   :  { %5518 = vtanh.f32 %v3650_v7 }
0x23cb   :  { %v3769_v46 = vpop.permute.xlu0 %3768 }
0x23cc   :  { %v3771_v54 = vmul.f32 %v5517_v45, %v3769_v46 }
0x23ce   :  { %3773 = vrot.lane.b32.xlu0 %v3771_v54, %s5563_s2 }
0x23d2   :  { %3670 = vrot.lane.b32.xlu0 %v3668_v59, %s5565_s5 }
0x23d4   :  { %v5519_v55 = vpop.eup %5518 }
0x23d5   :  { %3654 = vrot.lane.b32.xlu1 %v5519_v55, %s5565_s5 }
0x2440   :  { %v3774_v61 = vpop.permute.xlu0 %3773 }
0x2441   :  { %v3776_v56 = vadd.f32 %v3774_v61, %v3747_v5 }
0x2443   :  { %5520 = vtanh.f32 %v3776_v56 }
0x2444   :  { %5522 = vpow2.f32 %v4507_v48  ;;  %v3671_v20 = vpop.permute.xlu0 %3670 }
0x2447   :  { %v3655_v37 = vpop.permute.xlu1 %3654 }
0x2448   :  { %v3657_v13 = vmul.f32 %v3655_v37, %v3652_v28  ;;  %v3972_v37 = vld [vmem:[#allocation3 + $0x8] sm:$0xf0] }
0x244a   :  { %v3661_v35 = vadd.f32 %v3660_v11, %v3657_v13 }
0x244c   :  { %v3663_v53 = vrot.slane %v3661_v35, 4 }
0x244d   :  { %v5521_v40 = vpop.eup %5520 }
0x244e   :  { %3664 = vrot.lane.b32.xlu1 %v3663_v53, %s5565_s5  ;;  %v5523_v26 = vpop.eup %5522 }
0x244f   :  { %v3763_v30 = vadd.f32 1.0, %v5523_v26 }
0x2451   :  { %5524 = vrcp.f32 %v3763_v30 }
0x2452   :  { %3780 = vrot.lane.b32.xlu1 %v5521_v40, %s5565_s5 }
0x245b   :  { %v5525_v31 = vpop.eup %5524 }
0x245c   :  { %v3778_v23 = vsub.f32 1.0, %v5525_v31  ;;  %v3784_v49 = vmul.f32 %v5525_v31, %v6515_v2 }
0x24c0   :  { %v3665_v60 = vpop.permute.xlu1 %3664 }
0x24c1   :  { %v3667_v6 = vmul.f32 %v3665_v60, %v5895_v29  ;;  %v3787_v29 = vmul.f32 %v6515_v2, %v5913_v51 }
0x24c3   :  { %v3673_v42 = vadd.f32 %v3671_v20, %v3667_v6 }
0x24c4   :  { %v3781_v22 = vpop.permute.xlu1 %3780 }
0x24c5   :  { %v3783_v9 = vmul.f32 %v3781_v22, %v3778_v23  ;;  %5008 = vmatmul.mubr.msk.f32.vlgmr.msra.gmra.mrb[32].mxu1 %vm98_vm1, %v3673_v42  ;;  %v3893_v28 = vmul.f32 %v3673_v42, %v5840_v52 }
0x24c6   :  { %5271 = vmatpush3.bf16.msra.mxu1 %v6110_v38  ;;  %5029 = vmatprep.mubr.msk.f32.mxu1 %vm5561_vm0, %v5562_v4 }
0x24c7   :  { %v3785_v3 = vadd.f32 %v3784_v49, %v3783_v9  ;;  %5272 = vmatprep.subr.bf16.mxu1 %v5560_v0 }
0x24c9   :  { %v3786_v17 = vmul.f32 %v3785_v3, %v5919_v58 }
0x24ca   :  { %5274 = vmatpush3.bf16.msra.mxu1 %v6118_v21 }
0x24cb   :  { %v6553_v14 = vadd.f32 %v3787_v29, %v3786_v17  ;;  %5281 = vmatprep.subr.bf16.mxu1 %v5560_v0 }
0x24cd   :  { %5019 = vmatmul.mubr.msk.f32.vlgmr.msra.gmra.mrb[40].mxu0 %vm98_vm1, %v6553_v14  ;;  %v4011_v22 = vrot.slane %v6553_v14, 4 }
0x24ce   :  { %5277 = vmatpush3.bf16.msra.mxu0 %v6239_v44  ;;  %5040 = vmatprep.mubr.msk.f32.mxu0 %vm5561_vm0, %v5562_v4 }
0x24cf   :  { %5278 = vmatprep.subr.bf16.mxu0 %v5560_v0 }
0x24d2   :  { %5280 = vmatpush3.bf16.msra.mxu0 %v6250_v10 }
0x24d3   :  { %5287 = vmatprep.subr.bf16.mxu0 %v5560_v0 }
0x2598   :  { %v3858_v51 = vpop.f32.mrb[32].mxu1 }
0x2599   :  { %v3869_v58 = vadd.f32 %v3858_v51, %v6205_v27  ;;  %v5009_v38 = vpop.f32.mrb[33].mxu1  ;;  %v3862_v44 = vadd.f32 %v3858_v51, %v6367_v47  ;;  %v4019_v51 = vmul.f32 %v6553_v14, %v5859_v15 }
0x259b   :  { %3871 = vrot.lane.b32.xlu0 %v3869_v58, %s5563_s2  ;;  %v4509_v36 = vmul.f32 -1.442695, %v3862_v44 }
0x259d   :  { %5526 = vpow2.f32 %v4509_v36 }
0x25a0   :  { %v3968_v21 = vpop.f32.mrb[40].mxu0 }
0x25a1   :  { %v3974_v2 = vrot.slane %v3968_v21, 4  ;;  %v5020_v32 = vpop.f32.mrb[41].mxu0  ;;  %v3992_v39 = vadd.f32 %v3968_v21, %v6313_v8 }
0x25a3   :  { %3975 = vrot.lane.b32.xlu0 %v3974_v2, %s5565_s5  ;;  %v3994_v18 = vrot.slane %v3992_v39, 4 }
0x25a7   :  { %v5527_v63 = vpop.eup %5526 }
0x25a8   :  { %v3866_v12 = vadd.f32 1.0, %v5527_v63  ;;  %v5558_v63 = vld [vmem:[#allocation3 + $0x30] sm:$0xf0] }
0x25aa   :  { %5528 = vrcp.f32 %v3866_v12 }
0x25b4   :  { %v5529_v10 = vpop.eup %5528 }
0x25b5   :  { %v3881_v35 = vsub.f32 1.0, %v5529_v10 }
0x260d   :  { %v3872_v25 = vpop.permute.xlu0 %3871 }
0x260e   :  { %v3874_v41 = vmul.f32 %v5529_v10, %v3872_v25 }
0x2610   :  { %3876 = vrot.lane.b32.xlu1 %v3874_v41, %s5563_s2 }
0x2614   :  { %3995 = vrot.lane.b32.xlu1 %v3994_v18, %s5564_s26 }
0x2615   :  { %v3976_v16 = vpop.permute.xlu0 %3975 }
0x2616   :  { %v3978_v7 = vadd.f32 %v3976_v16, %v6350_v19  ;;  %v3985_v52 = vadd.f32 %v3976_v16, %v3972_v37  ;;  %v5559_v16 = vld [vmem:[#allocation3] sm:$0xf] }
0x2618   :  { %3887 = vrot.lane.b32.xlu1 %v3673_v42, %s5564_s26  ;;  %v4511_v45 = vmul.f32 -1.442695, %v3978_v7  ;;  %v4512_v60 = vmul.f32 -1.442695, %v3985_v52 }
0x261a   :  { %5530 = vpow2.f32 %v4511_v45 }
0x2624   :  { %v5531_v46 = vpop.eup %5530 }
0x2625   :  { %v3982_v54 = vadd.f32 1.0, %v5531_v46 }
0x2627   :  { %5532 = vrcp.f32 %v3982_v54 }
0x2631   :  { %v5533_v61 = vpop.eup %5532 }
0x2682   :  { %v3877_v59 = vpop.permute.xlu1 %3876 }
0x2683   :  { %v3879_v55 = vadd.f32 %v3877_v59, %v6367_v47 }
0x2685   :  { %5534 = vtanh.f32 %v3879_v55 }
0x2686   :  { %v3996_v5 = vpop.permute.xlu1 %3995 }
0x2687   :  { %v3998_v56 = vmul.f32 %v5533_v61, %v3996_v5 }
0x2689   :  { %4000 = vrot.lane.b32.xlu1 %v3998_v56, %s5563_s2 }
0x268a   :  { %v3888_v19 = vpop.permute.xlu1 %3887 }
0x268b   :  { %v3890_v53 = vmul.f32 %v5529_v10, %v3888_v19  ;;  %v4260_v19 = vld [vmem:[%s6662_s12 + $0x20] sm:$0xff] }
0x268f   :  { %v5535_v33 = vpop.eup %5534 }
0x2690   :  { %3883 = vrot.lane.b32.xlu0 %v5535_v33, %s5565_s5  ;;  %v4214_v33 = vld [vmem:[#allocation3 + $0x8] sm:$0xf] }
0x2694   :  { %3895 = vrot.lane.b32.xlu0 %v3893_v28, %s5564_s26 }
0x26fb   :  { %v4001_v11 = vpop.permute.xlu1 %4000 }
0x26fc   :  { %v4003_v13 = vadd.f32 %v4001_v11, %v3972_v37  ;;  %v4261_v37 = vld [vmem:[%s6662_s12 + $0x28] sm:$0xff] }
0x26fe   :  { %5536 = vtanh.f32 %v4003_v13  ;;  %v5282_v13 = vpack.c.bf16 %v4261_v37, %v4260_v19 }
0x26ff   :  { %5538 = vpow2.f32 %v4512_v60  ;;  %v4258_v60 = vld [vmem:[%s6662_s12 + $0x10] sm:$0xff] }
0x2702   :  { %v3884_v47 = vpop.permute.xlu0 %3883 }
0x2703   :  { %v3886_v40 = vmul.f32 %v3884_v47, %v3881_v35  ;;  %v4262_v35 = vld [vmem:[%s6662_s12 + $0x30] sm:$0xff]  ;;  %v4263_v47 = vld [vmem:[%s6662_s12 + $0x38] sm:$0xff] }
0x2705   :  { %v3891_v24 = vadd.f32 %v3890_v53, %v3886_v40  ;;  %v5285_v53 = vpack.c.bf16 %v4263_v47, %v4262_v35  ;;  %v4256_v40 = vld [vmem:[%s6662_s12] sm:$0xff] }
0x2706   :  { %v3896_v30 = vpop.permute.xlu0 %3895 }
0x2707   :  { %v3892_v48 = vmul.f32 %v3891_v24, %v5842_v1  ;;  %v4257_v24 = vld [vmem:[%s6662_s12 + $0x8] sm:$0xff] }
0x2708   :  { %v5537_v26 = vpop.eup %5536 }
0x2709   :  { %v6579_v31 = vadd.f32 %v3896_v30, %v3892_v48  ;;  %4007 = vrot.lane.b32.xlu1 %v5537_v26, %s5565_s5  ;;  %v5539_v6 = vpop.eup %5538  ;;  %v5288_v48 = vpack.c.bf16 %v4257_v24, %v4256_v40 }
0x270a   :  { %v3989_v20 = vadd.f32 1.0, %v5539_v6  ;;  %v4259_v6 = vld [vmem:[%s6662_s12 + $0x18] sm:$0xff] }
0x270b   :  { %4022 = vrot.lane.b32.xlu0 %v6579_v31, %s5565_s5  ;;  %v4135_v30 = vmul.f32 %v6579_v31, %v5790_v50 }
0x270c   :  { %5540 = vrcp.f32 %v3989_v20  ;;  %v5291_v20 = vpack.c.bf16 %v4259_v6, %v4258_v60 }
0x2716   :  { %v5541_v42 = vpop.eup %5540 }
0x2717   :  { %v4005_v23 = vsub.f32 1.0, %v5541_v42  ;;  %v4013_v49 = vmul.f32 %v5541_v42, %v4011_v22 }
0x277b   :  { %v4008_v1 = vpop.permute.xlu1 %4007 }
0x277c   :  { %v4010_v9 = vmul.f32 %v4008_v1, %v4005_v23 }
0x277d   :  { %v4023_v3 = vpop.permute.xlu0 %4022 }
0x277e   :  { %v4014_v29 = vadd.f32 %v4013_v49, %v4010_v9  ;;  %5030 = vmatmul.mubr.msk.f32.vlgmr.msra.gmra.mrb[34].mxu1 %vm98_vm1, %v4023_v3 }
0x277f   :  { %5051 = vmatprep.mubr.msk.f32.mxu1 %vm5561_vm0, %v5562_v4  ;;  %5283 = vmatpush3.bf16.msra.mxu1 %v5282_v13 }
0x2780   :  { %v4016_v17 = vrot.slane %v4014_v29, 4  ;;  %5284 = vmatprep.subr.bf16.mxu1 %v5560_v0 }
0x2782   :  { %v4018_v58 = vmul.f32 %v4016_v17, %v5869_v34 }
0x2783   :  { %5286 = vmatpush3.bf16.msra.mxu1 %v5285_v53 }
0x2784   :  { %v6591_v38 = vadd.f32 %v4019_v51, %v4018_v58 }
0x2786   :  { %5041 = vmatmul.mubr.msk.f32.vlgmr.msra.gmra.mrb[42].mxu0 %vm98_vm1, %v6591_v38 }
0x2787   :  { %5062 = vmatprep.mubr.msk.f32.mxu0 %vm5561_vm0, %v5562_v4  ;;  %5289 = vmatpush3.bf16.msra.mxu0 %v5288_v48 }
0x2788   :  { %5290 = vmatprep.subr.bf16.mxu0 %v5560_v0  ;;  %v4125_v0 = vrot.slane %v6579_v31, 4  ;;  %v4254_v31 = vmul.f32 %v6591_v38, %v5809_v62 }
0x278b   :  { %5292 = vmatpush3.bf16.msra.mxu0 %v5291_v20 }
0x2851   :  { %v4092_v21 = vpop.f32.mrb[34].mxu1 }
0x2852   :  { %v4106_v2 = vadd.f32 %v4092_v21, %v6205_v27  ;;  %v5031_v32 = vpop.f32.mrb[35].mxu1  ;;  %v4097_v14 = vrot.slane %v4092_v21, 4 }
0x2854   :  { %v4108_v44 = vrot.slane %v4106_v2, 4  ;;  %v4099_v12 = vadd.f32 %v5558_v63, %v4097_v14 }
0x2856   :  { %4109 = vrot.lane.b32.xlu0 %v4108_v44, %s5563_s2  ;;  %v4514_v10 = vmul.f32 -1.442695, %v4099_v12  ;;  %v19_v12 = vstv %s6663_s13 }
0x2857   :  { %20 = vst [vmem:[#allocation5] sm:$0x1] %v19_v12 }
0x2858   :  { %5542 = vpow2.f32 %v4514_v10 }
0x2859   :  { %v4210_v36 = vpop.f32.mrb[42].mxu0 }
0x285a   :  { %4216 = vrot.lane.b32.xlu1 %v4210_v36, %s5565_s5  ;;  %v5042_v15 = vpop.f32.mrb[43].mxu0  ;;  %v4233_v34 = vadd.f32 %v4210_v36, %v6313_v8 }
0x285e   :  { %4235 = vrot.lane.b32.xlu1 %v4233_v34, %s5564_s26 }
0x2862   :  { %v5543_v4 = vpop.eup %5542 }
0x2863   :  { %v4103_v25 = vadd.f32 1.0, %v5543_v4 }
0x2865   :  { %5544 = vrcp.f32 %v4103_v25 }
0x286f   :  { %v5545_v27 = vpop.eup %5544 }
0x2870   :  { %v4119_v23 = vsub.f32 1.0, %v5545_v27  ;;  %v4127_v50 = vmul.f32 %v5545_v27, %v4125_v0 }
0x28c8   :  { %v4110_v39 = vpop.permute.xlu0 %4109 }
0x28c9   :  { %v4112_v41 = vmul.f32 %v5545_v27, %v4110_v39 }
0x28cb   :  { %4114 = vrot.lane.b32.xlu0 %v4112_v41, %s5563_s2 }
0x28cc   :  { %v4217_v18 = vpop.permute.xlu1 %4216 }
0x28cd   :  { %v4219_v7 = vadd.f32 %v5559_v16, %v4217_v18  ;;  %v4226_v52 = vadd.f32 %v4217_v18, %v4214_v33 }
0x28cf   :  { %v4516_v45 = vmul.f32 -1.442695, %v4219_v7  ;;  %v4517_v42 = vmul.f32 -1.442695, %v4226_v52 }
0x28d0   :  { %v4236_v59 = vpop.permute.xlu1 %4235 }
0x28d1   :  { %5546 = vpow2.f32 %v4516_v45 }
0x28db   :  { %v5547_v8 = vpop.eup %5546 }
0x28dc   :  { %v4223_v46 = vadd.f32 1.0, %v5547_v8 }
0x28de   :  { %5548 = vrcp.f32 %v4223_v46 }
0x28e8   :  { %v5549_v54 = vpop.eup %5548 }
0x28e9   :  { %v4238_v55 = vmul.f32 %v5549_v54, %v4236_v59 }
0x28eb   :  { %4240 = vrot.lane.b32.xlu0 %v4238_v55, %s5563_s2 }
0x293d   :  { %v4115_v61 = vpop.permute.xlu0 %4114 }
0x293e   :  { %v4117_v5 = vadd.f32 %v5558_v63, %v4115_v61 }
0x2940   :  { %5550 = vtanh.f32 %v4117_v5 }
0x294a   :  { %v5551_v56 = vpop.eup %5550 }
0x294b   :  { %4121 = vrot.lane.b32.xlu1 %v5551_v56, %s5565_s5 }
0x295d   :  { %v4241_v28 = vpop.permute.xlu0 %4240 }
0x295e   :  { %v4243_v11 = vadd.f32 %v4241_v28, %v4214_v33 }
0x2960   :  { %5552 = vtanh.f32 %v4243_v11 }
0x2961   :  { %5554 = vpow2.f32 %v4517_v42 }
0x296a   :  { %v5553_v26 = vpop.eup %5552 }
0x296b   :  { %4247 = vrot.lane.b32.xlu0 %v5553_v26, %s5565_s5  ;;  %v5555_v3 = vpop.eup %5554 }
0x296c   :  { %v4230_v29 = vadd.f32 1.0, %v5555_v3 }
0x296e   :  { %5556 = vrcp.f32 %v4230_v29 }
0x296f   :  { %4137 = vrot.lane.b32.xlu0 %v4135_v30, %s5565_s5 }
0x2978   :  { %v5557_v17 = vpop.eup %5556 }
0x2979   :  { %v4245_v51 = vsub.f32 1.0, %v5557_v17  ;;  %v4251_v21 = vmul.f32 %v5557_v17, %v6591_v38  ;;  %v4520_v38 = vld [vmem:[#allocation5] ss:$0 sm:$0xff] }
0x29bd   :  { %v4122_v22 = vpop.permute.xlu1 %4121 }
0x29be   :  { %v4124_v1 = vmul.f32 %v4122_v22, %v4119_v23 }
0x29c0   :  { %v4128_v49 = vadd.f32 %v4127_v50, %v4124_v1 }
0x29c2   :  { %v4130_v9 = vrot.slane %v4128_v49, 4 }
0x29c4   :  { %4131 = vrot.lane.b32.xlu1 %v4130_v9, %s5565_s5 }
0x29dd   :  { %v4248_v58 = vpop.permute.xlu0 %4247 }
0x29de   :  { %v4250_v2 = vmul.f32 %v4248_v58, %v4245_v51 }
0x29e0   :  { %v4252_v32 = vadd.f32 %v4251_v21, %v4250_v2 }
0x29e1   :  { %v4138_v14 = vpop.permute.xlu0 %4137 }
0x29e2   :  { %v4253_v44 = vmul.f32 %v4252_v32, %v5806_v57 }
0x29e4   :  { %v4255_v36 = vadd.f32 %v4254_v31, %v4253_v44 }
0x29e6   :  { %5052 = vmatmul.mubr.msk.f32.vlgmr.msra.gmra.mrb[36].mxu1 %vm98_vm1, %v4255_v36 }
0x2a36   :  { %v4132_v15 = vpop.permute.xlu1 %4131 }
0x2a37   :  { %v4134_v34 = vmul.f32 %v4132_v15, %v5788_v43 }
0x2a39   :  { %v4140_v63 = vadd.f32 %v4138_v14, %v4134_v34 }
0x2a3b   :  { %5063 = vmatmul.mubr.msk.f32.vlgmr.msra.gmra.mrb[44].mxu0 %vm98_vm1, %v4140_v63 }
0x2ab9   :  { %v4333_v10 = vpop.f32.mrb[36].mxu1 }
0x2aba   :  { %v5053_v4 = vpop.f32.mrb[37].mxu1 }
0x2b0e   :  { %v4406_v62 = vpop.f32.mrb[44].mxu0 }
0x2b0f   :  { %v4407_v57 = vadd.f32 %v4406_v62, %v4333_v10  ;;  %v5064_v25 = vpop.f32.mrb[45].mxu0 }
0x2b11   :  { %v4417_v27 = vadd.f32 %v4520_v38, %v4407_v57 }
0x2b13   :  { %4419 = vst.msk [vmem:[%s6664_s14] sm:$0xf] %vm4418_vm13, %v4417_v27 }

</bundles_post_ra>
